<compile_context>
chip_gen: v6e
topology: v6e:2x2x1
jax: 0.10.0
libtpu: 0.0.40
codegen_flags: <defaults>
</compile_context>

<pallas_src>
import functools

import jax
import jax.numpy as jnp
from jax import lax
from jax.experimental import pallas as pl
from jax.experimental.pallas import tpu as pltpu

_LANE = 128   # channels are padded to a multiple of the TPU lane width
_GUARD = 8    # sublane-aligned guard rows before/after the padded image in scratch


def _round_up(x, m):
    return (x + m - 1) // m * m


def _basic_block_kernel(x_ref, w1_ref, w2_ref, b_ref, o_ref,
                        xpad_ref, hpad_ref, *, H, W, Cp):
    """Fused BasicBlock for one image (flattened-spatial, lane-dense layout).

    x_ref    : (1, H*W, Cp)               bf16  input image, no spatial padding
    w1_ref   : (3, Cp, 3*Cp)              bf16  conv1 weights * bn1 scale; [kw][Cin, kh*Cp+Cout]
    w2_ref   : (3, Cp, 3*Cp)              bf16  conv2 weights * bn2 scale
    b_ref    : (2, Cp)                    f32   rows = [bn1 bias, bn2 bias]
    o_ref    : (1, H*W, Cp)               f32   output
    xpad_ref : (2*GUARD + (H+2)*W, Cp)    f32   scratch: row-padded input
    hpad_ref : (2*GUARD + (H+2)*W, Cp)    f32   scratch: row-padded conv1/bn1/relu act
    """
    P = (H + 2) * W            # rows of the logically padded image
    interior = _GUARD + W      # first real image row inside the scratch buffers
    n_border = W + _GUARD      # rows to zero at the top and at the bottom

    # Spatial column of every padded row (used to mask column-wraparound reads).
    col = lax.broadcasted_iota(jnp.int32, (P, 1), 0) % W

    def zero_borders(buf_ref):
        # Only the 1-row halo (+ alignment guards) is zeroed -- the interior is fully
        # overwritten below.  Done every grid step (it is tiny) so correctness does
        # not depend on which TensorCore sees program_id == 0 under megacore split.
        buf_ref[0:interior, :] = jnp.zeros((interior, Cp), jnp.float32)
        buf_ref[interior + H * W:interior + H * W + n_border, :] = (
            jnp.zeros((n_border, Cp), jnp.float32))

    def conv3x3(src, w_ref):
        """3x3 'same' conv: 3 lane-dense MXU matmuls (kh taps fused along N)."""
        acc = jnp.zeros((H * W, Cp), jnp.float32)
        for kw in range(3):
            dw = kw - 1
            # xs[q] = padded_image[q + dw]; only dw == 0 is sublane aligned.
            xs = src[_GUARD + dw:_GUARD + dw + P, :]
            if dw == -1:    # reads that wrapped to column W-1 of the previous row
                xs = jnp.where(col != 0, xs, 0.0)
            elif dw == 1:   # reads that wrapped to column 0 of the next row
                xs = jnp.where(col != W - 1, xs, 0.0)
            # One long matmul per kw: M=(H+2)*W, K=Cp, N=3*Cp (bf16 MXU, f32 acc).
            y = jnp.dot(xs.astype(jnp.bfloat16), w_ref[kw],
                        preferred_element_type=jnp.float32)          # (P, 3*Cp)
            for kh in range(3):
                # Aligned slice-adds: row offset kh*W (W % 8 == 0), lane offset kh*Cp.
                acc = acc + y[kh * W:kh * W + H * W, kh * Cp:(kh + 1) * Cp]
        return acc

    zero_borders(xpad_ref)
    zero_borders(hpad_ref)

    x = x_ref[0].astype(jnp.float32)                 # (H*W, Cp); also the residual
    xpad_ref[interior:interior + H * W, :] = x       # aligned interior store

    # conv1 -> bn1 (scale folded into w1) -> relu
    h = jnp.maximum(conv3x3(xpad_ref[...], w1_ref) + b_ref[0:1, :], 0.0)
    hpad_ref[interior:interior + H * W, :] = h

    # conv2 -> bn2 -> + residual -> relu
    out = conv3x3(hpad_ref[...], w2_ref) + b_ref[1:2, :] + x
    o_ref[0] = jnp.maximum(out, 0.0)


def _fold_weights(w_oihw, scale, cp):
    """OIHW conv weight * per-Cout BN scale -> (kw, Cp, 3*Cp) bf16 (kh fused on N)."""
    O, I, KH, KW = w_oihw.shape
    w = w_oihw.astype(jnp.float32) * scale.astype(jnp.float32)[:, None, None, None]
    w = jnp.pad(w, ((0, cp - O), (0, cp - I), (0, 0), (0, 0)))        # (Cp, Cp, 3, 3)
    w = jnp.transpose(w, (3, 1, 2, 0)).reshape(KW, cp, KH * cp)       # [kw][Cin, kh*Cp+Cout]
    return w.astype(jnp.bfloat16)


def basic_block_pallas(x_nchw, w1_oihw, w2_oihw, scale1, bias1, scale2, bias2):
    """Runs the fused BasicBlock kernel. Input/output are NCHW (PyTorch convention)."""
    N, C, H, W = x_nchw.shape
    assert w1_oihw.shape == (C, C, 3, 3) and w2_oihw.shape == (C, C, 3, 3), (
        "only stride=1 / no-downsample BasicBlock (inplanes == planes) is supported")
    assert W % 8 == 0, "W must be a multiple of 8 (sublane alignment of flat layout)"
    # TODO(synk): stride>1 / downsample residual path not implemented.

    cp = _round_up(C, _LANE)                          # lane-dense channel count

    # NCHW -> (N, H*W, Cp) bf16; channels zero-padded so the lane axis is full.
    x = jnp.transpose(x_nchw, (0, 2, 3, 1)).astype(jnp.float32)
    x = jnp.pad(x, ((0, 0), (0, 0), (0, 0), (0, cp - C)))
    x = x.reshape(N, H * W, cp).astype(jnp.bfloat16)

    w1 = _fold_weights(w1_oihw, scale1, cp)
    w2 = _fold_weights(w2_oihw, scale2, cp)
    biases = jnp.stack([jnp.pad(bias1.astype(jnp.float32), (0, cp - C)),
                        jnp.pad(bias2.astype(jnp.float32), (0, cp - C))])   # (2, Cp)

    kernel = functools.partial(_basic_block_kernel, H=H, W=W, Cp=cp)
    pbuf = 2 * _GUARD + (H + 2) * W

    out = pl.pallas_call(
        kernel,
        out_shape=jax.ShapeDtypeStruct((N, H * W, cp), jnp.float32),
        grid_spec=pltpu.PrefetchScalarGridSpec(
            num_scalar_prefetch=0,
            grid=(N,),
            in_specs=[
                pl.BlockSpec((1, H * W, cp), lambda n: (n, 0, 0)),        # x
                pl.BlockSpec((3, cp, 3 * cp), lambda n: (0, 0, 0)),       # w1 (resident)
                pl.BlockSpec((3, cp, 3 * cp), lambda n: (0, 0, 0)),       # w2 (resident)
                pl.BlockSpec((2, cp), lambda n: (0, 0)),                  # biases
            ],
            out_specs=pl.BlockSpec((1, H * W, cp), lambda n: (n, 0, 0)),
            scratch_shapes=[pltpu.VMEM((pbuf, cp), jnp.float32),
                            pltpu.VMEM((pbuf, cp), jnp.float32)],
        ),
        compiler_params=pltpu.CompilerParams(
            dimension_semantics=("parallel",),
            vmem_limit_bytes=48 * 1024 * 1024),
    )(x, w1, w2, biases)

    out = out.reshape(N, H, W, cp)[..., :C]
    return jnp.transpose(out, (0, 3, 1, 2))           # back to NCHW


def basic_block_ref(x, w1, w2, s1, b1, s2, b2):
    """Pure-JAX f32 reference (NCHW) for correctness check."""
    dn = ('NCHW', 'OIHW', 'NCHW')
    y = lax.conv_general_dilated(x, w1, (1, 1), 'SAME', dimension_numbers=dn)
    y = y * s1[None, :, None, None] + b1[None, :, None, None]
    y = jnp.maximum(y, 0.0)
    y = lax.conv_general_dilated(y, w2, (1, 1), 'SAME', dimension_numbers=dn)
    y = y * s2[None, :, None, None] + b2[None, :, None, None]
    return jnp.maximum(y + x, 0.0)


if __name__ == "__main__":
    # Small shapes: batch=2, inplanes=planes=4, spatial=16 (stride=1, no downsample)
    N, C, H, W = 2, 4, 16, 16
    key = jax.random.PRNGKey(0)
    kx, kw1, kw2 = jax.random.split(key, 3)

    x = jax.random.normal(kx, (N, C, H, W), dtype=jnp.float32)
    # conv weights, PyTorch OIHW layout (out, in, kh, kw), bias=False
    w1 = jax.random.normal(kw1, (C, C, 3, 3), dtype=jnp.float32) * 0.1
    w2 = jax.random.normal(kw2, (C, C, 3, 3), dtype=jnp.float32) * 0.1

    # Deterministic BatchNorm parameters (inference mode), folded to scale/bias
    eps = 1e-5
    gamma1 = 1.0 + 0.1 * jnp.arange(C, dtype=jnp.float32)
    beta1 = 0.01 * jnp.arange(C, dtype=jnp.float32)
    mean1 = 0.05 * jnp.arange(C, dtype=jnp.float32)
    var1 = 1.0 + 0.1 * jnp.arange(C, dtype=jnp.float32)
    gamma2 = 1.0 - 0.05 * jnp.arange(C, dtype=jnp.float32)
    beta2 = -0.02 * jnp.arange(C, dtype=jnp.float32)
    mean2 = -0.03 * jnp.arange(C, dtype=jnp.float32)
    var2 = 1.0 + 0.2 * jnp.arange(C, dtype=jnp.float32)

    scale1 = gamma1 / jnp.sqrt(var1 + eps)
    bias1 = beta1 - mean1 * scale1
    scale2 = gamma2 / jnp.sqrt(var2 + eps)
    bias2 = beta2 - mean2 * scale2

    out = jax.block_until_ready(
        basic_block_pallas(x, w1, w2, scale1, bias1, scale2, bias2))
    ref = basic_block_ref(x, w1, w2, scale1, bias1, scale2, bias2)

    assert out.shape == (N, C, H, W)
    err = jnp.max(jnp.abs(out - ref))
    # bf16 matmul inputs with f32 accumulation -> loosened tolerance vs f32 reference
    assert jnp.allclose(out, ref, atol=2e-2, rtol=2e-2), f"max abs err = {err}"
    print("KERNEL_OK")
</pallas_src>

<mosaic_0001>
module attributes {stable_mosaic.version = 11 : i64} {
  func.func @_basic_block_kernel(%arg0: i32, %arg1: memref<1x256x128xbf16, #tpu.memory_space<vmem>>, %arg2: memref<3x128x384xbf16, #tpu.memory_space<vmem>>, %arg3: memref<3x128x384xbf16, #tpu.memory_space<vmem>>, %arg4: memref<2x128xf32, #tpu.memory_space<vmem>>, %arg5: memref<1x256x128xf32, #tpu.memory_space<vmem>>, %arg6: memref<304x128xf32, #tpu.memory_space<vmem>>, %arg7: memref<304x128xf32, #tpu.memory_space<vmem>>) attributes {dimension_semantics = [#tpu.dimension_semantics<parallel>], iteration_bounds = array<i64: 2>, scalar_prefetch = 0 : i64, scratch_operands = 2 : i64, tpu.core_type = #tpu.core_type<tc>, window_params = [{transform_indices = @transform_0, window_bounds = array<i64: 1, 256, 128>}, {pipeline_mode = #tpu.pipeline_mode<synchronous>, transform_indices = @transform_1, window_bounds = array<i64: 3, 128, 384>}, {pipeline_mode = #tpu.pipeline_mode<synchronous>, transform_indices = @transform_2, window_bounds = array<i64: 3, 128, 384>}, {pipeline_mode = #tpu.pipeline_mode<synchronous>, transform_indices = @transform_3, window_bounds = array<i64: 2, 128>}, {transform_indices = @transform_4, window_bounds = array<i64: 1, 256, 128>}]} {
    %0 = tpu.iota {dimensions = array<i32: 0>} : vector<288x1xi32>
    %c16_i32 = arith.constant 16 : i32
    %c0_i32 = arith.constant 0 : i32
    %1 = arith.cmpi eq, %c16_i32, %c0_i32 : i32
    %c1_i32 = arith.constant 1 : i32
    %2 = arith.select %1, %c1_i32, %c16_i32 : i32
    %3 = vector.broadcast %2 : i32 to vector<288x1xi32>
    %4 = arith.remsi %0, %3 : vector<288x1xi32>
    %c0_i32_0 = arith.constant 0 : i32
    %5 = vector.broadcast %c0_i32_0 : i32 to vector<288x1xi32>
    %6 = arith.cmpi ne, %4, %5 : vector<288x1xi32>
    %c0_i32_1 = arith.constant 0 : i32
    %7 = vector.broadcast %c0_i32_1 : i32 to vector<288x1xi32>
    %8 = arith.cmpi slt, %4, %7 : vector<288x1xi32>
    %c0_i32_2 = arith.constant 0 : i32
    %9 = arith.cmpi slt, %2, %c0_i32_2 : i32
    %10 = vector.broadcast %9 : i1 to vector<288x1xi1>
    %11 = vector.broadcast %10 : vector<288x1xi1> to vector<288x1xi1>
    %12 = arith.xori %8, %11 : vector<288x1xi1>
    %13 = arith.andi %12, %6 : vector<288x1xi1>
    %14 = vector.broadcast %2 : i32 to vector<288x1xi32>
    %15 = arith.addi %4, %14 : vector<288x1xi32>
    %16 = arith.select %13, %15, %4 : vector<288x1xi1>, vector<288x1xi32>
    %cst = arith.constant 0.000000e+00 : f32
    %17 = vector.broadcast %cst : f32 to vector<24x128xf32>
    %c0 = arith.constant 0 : index
    %c0_3 = arith.constant 0 : index
    %18 = vector.load %arg6[%c0, %c0_3] : memref<304x128xf32, #tpu.memory_space<vmem>>, vector<24x128xf32>
    tpu.vector_store %arg6[%c0, %c0_3], %17 {strides = array<i32>} : memref<304x128xf32, #tpu.memory_space<vmem>>, vector<24x128xf32>,
    %cst_4 = arith.constant 0.000000e+00 : f32
    %19 = vector.broadcast %cst_4 : f32 to vector<24x128xf32>
    %c280 = arith.constant 280 : index
    %c0_5 = arith.constant 0 : index
    %20 = vector.load %arg6[%c280, %c0_5] : memref<304x128xf32, #tpu.memory_space<vmem>>, vector<24x128xf32>
    tpu.vector_store %arg6[%c280, %c0_5], %19 {strides = array<i32>} : memref<304x128xf32, #tpu.memory_space<vmem>>, vector<24x128xf32>,
    %cst_6 = arith.constant 0.000000e+00 : f32
    %21 = vector.broadcast %cst_6 : f32 to vector<24x128xf32>
    %c0_7 = arith.constant 0 : index
    %c0_8 = arith.constant 0 : index
    %22 = vector.load %arg7[%c0_7, %c0_8] : memref<304x128xf32, #tpu.memory_space<vmem>>, vector<24x128xf32>
    tpu.vector_store %arg7[%c0_7, %c0_8], %21 {strides = array<i32>} : memref<304x128xf32, #tpu.memory_space<vmem>>, vector<24x128xf32>,
    %cst_9 = arith.constant 0.000000e+00 : f32
    %23 = vector.broadcast %cst_9 : f32 to vector<24x128xf32>
    %c280_10 = arith.constant 280 : index
    %c0_11 = arith.constant 0 : index
    %24 = vector.load %arg7[%c280_10, %c0_11] : memref<304x128xf32, #tpu.memory_space<vmem>>, vector<24x128xf32>
    tpu.vector_store %arg7[%c280_10, %c0_11], %23 {strides = array<i32>} : memref<304x128xf32, #tpu.memory_space<vmem>>, vector<24x128xf32>,
    %c0_12 = arith.constant 0 : index
    %c0_13 = arith.constant 0 : index
    %c0_14 = arith.constant 0 : index
    %25 = vector.load %arg1[%c0_12, %c0_13, %c0_14] : memref<1x256x128xbf16, #tpu.memory_space<vmem>>, vector<1x256x128xbf16>
    %26 = vector.shape_cast %25 : vector<1x256x128xbf16> to vector<256x128xbf16>
    %27 = arith.extf %26 : vector<256x128xbf16> to vector<256x128xf32>
    %c24 = arith.constant 24 : index
    %c0_15 = arith.constant 0 : index
    %28 = vector.load %arg6[%c24, %c0_15] : memref<304x128xf32, #tpu.memory_space<vmem>>, vector<256x128xf32>
    tpu.vector_store %arg6[%c24, %c0_15], %27 {strides = array<i32>} : memref<304x128xf32, #tpu.memory_space<vmem>>, vector<256x128xf32>,
    %c0_16 = arith.constant 0 : index
    %c0_17 = arith.constant 0 : index
    %29 = vector.load %arg6[%c0_16, %c0_17] : memref<304x128xf32, #tpu.memory_space<vmem>>, vector<304x128xf32>
    %cst_18 = arith.constant 0.000000e+00 : f32
    %30 = vector.broadcast %cst_18 : f32 to vector<256x128xf32>
    %31 = vector.extract_strided_slice %29 {offsets = [7, 0], sizes = [288, 128], strides = [1, 1]} : vector<304x128xf32> to vector<288x128xf32>
    %c0_i32_19 = arith.constant 0 : i32
    %32 = vector.broadcast %c0_i32_19 : i32 to vector<288x1xi32>
    %33 = arith.cmpi ne, %16, %32 : vector<288x1xi32>
    %cst_20 = arith.constant 0.000000e+00 : f32
    %34 = vector.shape_cast %33 : vector<288x1xi1> to vector<288x1xi1>
    %35 = vector.broadcast %34 : vector<288x1xi1> to vector<288x128xi1>
    %36 = vector.broadcast %cst_20 : f32 to vector<288x128xf32>
    %37 = arith.select %35, %31, %36 : vector<288x128xi1>, vector<288x128xf32>
    %38 = arith.truncf %37 : vector<288x128xf32> to vector<288x128xbf16>
    %c0_21 = arith.constant 0 : index
    %c0_22 = arith.constant 0 : index
    %c0_23 = arith.constant 0 : index
    %39 = vector.load %arg2[%c0_21, %c0_22, %c0_23] : memref<3x128x384xbf16, #tpu.memory_space<vmem>>, vector<1x128x384xbf16>
    %40 = vector.shape_cast %39 : vector<1x128x384xbf16> to vector<128x384xbf16>
    %cst_24 = arith.constant dense<0.000000e+00> : vector<288x384xf32>
    %41 = tpu.matmul %38, %40, %cst_24 {dimension_numbers = #tpu.dot_dimension_numbers<[1], [0], [0], [1], [0, 0, 1, 1], [], []>} : vector<288x128xbf16>, vector<128x384xbf16>, vector<288x384xf32> -> vector<288x384xf32>
    %42 = vector.extract_strided_slice %41 {offsets = [0, 0], sizes = [256, 128], strides = [1, 1]} : vector<288x384xf32> to vector<256x128xf32>
    %43 = arith.addf %30, %42 : vector<256x128xf32>
    %44 = vector.extract_strided_slice %41 {offsets = [16, 128], sizes = [256, 128], strides = [1, 1]} : vector<288x384xf32> to vector<256x128xf32>
    %45 = arith.addf %43, %44 : vector<256x128xf32>
    %46 = vector.extract_strided_slice %41 {offsets = [32, 256], sizes = [256, 128], strides = [1, 1]} : vector<288x384xf32> to vector<256x128xf32>
    %47 = arith.addf %45, %46 : vector<256x128xf32>
    %48 = vector.extract_strided_slice %29 {offsets = [8, 0], sizes = [288, 128], strides = [1, 1]} : vector<304x128xf32> to vector<288x128xf32>
    %49 = arith.truncf %48 : vector<288x128xf32> to vector<288x128xbf16>
    %c1 = arith.constant 1 : index
    %c0_25 = arith.constant 0 : index
    %c0_26 = arith.constant 0 : index
    %50 = vector.load %arg2[%c1, %c0_25, %c0_26] : memref<3x128x384xbf16, #tpu.memory_space<vmem>>, vector<1x128x384xbf16>
    %51 = vector.shape_cast %50 : vector<1x128x384xbf16> to vector<128x384xbf16>
    %cst_27 = arith.constant dense<0.000000e+00> : vector<288x384xf32>
    %52 = tpu.matmul %49, %51, %cst_27 {dimension_numbers = #tpu.dot_dimension_numbers<[1], [0], [0], [1], [0, 0, 1, 1], [], []>} : vector<288x128xbf16>, vector<128x384xbf16>, vector<288x384xf32> -> vector<288x384xf32>
    %53 = vector.extract_strided_slice %52 {offsets = [0, 0], sizes = [256, 128], strides = [1, 1]} : vector<288x384xf32> to vector<256x128xf32>
    %54 = arith.addf %47, %53 : vector<256x128xf32>
    %55 = vector.extract_strided_slice %52 {offsets = [16, 128], sizes = [256, 128], strides = [1, 1]} : vector<288x384xf32> to vector<256x128xf32>
    %56 = arith.addf %54, %55 : vector<256x128xf32>
    %57 = vector.extract_strided_slice %52 {offsets = [32, 256], sizes = [256, 128], strides = [1, 1]} : vector<288x384xf32> to vector<256x128xf32>
    %58 = arith.addf %56, %57 : vector<256x128xf32>
    %59 = vector.extract_strided_slice %29 {offsets = [9, 0], sizes = [288, 128], strides = [1, 1]} : vector<304x128xf32> to vector<288x128xf32>
    %c15_i32 = arith.constant 15 : i32
    %60 = vector.broadcast %c15_i32 : i32 to vector<288x1xi32>
    %61 = arith.cmpi ne, %16, %60 : vector<288x1xi32>
    %cst_28 = arith.constant 0.000000e+00 : f32
    %62 = vector.shape_cast %61 : vector<288x1xi1> to vector<288x1xi1>
    %63 = vector.broadcast %62 : vector<288x1xi1> to vector<288x128xi1>
    %64 = vector.broadcast %cst_28 : f32 to vector<288x128xf32>
    %65 = arith.select %63, %59, %64 : vector<288x128xi1>, vector<288x128xf32>
    %66 = arith.truncf %65 : vector<288x128xf32> to vector<288x128xbf16>
    %c2 = arith.constant 2 : index
    %c0_29 = arith.constant 0 : index
    %c0_30 = arith.constant 0 : index
    %67 = vector.load %arg2[%c2, %c0_29, %c0_30] : memref<3x128x384xbf16, #tpu.memory_space<vmem>>, vector<1x128x384xbf16>
    %68 = vector.shape_cast %67 : vector<1x128x384xbf16> to vector<128x384xbf16>
    %cst_31 = arith.constant dense<0.000000e+00> : vector<288x384xf32>
    %69 = tpu.matmul %66, %68, %cst_31 {dimension_numbers = #tpu.dot_dimension_numbers<[1], [0], [0], [1], [0, 0, 1, 1], [], []>} : vector<288x128xbf16>, vector<128x384xbf16>, vector<288x384xf32> -> vector<288x384xf32>
    %70 = vector.extract_strided_slice %69 {offsets = [0, 0], sizes = [256, 128], strides = [1, 1]} : vector<288x384xf32> to vector<256x128xf32>
    %71 = arith.addf %58, %70 : vector<256x128xf32>
    %72 = vector.extract_strided_slice %69 {offsets = [16, 128], sizes = [256, 128], strides = [1, 1]} : vector<288x384xf32> to vector<256x128xf32>
    %73 = arith.addf %71, %72 : vector<256x128xf32>
    %74 = vector.extract_strided_slice %69 {offsets = [32, 256], sizes = [256, 128], strides = [1, 1]} : vector<288x384xf32> to vector<256x128xf32>
    %75 = arith.addf %73, %74 : vector<256x128xf32>
    %c0_32 = arith.constant 0 : index
    %c0_33 = arith.constant 0 : index
    %76 = vector.load %arg4[%c0_32, %c0_33] : memref<2x128xf32, #tpu.memory_space<vmem>>, vector<1x128xf32>
    %77 = vector.broadcast %76 : vector<1x128xf32> to vector<256x128xf32>
    %78 = arith.addf %75, %77 : vector<256x128xf32>
    %cst_34 = arith.constant 0.000000e+00 : f32
    %79 = vector.broadcast %cst_34 : f32 to vector<256x128xf32>
    %80 = arith.maximumf %78, %79 : vector<256x128xf32>
    %c24_35 = arith.constant 24 : index
    %c0_36 = arith.constant 0 : index
    %81 = vector.load %arg7[%c24_35, %c0_36] : memref<304x128xf32, #tpu.memory_space<vmem>>, vector<256x128xf32>
    tpu.vector_store %arg7[%c24_35, %c0_36], %80 {strides = array<i32>} : memref<304x128xf32, #tpu.memory_space<vmem>>, vector<256x128xf32>,
    %c0_37 = arith.constant 0 : index
    %c0_38 = arith.constant 0 : index
    %82 = vector.load %arg7[%c0_37, %c0_38] : memref<304x128xf32, #tpu.memory_space<vmem>>, vector<304x128xf32>
    %cst_39 = arith.constant 0.000000e+00 : f32
    %83 = vector.broadcast %cst_39 : f32 to vector<256x128xf32>
    %84 = vector.extract_strided_slice %82 {offsets = [7, 0], sizes = [288, 128], strides = [1, 1]} : vector<304x128xf32> to vector<288x128xf32>
    %c0_i32_40 = arith.constant 0 : i32
    %85 = vector.broadcast %c0_i32_40 : i32 to vector<288x1xi32>
    %86 = arith.cmpi ne, %16, %85 : vector<288x1xi32>
    %cst_41 = arith.constant 0.000000e+00 : f32
    %87 = vector.shape_cast %86 : vector<288x1xi1> to vector<288x1xi1>
    %88 = vector.broadcast %87 : vector<288x1xi1> to vector<288x128xi1>
    %89 = vector.broadcast %cst_41 : f32 to vector<288x128xf32>
    %90 = arith.select %88, %84, %89 : vector<288x128xi1>, vector<288x128xf32>
    %91 = arith.truncf %90 : vector<288x128xf32> to vector<288x128xbf16>
    %c0_42 = arith.constant 0 : index
    %c0_43 = arith.constant 0 : index
    %c0_44 = arith.constant 0 : index
    %92 = vector.load %arg3[%c0_42, %c0_43, %c0_44] : memref<3x128x384xbf16, #tpu.memory_space<vmem>>, vector<1x128x384xbf16>
    %93 = vector.shape_cast %92 : vector<1x128x384xbf16> to vector<128x384xbf16>
    %cst_45 = arith.constant dense<0.000000e+00> : vector<288x384xf32>
    %94 = tpu.matmul %91, %93, %cst_45 {dimension_numbers = #tpu.dot_dimension_numbers<[1], [0], [0], [1], [0, 0, 1, 1], [], []>} : vector<288x128xbf16>, vector<128x384xbf16>, vector<288x384xf32> -> vector<288x384xf32>
    %95 = vector.extract_strided_slice %94 {offsets = [0, 0], sizes = [256, 128], strides = [1, 1]} : vector<288x384xf32> to vector<256x128xf32>
    %96 = arith.addf %83, %95 : vector<256x128xf32>
    %97 = vector.extract_strided_slice %94 {offsets = [16, 128], sizes = [256, 128], strides = [1, 1]} : vector<288x384xf32> to vector<256x128xf32>
    %98 = arith.addf %96, %97 : vector<256x128xf32>
    %99 = vector.extract_strided_slice %94 {offsets = [32, 256], sizes = [256, 128], strides = [1, 1]} : vector<288x384xf32> to vector<256x128xf32>
    %100 = arith.addf %98, %99 : vector<256x128xf32>
    %101 = vector.extract_strided_slice %82 {offsets = [8, 0], sizes = [288, 128], strides = [1, 1]} : vector<304x128xf32> to vector<288x128xf32>
    %102 = arith.truncf %101 : vector<288x128xf32> to vector<288x128xbf16>
    %c1_46 = arith.constant 1 : index
    %c0_47 = arith.constant 0 : index
    %c0_48 = arith.constant 0 : index
    %103 = vector.load %arg3[%c1_46, %c0_47, %c0_48] : memref<3x128x384xbf16, #tpu.memory_space<vmem>>, vector<1x128x384xbf16>
    %104 = vector.shape_cast %103 : vector<1x128x384xbf16> to vector<128x384xbf16>
    %cst_49 = arith.constant dense<0.000000e+00> : vector<288x384xf32>
    %105 = tpu.matmul %102, %104, %cst_49 {dimension_numbers = #tpu.dot_dimension_numbers<[1], [0], [0], [1], [0, 0, 1, 1], [], []>} : vector<288x128xbf16>, vector<128x384xbf16>, vector<288x384xf32> -> vector<288x384xf32>
    %106 = vector.extract_strided_slice %105 {offsets = [0, 0], sizes = [256, 128], strides = [1, 1]} : vector<288x384xf32> to vector<256x128xf32>
    %107 = arith.addf %100, %106 : vector<256x128xf32>
    %108 = vector.extract_strided_slice %105 {offsets = [16, 128], sizes = [256, 128], strides = [1, 1]} : vector<288x384xf32> to vector<256x128xf32>
    %109 = arith.addf %107, %108 : vector<256x128xf32>
    %110 = vector.extract_strided_slice %105 {offsets = [32, 256], sizes = [256, 128], strides = [1, 1]} : vector<288x384xf32> to vector<256x128xf32>
    %111 = arith.addf %109, %110 : vector<256x128xf32>
    %112 = vector.extract_strided_slice %82 {offsets = [9, 0], sizes = [288, 128], strides = [1, 1]} : vector<304x128xf32> to vector<288x128xf32>
    %c15_i32_50 = arith.constant 15 : i32
    %113 = vector.broadcast %c15_i32_50 : i32 to vector<288x1xi32>
    %114 = arith.cmpi ne, %16, %113 : vector<288x1xi32>
    %cst_51 = arith.constant 0.000000e+00 : f32
    %115 = vector.shape_cast %114 : vector<288x1xi1> to vector<288x1xi1>
    %116 = vector.broadcast %115 : vector<288x1xi1> to vector<288x128xi1>
    %117 = vector.broadcast %cst_51 : f32 to vector<288x128xf32>
    %118 = arith.select %116, %112, %117 : vector<288x128xi1>, vector<288x128xf32>
    %119 = arith.truncf %118 : vector<288x128xf32> to vector<288x128xbf16>
    %c2_52 = arith.constant 2 : index
    %c0_53 = arith.constant 0 : index
    %c0_54 = arith.constant 0 : index
    %120 = vector.load %arg3[%c2_52, %c0_53, %c0_54] : memref<3x128x384xbf16, #tpu.memory_space<vmem>>, vector<1x128x384xbf16>
    %121 = vector.shape_cast %120 : vector<1x128x384xbf16> to vector<128x384xbf16>
    %cst_55 = arith.constant dense<0.000000e+00> : vector<288x384xf32>
    %122 = tpu.matmul %119, %121, %cst_55 {dimension_numbers = #tpu.dot_dimension_numbers<[1], [0], [0], [1], [0, 0, 1, 1], [], []>} : vector<288x128xbf16>, vector<128x384xbf16>, vector<288x384xf32> -> vector<288x384xf32>
    %123 = vector.extract_strided_slice %122 {offsets = [0, 0], sizes = [256, 128], strides = [1, 1]} : vector<288x384xf32> to vector<256x128xf32>
    %124 = arith.addf %111, %123 : vector<256x128xf32>
    %125 = vector.extract_strided_slice %122 {offsets = [16, 128], sizes = [256, 128], strides = [1, 1]} : vector<288x384xf32> to vector<256x128xf32>
    %126 = arith.addf %124, %125 : vector<256x128xf32>
    %127 = vector.extract_strided_slice %122 {offsets = [32, 256], sizes = [256, 128], strides = [1, 1]} : vector<288x384xf32> to vector<256x128xf32>
    %128 = arith.addf %126, %127 : vector<256x128xf32>
    %c1_56 = arith.constant 1 : index
    %c0_57 = arith.constant 0 : index
    %129 = vector.load %arg4[%c1_56, %c0_57] : memref<2x128xf32, #tpu.memory_space<vmem>>, vector<1x128xf32>
    %130 = vector.broadcast %129 : vector<1x128xf32> to vector<256x128xf32>
    %131 = arith.addf %128, %130 : vector<256x128xf32>
    %132 = arith.addf %131, %27 : vector<256x128xf32>
    %cst_58 = arith.constant 0.000000e+00 : f32
    %133 = vector.broadcast %cst_58 : f32 to vector<256x128xf32>
    %134 = arith.maximumf %132, %133 : vector<256x128xf32>
    %c0_59 = arith.constant 0 : index
    %c0_60 = arith.constant 0 : index
    %c0_61 = arith.constant 0 : index
    %135 = vector.load %arg5[%c0_59, %c0_60, %c0_61] : memref<1x256x128xf32, #tpu.memory_space<vmem>>, vector<1x256x128xf32>
    %136 = vector.shape_cast %135 : vector<1x256x128xf32> to vector<256x128xf32>
    %137 = vector.shape_cast %134 : vector<256x128xf32> to vector<1x256x128xf32>
    tpu.vector_store %arg5[%c0_59, %c0_60, %c0_61], %137 {strides = array<i32>} : memref<1x256x128xf32, #tpu.memory_space<vmem>>, vector<1x256x128xf32>,
    return
  }
  func.func @transform_0(%arg0: i32) -> (i32, i32, i32) {
    %c0_i32 = arith.constant 0 : i32
    %c0_i32_0 = arith.constant 0 : i32
    %c0_i32_1 = arith.constant 0 : i32
    return %arg0, %c0_i32, %c0_i32_0 : i32, i32, i32
  }
  func.func @transform_1(%arg0: i32) -> (i32, i32, i32) {
    %c0_i32 = arith.constant 0 : i32
    %c0_i32_0 = arith.constant 0 : i32
    %c0_i32_1 = arith.constant 0 : i32
    %c0_i32_2 = arith.constant 0 : i32
    return %c0_i32, %c0_i32_0, %c0_i32_1 : i32, i32, i32
  }
  func.func @transform_2(%arg0: i32) -> (i32, i32, i32) {
    %c0_i32 = arith.constant 0 : i32
    %c0_i32_0 = arith.constant 0 : i32
    %c0_i32_1 = arith.constant 0 : i32
    %c0_i32_2 = arith.constant 0 : i32
    return %c0_i32, %c0_i32_0, %c0_i32_1 : i32, i32, i32
  }
  func.func @transform_3(%arg0: i32) -> (i32, i32) {
    %c0_i32 = arith.constant 0 : i32
    %c0_i32_0 = arith.constant 0 : i32
    %c0_i32_1 = arith.constant 0 : i32
    return %c0_i32, %c0_i32_0 : i32, i32
  }
  func.func @transform_4(%arg0: i32) -> (i32, i32, i32) {
    %c0_i32 = arith.constant 0 : i32
    %c0_i32_0 = arith.constant 0 : i32
    %c0_i32_1 = arith.constant 0 : i32
    return %arg0, %c0_i32, %c0_i32_0 : i32, i32, i32
  }
}

</mosaic_0001>

<bundles_post_ra>
// kernel: tpu_custom_call.1
= control target key start
LH: loop header
LB: loop body
LE: loop exit
PB: predicated region body
PF: predicated region fallthrough
CT: control target
= control target key end

     0   :  { %9 = vsyncpa [#allocation5], 0  ;;  %s10195_s0 = inlined_call_operand.hbm [shape: bf16[2,256,128], index: 0, kind: input, shape index: {}]   ;;  %s10196_s1 = inlined_call_operand.hbm [shape: bf16[3,128,384], index: 1, kind: input, shape index: {}]   ;;  %s10197_s2 = inlined_call_operand.hbm [shape: bf16[3,128,384], index: 2, kind: input, shape index: {}]   ;;  %s10198_s3 = inlined_call_operand.vmem [shape: f32[2,128], index: 3, kind: input, shape index: {}]   ;;  %s10199_s4 = inlined_call_operand.hbm [shape: f32[2,256,128], index: 4, kind: output, shape index: {}]  }
   0x1   :  { %11 = vsyncpa [#allocation5 + $0x1], 0 }
   0x2   :  { %12 = vsyncpa [#allocation8], 0 }
   0x3   :  { %13 = vsyncpa [#allocation6], 0 }
   0x4   :  { %15 = vsyncpa [#allocation6 + $0x1], 0  ;;  %s7637_s15 = smov 0   ;;  %s7639_s16 = smov 0  }
   0x5   :  { %s7641_s17 = smov 0   ;;  %s7643_s18 = smov 0  }
   0x6 LB: > { %s7658_s19 = sadd.s32 4294967295, %s7596_s18   ;;  %s6029_s20 = sadd.s32 4294967294, %s7596_s18   ;;  %s7596_s18 = sphi %s7643_s18, %s10850_s18   ;;  %s7592_s17 = sphi %s7641_s17, %s10849_s17   ;;  %s7588_s16 = sphi %s7639_s16, %s10848_s16   ;;  %s7584_s15 = sphi %s7637_s15, %s10847_s15  }
   0x7   : > { %p41_p0 = scmp.ne.s32.totalorder %s7588_s16, %s7584_s15  ;;  %p10200_p1 = scmp.eq.s32.totalorder %s7658_s19, 0 }
   0x8   : > { %p134_p3 = scmp.eq.s32.totalorder %s6029_s20, 1  ;;  %p6030_p5 = scmp.ge.s32.totalorder %s7596_s18, 1 }
   0x9   : > { %p7667_p4 = por %p10200_p1, %p41_p0  ;;  %p141_p7 = scmp.lt.s32.totalorder %s7596_s18, 3 }
   0xa   : > { %p7672_p6 = por %p134_p3, %p41_p0  ;;  %s7598_s24 = smov [#allocation7]  }
   0xb   : > { %s10399_s21 = scalar_select %p7667_p4, 1, 0 }
   0xc   : > { %s10400_s22 = scalar_select %p7672_p6, 1, 0 }
   0xd   : > { %p7677_p8 = pnand %p6030_p5, %p141_p7  ;;  %s153_s25 = sshll.u32 %s7598_s24, 4  ;;  %s154_s25 = int_to_ptr.vmem [resolvable:$true] %s153_s25 }
   0xe   : > { %s7599_s27 = smov [#allocation9]   ;;  %s7459_s29 = scalar_lea.vmem %s154_s25, 9216 }
   0xf   : > { %s10401_s23 = scalar_select %p7677_p8, 1, 0 }
  0x10   : > { %p7186_p9 = pneg %p7677_p8  ;;  %s166_s28 = sshll.u32 %s7599_s27, 4  ;;  %s167_s28 = int_to_ptr.vmem [resolvable:$true] %s166_s28 }
  0x11   : > { %p7460_p13 = scmp.ne.s32.totalorder %s154_s25, %s7459_s29  ;;  %p7467_p5 = scmp.lt.s32.totalorder %s154_s25, %s154_s25 }
  0x12   : > { %p7686_p11 = pnand %p7186_p9, %p10200_p1  ;;  %p7468_p7 = scmp.lt.s32.totalorder %s7459_s29, %s7459_s29 }
  0x14   : > { %p7450_p12 = pneg %p7686_p11  ;;  %p7469_p10 = por %p7468_p7, %p7467_p5 }
  0x16   : > { %p7462_p0 = pnand %p7460_p13, %p7450_p12 }
  0x18   : > { %p7463_p3 = pneg %p7462_p0 }
  0x1a   : > { %p7470_p9 = pnand %p7469_p10, %p7463_p3 }
  0x1c   : > { %7473 = shalt.err (!%p7470_p9)
}
  0x1d   : > { %s7600_s30 = smov 192   ;;  %s7601_s5 = smov 12  }
  0x1e   : > { %7189 = dma.hbm_to_vmem [thread:$0]  (!%p7686_p11), %s10196_s1, 9216, %s154_s25, [#allocation8], %s7600_s30, %s7600_s30, %s7601_s5  }
  0x1f   : > { %s7485_s8 = scalar_lea.vmem %s167_s28, 9216  ;;  %p7493_p2 = scmp.lt.s32.totalorder %s167_s28, %s167_s28 }
  0x20   : > { %p7486_p1 = scmp.ne.s32.totalorder %s167_s28, %s7485_s8  ;;  %p7494_p6 = scmp.lt.s32.totalorder %s7485_s8, %s7485_s8 }
  0x22   : > { %p7488_p13 = pnand %p7486_p1, %p7450_p12  ;;  %p7495_p5 = por %p7494_p6, %p7493_p2 }
  0x24   : > { %p7489_p0 = pneg %p7488_p13 }
  0x26   : > { %p7496_p10 = pnand %p7495_p5, %p7489_p0 }
  0x28   : > { %7499 = shalt.err (!%p7496_p10)
}
  0x29   : > { %7192 = dma.hbm_to_vmem [thread:$0]  (!%p7686_p11), %s10197_s2, 9216, %s167_s28, [#allocation8], %s7600_s30, %s7600_s30, %s7601_s5  }
  0x2a   : > { %s7709_s11 = sadd.s32 1, %s7596_s18   ;;  %s28_s12 = sadd.s32 1, %s7592_s17 }
  0x2b   : > { %s25_s13 = ssub.s32 %s7596_s18, %s7709_s11  ;;  %p35_p1 = scmp.ne.s32.totalorder %s7592_s17, %s7588_s16 }
  0x2c   : > { %p26_p2 = scmp.eq.s32.totalorder %s25_s13, 0  ;;  %p36_p6 = scmp.eq.s32.totalorder %s7596_s18, 0 }
  0x2d   : > { %p10403_p12 = scmp.eq.s32.totalorder %s7658_s19, 1  ;;  %p7203_p7 = scmp.lt.s32.totalorder %s7596_s18, 2 }
  0x2e   : > { %s7725_s20 = scalar_select %p26_p2, %s7592_s17, %s28_s12  }
  0x2f   : > { %p7719_p3 = por %p10403_p12, %p35_p1  ;;  %p37_p9 = por %p36_p6, %p35_p1 }
  0x30   : > { %s183_s24 = sand.u32 1, %s7592_s17   ;;  %s6625_s26 = sshll.u32 %s7596_s18, 11 }
  0x31   : > { %s10404_s14 = scalar_select %p7719_p3, 1, 0 }
  0x32   : > { %s6034_s25 = sshll.u32 %s183_s24, 7  ;;  %s7732_s29 = scalar_lea.hbm %s10195_s0, %s6625_s26 }
  0x33   : > { %s187_s30 = scalar_lea.vmem [#allocation4], %s6034_s25  ;;  %p7736_p11 = pnand %p7203_p7, %p37_p9 }
  0x34   : > { %s194_s5 = sshll.u32 %s187_s30, 4  ;;  %s7740_s7 = scalar_lea.sflag [#allocation5], %s183_s24  ;;  %s7734_s5 = int_to_ptr.vmem [resolvable:$true] %s194_s5 }
  0x35   : > { %s7500_s8 = scalar_lea.hbm %s7732_s29, 2048  ;;  %p7502_p0 = pneg %p7736_p11 }
  0x36   : > { %p7501_p13 = scmp.ne.s32.totalorder %s7732_s29, %s7500_s8  ;;  %s7505_s12 = scalar_lea.hbm %s10195_s0, 4096 }
  0x37   : > { %p7506_p1 = scmp.lt.s32.totalorder %s7732_s29, %s10195_s0  ;;  %p7507_p2 = scmp.lt.s32.totalorder %s7505_s12, %s7500_s8 }
  0x38   : > { %p7503_p5 = pnand %p7502_p0, %p7501_p13 }
  0x39   : > { %p7508_p6 = por %p7507_p2, %p7506_p1 }
  0x3a   : > { %p7504_p10 = pneg %p7503_p5 }
  0x3c   : > { %p7509_p12 = pnand %p7508_p6, %p7504_p10 }
  0x3e   : > { %7512 = shalt.err (!%p7509_p12)
}
  0x3f   : > { %s7513_s24 = scalar_lea.vmem %s7734_s5, 2048  ;;  %s7602_s26 = smov [#allocation4]  }
  0x40   : > { %p7514_p7 = scmp.ne.s32.totalorder %s7734_s5, %s7513_s24  ;;  %s7518_s27 = sshll.u32 %s7602_s26, 4  ;;  %s7519_s27 = int_to_ptr.vmem [resolvable:$false] %s7518_s27 }
  0x41   : > { %s7520_s28 = scalar_lea.vmem %s7519_s27, 4096  ;;  %p7521_p5 = scmp.lt.s32.totalorder %s7734_s5, %s7519_s27 }
  0x42   : > { %p7516_p9 = pnand %p7514_p7, %p7502_p0  ;;  %p7522_p3 = scmp.lt.s32.totalorder %s7520_s28, %s7513_s24 }
  0x44   : > { %p7517_p13 = pneg %p7516_p9  ;;  %p7523_p4 = por %p7522_p3, %p7521_p5 }
  0x46   : > { %p7524_p8 = pnand %p7523_p4, %p7517_p13 }
  0x48   : > { %7527 = shalt.err (!%p7524_p8)
}
  0x49   : > { %s7603_s30 = smov 64   ;;  %s7604_s8 = smov 4  }
  0x4a   : > { %7196 = dma.hbm_to_vmem [thread:$0]  (!%p7736_p11), %s7732_s29, 2048, %s7734_s5, %s7740_s7, %s7603_s30, %s7603_s30, %s7604_s8  }
  0x4b   : > { %p10406_p0 = scmp.ne.s32.totalorder %s10401_s23, 0 }
  0x4d   : > { %206 = sbr.rel (%p10406_p0) target bundleno = 1119 (0x45f), region = 36 }
  0x52   : > { %s7764_s9 = sand.u32 1, %s7588_s16   ;;  %p10407_p4 = scmp.ne.s32.totalorder %s10399_s21, 0 }
  0x53   : > { %s6038_s10 = sshll.u32 %s7764_s9, 7  ;;  %s209_s12 = scalar_lea.sflag [#allocation5], %s7764_s9 }
  0x54   : > { %s7768_s13 = scalar_lea.vmem [#allocation4], %s6038_s10 }
  0x55   : > { %7571 = dma.done.wait (%p10407_p4), %s209_s12, 2048  }
  0x56   : > { %7573 = vsyncadd (%p10407_p4), %s209_s12, 4294965248  ;;  %p10408_p8 = scmp.eq.s32.totalorder %s7658_s19, 0 }
  0x58   : > { %7575 = dma.done.wait (%p10408_p8), [#allocation8], 18432   ;;  %p10409_p3 = pmov %p10408_p8 }
  0x59   : > { %v10205_v0 = vmov 0   ;;  %v7251_v1 = vld [vmem:[#allocation7 + $0xac] ss:$12 sps:$4 sm:$0xff]   ;;  %v7253_v2 = vld [vmem:[#allocation7 + $0xb0] ss:$12 sps:$4 sm:$0xff]   ;;  %v246_v4 = vlaneseq  ;;  %v10204_v15 = vmov 0.0  }
  0x5a   : > { %7577 = vsyncadd (%p10409_p3), [#allocation8], 4294948864  ;;  %1362 = vmatprep.mubr.bf16.mxu0 %v10205_v0  ;;  %1330 = vmatprep.subr.bf16.mxu0 %v7251_v1  ;;  %v7254_v3 = vld [vmem:[#allocation7 + $0xa8] ss:$12 sps:$4 sm:$0xff]   ;;  %v7257_v6 = vld [vmem:[#allocation7 + $0x98] ss:$12 sps:$4 sm:$0xff]  }
  0x5b   : > { %6862 = vmatprep.subr.bf16.mxu1 %v7253_v2  ;;  %v7255_v5 = vld [vmem:[#allocation7 + $0x94] ss:$12 sps:$4 sm:$0xff]   ;;  %1331 = vmatpush1.bf16.msra.mxu0 %v7254_v3  ;;  %v7258_v7 = vld [vmem:[#allocation7 + $0x90] ss:$12 sps:$4 sm:$0xff]   ;;  %v7779_v10 = vshrl.u32 %v246_v4, 7  ;;  %v7783_v16 = vrot.slane %v10204_v15, 7 }
  0x5c   : > { %6863 = vmatpush3.bf16.msra.mxu1 %v7253_v2  ;;  %1332 = vmatprep.subr.bf16.mxu0 %v7255_v5  ;;  %v7259_v8 = vld [vmem:[#allocation7 + $0x7c] ss:$12 sps:$4 sm:$0xff]   ;;  %v7261_v9 = vld [vmem:[#allocation7 + $0x80] ss:$12 sps:$4 sm:$0xff]   ;;  %v7262_v11 = vld [vmem:[#allocation7 + $0x78] ss:$12 sps:$4 sm:$0xff]  }
  0x5d   : > { %6864 = vmatprep.subr.bf16.mxu1 %v7257_v6  ;;  %v7263_v12 = vld [vmem:[#allocation7 + $0x64] ss:$12 sps:$4 sm:$0xff]   ;;  %v7265_v13 = vld [vmem:[#allocation7 + $0x68] ss:$12 sps:$4 sm:$0xff]   ;;  %v287_v14 = vand.u32 15, %v7779_v10  ;;  %10410 = vst [vmem:[#allocation14_spill] sm:$0xff] %v7783_v16  ;;  %v7787_v21 = vpack.c.bf16 %v7783_v16, %v7783_v16 }
  0x5e   : > { %v7266_v17 = vld [vmem:[#allocation7 + $0x60] ss:$12 sps:$4 sm:$0xff]   ;;  %v7269_v19 = vld [vmem:[#allocation7 + $0x50] ss:$12 sps:$4 sm:$0xff]   ;;  %v7270_v20 = vld [vmem:[#allocation7 + $0x48] ss:$12 sps:$4 sm:$0xff]  }
  0x5f   : > { %1333 = vmatpush1.bf16.msra.mxu0 %v7258_v7  ;;  %v7267_v18 = vld [vmem:[#allocation7 + $0x4c] ss:$12 sps:$4 sm:$0xff]   ;;  %vm861_vm0 = vcmp.ne.s32.totalorder %v287_v14, 0  ;;  %10411 = vst [vmem:[#allocation15_spill] sm:$0xff] %v7787_v21  ;;  %v7271_v22 = vld [vmem:[#allocation7 + $0x34] ss:$12 sps:$4 sm:$0xff]  }
  0x60   : > { %6865 = vmatpush3.bf16.msra.mxu1 %v7257_v6  ;;  %1334 = vmatprep.subr.bf16.mxu0 %v7259_v8  ;;  %v7273_v23 = vld [vmem:[#allocation7 + $0x38] ss:$12 sps:$4 sm:$0xff]   ;;  %vm10254_vm1 = vmmov 1   ;;  %v10412_v24 = vmov 0  ;;  %v249_v25 = vadd.s32 16, %v7779_v10  ;;  %v251_v32 = vadd.s32 32, %v7779_v10 }
  0x61   : > { %6866 = vmatprep.subr.bf16.mxu1 %v7261_v9  ;;  %vm7790_vm2 = vmpackc.low %vm10254_vm1, %vm861_vm0  ;;  %v7799_v26 = vld [vmem:[%s7768_s13] sm:$0xff]   ;;  %v7274_v27 = vld [vmem:[#allocation7 + $0x30] ss:$12 sps:$4 sm:$0xff]   ;;  %vm10249_vm3 = vcmask 1040384   ;;  %v253_v37 = vadd.s32 48, %v7779_v10  ;;  %v255_v47 = vadd.s32 64, %v7779_v10 }
  0x62   : > { %v10413_v24 = vsel %vm7790_vm2, 4294967295, %v10412_v24  ;;  %6878 = vmatprep.mubr.msk.bf16.mxu1 %vm7790_vm2, %v7787_v21  ;;  %v7802_v28 = vunpack.c.l.bf16 %v7799_v26  ;;  %v7805_v29 = vunpack.c.h.bf16 %v7799_v26  ;;  %v7275_v30 = vld [vmem:[#allocation7 + $0x1c] ss:$12 sps:$4 sm:$0xff]   ;;  %v7277_v31 = vld [vmem:[#allocation7 + $0x20] ss:$12 sps:$4 sm:$0xff]   ;;  %v301_v34 = vand.u32 15, %v249_v25 }
  0x63   : > { %1335 = vmatpush1.bf16.msra.mxu0 %v7262_v11  ;;  %10414 = vst [vmem:[#allocation16_spill] sm:$0xff] %v10413_v24  ;;  %v7809_v33 = vld [vmem:[%s7768_s13 + $0x8] sm:$0xff]   ;;  %v7278_v38 = vld [vmem:[#allocation7 + $0x18] ss:$12 sps:$4 sm:$0xff]   ;;  %v315_v43 = vand.u32 15, %v251_v32  ;;  %v7821_v44 = vld [vmem:[%s7768_s13 + $0x10] sm:$0xff]  }
  0x64   : > { %6867 = vmatpush3.bf16.msra.mxu1 %v7261_v9  ;;  %1336 = vmatprep.subr.bf16.mxu0 %v7263_v12  ;;  %10415 = vst [vmem:[#allocation17_spill] sm:$0xff] %v7802_v28  ;;  %10416 = vst [vmem:[#allocation18_spill] sm:$0xff] %v7805_v29  ;;  %v7812_v35 = vunpack.c.l.bf16 %v7809_v33  ;;  %v7815_v36 = vunpack.c.h.bf16 %v7809_v33  ;;  %v7279_v39 = vld [vmem:[#allocation7 + $0x4] ss:$12 sps:$4 sm:$0xff]   ;;  %v1012_v40 = vrot.slane %v7802_v28, 7  ;;  %v1014_v41 = vrot.slane %v7805_v29, 7 }
  0x65   : > { %6868 = vmatprep.subr.bf16.mxu1 %v7265_v13  ;;  %v7281_v42 = vld [vmem:[#allocation7 + $0x8] ss:$12 sps:$4 sm:$0xff]   ;;  %v7827_v48 = vld [vmem:[%s7768_s13 + $0x18] sm:$0xff]   ;;  %vm7829_vm4 = vcmp.ne.s32.totalorder %v301_v34, 0  ;;  %v329_v50 = vand.u32 15, %v253_v37  ;;  %v257_v51 = vadd.s32 80, %v7779_v10  ;;  %v7838_v55 = vunpack.c.l.bf16 %v7821_v44 }
  0x66   : > { %10417 = vst [vmem:[#allocation19_spill] sm:$0xff] %v7812_v35  ;;  %10418 = vst [vmem:[#allocation20_spill] sm:$0xff] %v7815_v36  ;;  %v1016_v45 = vrot.slane %v7812_v35, 7  ;;  %v1018_v46 = vrot.slane %v7815_v36, 7  ;;  %v7282_v52 = vld [vmem:[#allocation7] ss:$12 sps:$4 sm:$0xff]   ;;  %v1013_v53 = vsel %vm10249_vm3, %v7783_v16, %v1012_v40  ;;  %v1015_v54 = vsel %vm10249_vm3, %v1012_v40, %v1014_v41 }
  0x67   : > { %1337 = vmatpush1.bf16.msra.mxu0 %v7266_v17  ;;  %10421 = vst [vmem:[#allocation21_spill] sm:$0xff] %v7838_v55  ;;  %v7841_v56 = vunpack.c.h.bf16 %v7821_v44  ;;  %v7283_v57 = vld [vmem:[#allocation7 + $0x170] ss:$12 sps:$4 sm:$0xff]   ;;  %v7286_v58 = vld [vmem:[#allocation7 + $0x16c] ss:$12 sps:$4 sm:$0xff]   ;;  %vm865_vm5 = vcmp.ne.s32.totalorder %v315_v43, 0  ;;  %v7844_v59 = vunpack.c.l.bf16 %v7827_v48  ;;  %v7847_v60 = vunpack.c.h.bf16 %v7827_v48  ;;  %vm7854_vm6 = vmpackc.low %vm10254_vm1, %vm7829_vm4 }
  0x68   : > { %6869 = vmatpush3.bf16.msra.mxu1 %v7265_v13  ;;  %1338 = vmatprep.subr.bf16.mxu0 %v7267_v18  ;;  %v1017_v61 = vsel %vm10249_vm3, %v1014_v41, %v1016_v45  ;;  %v1019_v62 = vsel %vm10249_vm3, %v1016_v45, %v1018_v46  ;;  %v343_v63 = vand.u32 15, %v255_v47  ;;  %v10425_v1 = vmov 0  ;;  %v7284_v3 = vld [vmem:[#allocation7 + $0x168] ss:$12 sps:$4 sm:$0xff]   ;;  %vm7865_vm7 = vmpackc.low %vm10254_vm1, %vm865_vm5  ;;  %v7880_v17 = vld [vmem:[%s7768_s13 + $0x20] sm:$0xff]   ;;  %s6041_s25 = sshll.u32 %s7764_s9, 8 }
  0x69   : > { %6870 = vmatprep.subr.bf16.mxu1 %v7269_v19  ;;  %10422 = vst [vmem:[#allocation22_spill] sm:$0xff] %v7841_v56  ;;  %10423 = vst [vmem:[#allocation23_spill] sm:$0xff] %v7844_v59  ;;  %v10426_v1 = vsel %vm7854_vm6, 4294967295, %v10425_v1  ;;  %v7858_v2 = vpack.c.bf16 %v1015_v54, %v1013_v53  ;;  %v357_v4 = vand.u32 15, %v257_v51  ;;  %v259_v5 = vadd.s32 96, %v7779_v10  ;;  %s9972_s24 = scalar_lea.vmem [#allocation10], %s6041_s25 }
  0x6a   : > { %10424 = vst [vmem:[#allocation24_spill] sm:$0xff] %v7847_v60  ;;  %10427 = vst [vmem:[#allocation25_spill] sm:$0xff] %v10426_v1  ;;  %v7862_v6 = vadd.s32 112, %v7779_v10  ;;  %v10428_v7 = vmov 0  ;;  %v1020_v8 = vrot.slane %v7838_v55, 7  ;;  %v1022_v9 = vrot.slane %v7841_v56, 7 }
  0x6b   : > { %1339 = vmatpush1.bf16.msra.mxu0 %v7270_v20  ;;  %v10429_v7 = vsel %vm7865_vm7, 4294967295, %v10428_v7  ;;  %v7871_v11 = vpack.c.bf16 %v1019_v62, %v1017_v61  ;;  %vm7873_vm8 = vcmp.ne.s32.totalorder %v329_v50, 0  ;;  %v1024_v13 = vrot.slane %v7844_v59, 7  ;;  %v7289_v18 = vld [vmem:[#allocation7 + $0x154] ss:$12 sps:$4 sm:$0xff]   ;;  %s6626_s26 = sshll.u32 %s7658_s19, 12 }
  0x6c   : > { %6871 = vmatpush3.bf16.msra.mxu1 %v7269_v19  ;;  %1340 = vmatprep.subr.bf16.mxu0 %v7271_v22  ;;  %10430 = vst [vmem:[#allocation26_spill] sm:$0xff] %v10429_v7  ;;  %v1026_v14 = vrot.slane %v7847_v60, 7  ;;  %vm7882_vm9 = vcmp.ne.s32.totalorder %v343_v63, 0  ;;  %v7290_v20 = vld [vmem:[#allocation7 + $0x158] ss:$12 sps:$4 sm:$0xff]   ;;  %v7887_v22 = vld [vmem:[%s7768_s13 + $0x28] sm:$0xff]   ;;  %v1023_v32 = vsel %vm10249_vm3, %v1020_v8, %v1022_v9  ;;  %v7904_v37 = vunpack.c.l.bf16 %v7880_v17  ;;  %vm7924_vm11 = vmpackc.low %vm10254_vm1, %vm7873_vm8  ;;  %s10149_s8 = scalar_lea.hbm %s10199_s4, %s6626_s26 }
  0x6d   : > { %6872 = vmatprep.subr.bf16.mxu1 %v7273_v23  ;;  %vm7895_vm10 = vcmp.ne.s32.totalorder %v357_v4, 0  ;;  %v371_v25 = vand.u32 15, %v259_v5  ;;  %v7287_v34 = vld [vmem:[#allocation7 + $0x150] ss:$12 sps:$4 sm:$0xff]   ;;  %v7919_v43 = vunpack.c.h.bf16 %v7887_v22  ;;  %v7297_v45 = vld [vmem:[#allocation7 + $0x140] ss:$12 sps:$4 sm:$0xff]   ;;  %vm7933_vm12 = vmpackc.low %vm10254_vm1, %vm7882_vm9 }
  0x6e   : > { %10437 = vst [vmem:[#allocation27_spill] sm:$0xff] %v7904_v37  ;;  %v1027_v40 = vsel %vm10249_vm3, %v1024_v13, %v1026_v14  ;;  %v7293_v41 = vld [vmem:[#allocation7 + $0x13c] ss:$12 sps:$4 sm:$0xff]   ;;  %v10444_v49 = vmov 0  ;;  %v385_v51 = vand.u32 15, %v7862_v6  ;;  %v1028_v54 = vrot.slane %v7904_v37, 7  ;;  %vm7949_vm14 = vmpackc.low %vm10254_vm1, %vm7895_vm10 }
  0x6f   : > { %1341 = vmatpush1.bf16.msra.mxu0 %v7274_v27  ;;  %v263_v27 = vadd.s32 128, %v7779_v10  ;;  %10440 = vst [vmem:[#allocation30_spill] sm:$0xff] %v7919_v43  ;;  %v10445_v49 = vsel %vm7933_vm12, 4294967295, %v10444_v49  ;;  %vm7937_vm13 = vcmp.ne.s32.totalorder %v371_v25, 0  ;;  %v7954_v61 = vld [vmem:[%s7768_s13 + $0x30] sm:$0xff]   ;;  %v1034_v4 = vrot.slane %v7919_v43, 7 }
  0x70   : > { %6873 = vmatpush3.bf16.msra.mxu1 %v7273_v23  ;;  %1342 = vmatprep.subr.bf16.mxu0 %v7275_v30  ;;  %v265_v30 = vadd.s32 144, %v7779_v10  ;;  %10446 = vst [vmem:[#allocation32_spill] sm:$0xff] %v10445_v49  ;;  %v7291_v63 = vld [vmem:[#allocation7 + $0x138] ss:$12 sps:$4 sm:$0xff]   ;;  %v7969_v12 = vunpack.c.l.bf16 %v7954_v61  ;;  %vm7974_vm15 = vcmp.ne.s32.totalorder %v385_v51, 0  ;;  %vm7987_vm0 = vmpackc.low %vm10254_vm1, %vm7937_vm13  ;;  %v7996_v25 = vadd.s32 176, %v7779_v10 }
  0x71   : > { %6874 = vmatprep.subr.bf16.mxu1 %v7277_v31  ;;  %v7296_v5 = vld [vmem:[#allocation7 + $0x124] ss:$12 sps:$4 sm:$0xff]   ;;  %v7959_v6 = vld [vmem:[%s7768_s13 + $0x38] sm:$0xff]   ;;  %vm8022_vm8 = vmpackc.low %vm10254_vm1, %vm7974_vm15  ;;  %s5937_s27 = sshll.u32 %s9972_s24, 4  ;;  %s5924_s19 = scalar_lea.sflag [#allocation6], %s7764_s9  ;;  %s10151_s27 = int_to_ptr.vmem [resolvable:$true] %s5937_s27 }
  0x72   : > { %v413_v62 = vand.u32 15, %v265_v30  ;;  %10452 = vst [vmem:[#allocation34_spill] sm:$0xff] %v7969_v12  ;;  %v7294_v30 = vld [vmem:[#allocation7 + $0x120] ss:$12 sps:$4 sm:$0xff]   ;;  %v1036_v51 = vrot.slane %v7969_v12, 7  ;;  %s7528_s10 = scalar_lea.vmem %s10151_s27, 4096 }
  0x73   : > { %1343 = vmatpush1.bf16.msra.mxu0 %v7278_v38  ;;  %v7907_v38 = vunpack.c.h.bf16 %v7880_v17  ;;  %v7307_v23 = vld [vmem:[#allocation7 + $0xdc] ss:$12 sps:$4 sm:$0xff]   ;;  %p7529_p11 = scmp.ne.s32.totalorder %s10151_s27, %s7528_s10  ;;  %p10844_p10 = scmp.ne.s32.totalorder %s10404_s14, 0 }
  0x74   : > { %6875 = vmatpush3.bf16.msra.mxu1 %v7277_v31  ;;  %1344 = vmatprep.subr.bf16.mxu0 %v7279_v39  ;;  %v1021_v31 = vsel %vm10249_vm3, %v1018_v46, %v1020_v8  ;;  %v1025_v39 = vsel %vm10249_vm3, %v1022_v9, %v1024_v13  ;;  %v10441_v46 = vmov 0  ;;  %v267_v8 = vadd.s32 160, %v7779_v10  ;;  %v7304_v9 = vld [vmem:[#allocation7 + $0x128] ss:$12 sps:$4 sm:$0xff]   ;;  %s7609_s12 = smov [#allocation10]  }
  0x75   : > { %6876 = vmatprep.subr.bf16.mxu1 %v7281_v42  ;;  %10438 = vst [vmem:[#allocation28_spill] sm:$0xff] %v7907_v38  ;;  %v10442_v46 = vsel %vm7924_vm11, 4294967295, %v10441_v46  ;;  %v7928_v47 = vpack.c.bf16 %v1023_v32, %v1021_v31  ;;  %v7942_v53 = vpack.c.bf16 %v1027_v40, %v1025_v39  ;;  %v7972_v13 = vunpack.c.h.bf16 %v7954_v61  ;;  %v7300_v39 = vld [vmem:[#allocation7 + $0x10c] ss:$12 sps:$4 sm:$0xff]   ;;  %p7530_p1 = pnand %p7529_p11, %p10844_p10 }
  0x76   : > { %10443 = vst [vmem:[#allocation31_spill] sm:$0xff] %v10442_v46  ;;  %v8001_v31 = vunpack.c.l.bf16 %v7959_v6  ;;  %v8004_v32 = vunpack.c.h.bf16 %v7959_v6  ;;  %vm8006_vm5 = vcmp.ne.s32.totalorder %v413_v62, 0  ;;  %v427_v40 = vand.u32 15, %v267_v8  ;;  %v7298_v62 = vld [vmem:[#allocation7 + $0x108] ss:$12 sps:$4 sm:$0xff]  }
  0x77   : > { %1345 = vmatpush1.bf16.msra.mxu0 %v7282_v52  ;;  %v399_v52 = vand.u32 15, %v263_v27  ;;  %10453 = vst [vmem:[#allocation35_spill] sm:$0xff] %v7972_v13  ;;  %v8032_v8 = vadd.s32 192, %v7779_v10  ;;  %vm8084_vm13 = vmpackc.low %vm10254_vm1, %vm8006_vm5  ;;  %v8146_v12 = vld [vmem:[%s7768_s13 + $0x68] sm:$0xff]   ;;  %v277_v46 = vadd.s32 240, %v7779_v10  ;;  %p7531_p2 = pneg %p7530_p1 }
  0x78   : > { %6877 = vmatpush3.bf16.msra.mxu1 %v7281_v42  ;;  %6914 = vmatprep.subr.bf16.mxu0 %v7283_v57  ;;  %v7916_v42 = vunpack.c.l.bf16 %v7887_v22  ;;  %10461 = vst [vmem:[#allocation37_spill] sm:$0xff] %v8001_v31  ;;  %10462 = vst [vmem:[#allocation38_spill] sm:$0xff] %v8004_v32  ;;  %vm8047_vm9 = vcmp.ne.s32.totalorder %v427_v40, 0 }
  0x79   : > { %1983 = vmatprep.subr.bf16.mxu1 %v7286_v58  ;;  %v10449_v58 = vmov 0  ;;  %vm7991_vm4 = vcmp.ne.s32.totalorder %v399_v52, 0  ;;  %v1038_v52 = vrot.slane %v7972_v13, 7  ;;  %vm8105_vm15 = vmpackc.low %vm10254_vm1, %vm8047_vm9 }
  0x7a   : > { %6068 = vmatmul.mubr.msk.bf16.vlgmr.msra.gmra.mxu0 %vm7790_vm2, %v7787_v21  ;;  %10439 = vst [vmem:[#allocation29_spill] sm:$0xff] %v7916_v42  ;;  %v10450_v58 = vsel %vm7949_vm14, 4294967295, %v10449_v58  ;;  %vm8060_vm10 = vmpackc.low %vm10254_vm1, %vm7991_vm4  ;;  %v8077_v21 = vld [vmem:[%s7768_s13 + $0x50] sm:$0xff]  }
  0x7b   : > { %6879 = vmatmul.mubr.msk.bf16.vlgmr.msra.gmra.mxu1 %vm7854_vm6, %v7858_v2  ;;  %6915 = vmatpush3.bf16.msra.mxu0 %v7283_v57  ;;  %v1030_v57 = vrot.slane %v7907_v38, 7  ;;  %10451 = vst [vmem:[#allocation33_spill] sm:$0xff] %v10450_v58 }
  0x7c   : > { %1984 = vmatpush1.bf16.msra.mxu1 %v7284_v3  ;;  %1370 = vmatprep.mubr.bf16.mxu0 %v10205_v0  ;;  %v1032_v3 = vrot.slane %v7916_v42, 7  ;;  %v10502_v42 = vmov 0 }
  0x7d   : > { %6882 = vmatprep.mubr.msk.bf16.mxu1 %vm7865_vm7, %v7871_v11  ;;  %1985 = vmatprep.subr.bf16.mxu1 %v7289_v18  ;;  %v1031_v19 = vsel %vm10249_vm3, %v1028_v54, %v1030_v57  ;;  %v7303_v18 = vld [vmem:[#allocation7 + $0xf4] ss:$12 sps:$4 sm:$0xff]  }
  0x7e   : > { %6916 = vmatprep.subr.bf16.mxu0 %v7290_v20  ;;  %v1035_v27 = vsel %vm10249_vm3, %v1032_v3, %v1034_v4 }
  0x7f   : > { %6917 = vmatpush3.bf16.msra.mxu0 %v7290_v20  ;;  %v10456_v20 = vmov 0 }
  0x80   : > { %1986 = vmatpush1.bf16.msra.mxu1 %v7287_v34  ;;  %6918 = vmatprep.subr.bf16.mxu0 %v7297_v45  ;;  %v10457_v20 = vsel %vm7987_vm0, 4294967295, %v10456_v20  ;;  %v10481_v34 = vmov 0 }
  0x81   : > { %1987 = vmatprep.subr.bf16.mxu1 %v7293_v41  ;;  %10458 = vst [vmem:[#allocation36_spill] sm:$0xff] %v10457_v20  ;;  %v7311_v41 = vld [vmem:[#allocation7 + $0x110] ss:$12 sps:$4 sm:$0xff]   ;;  %v10482_v34 = vsel %vm8105_vm15, 4294967295, %v10481_v34 }
  0x82   : > { %6071 = vmatmul.mubr.msk.bf16.gmra.mxu0 %vm7854_vm6, %v7858_v2  ;;  %v1029_v2 = vsel %vm10249_vm3, %v1026_v14, %v1028_v54  ;;  %v1033_v14 = vsel %vm10249_vm3, %v1030_v57, %v1032_v3  ;;  %v8015_v54 = vld [vmem:[%s7768_s13 + $0x40] sm:$0xff]   ;;  %v1042_v3 = vrot.slane %v8004_v32, 7  ;;  %10483 = vst [vmem:[#allocation47_spill] sm:$0xff] %v10482_v34 }
  0x83   : > { %6883 = vmatmul.mubr.msk.bf16.gmra.mxu1 %vm7924_vm11, %v7928_v47  ;;  %1380 = vmatprep.mubr.bf16.mxu0 %v10205_v0  ;;  %v8010_v50 = vpack.c.bf16 %v1031_v19, %v1029_v2  ;;  %v8017_v57 = vpack.c.bf16 %v1035_v27, %v1033_v14  ;;  %v441_v2 = vand.u32 15, %v7996_v25  ;;  %v8042_v19 = vunpack.c.l.bf16 %v8015_v54  ;;  %v7313_v25 = vld [vmem:[#allocation7 + $0xf8] ss:$12 sps:$4 sm:$0xff]  }
  0x84   : > { %6886 = vmatprep.mubr.msk.bf16.mxu1 %vm7933_vm12, %v7942_v53  ;;  %1988 = vmatpush1.bf16.msra.mxu1 %v7291_v63  ;;  %v1040_v63 = vrot.slane %v8001_v31, 7  ;;  %v8045_v14 = vunpack.c.h.bf16 %v8015_v54  ;;  %v1039_v27 = vsel %vm10249_vm3, %v1036_v51, %v1038_v52 }
  0x85   : > { %6919 = vmatpush3.bf16.msra.mxu0 %v7297_v45  ;;  %1989 = vmatprep.subr.bf16.mxu1 %v7296_v5  ;;  %v10465_v45 = vmov 0  ;;  %v8029_v5 = vld [vmem:[%s7768_s13 + $0x48] sm:$0xff]   ;;  %10468 = vst [vmem:[#allocation40_spill] sm:$0xff] %v8042_v19  ;;  %v1044_v1 = vrot.slane %v8042_v19, 7  ;;  %vm8119_vm4 = vcmp.ne.s32.totalorder %v441_v2, 0 }
  0x86   : > { %6920 = vmatprep.subr.bf16.mxu0 %v7304_v9  ;;  %v10466_v45 = vsel %vm8022_vm8, 4294967295, %v10465_v45  ;;  %10469 = vst [vmem:[#allocation41_spill] sm:$0xff] %v8045_v14  ;;  %v8068_v40 = vunpack.c.h.bf16 %v8029_v5  ;;  %v1041_v15 = vsel %vm10249_vm3, %v1038_v52, %v1040_v63  ;;  %v1046_v24 = vrot.slane %v8045_v14, 7  ;;  %vm8153_vm9 = vmpackc.low %vm10254_vm1, %vm8119_vm4 }
  0x87   : > { %10467 = vst [vmem:[#allocation39_spill] sm:$0xff] %v10466_v45  ;;  %v10477_v52 = vmov 0 }
  0x88   : > { %1990 = vmatpush1.bf16.msra.mxu1 %v7294_v30  ;;  %v10472_v30 = vmov 0  ;;  %10476 = vst [vmem:[#allocation44_spill] sm:$0xff] %v8068_v40  ;;  %v10478_v52 = vsel %vm8084_vm13, 4294967295, %v10477_v52 }
  0x89   : > { %6921 = vmatpush3.bf16.msra.mxu0 %v7304_v9  ;;  %1991 = vmatprep.subr.bf16.mxu1 %v7300_v39  ;;  %v10473_v30 = vsel %vm8060_vm10, 4294967295, %v10472_v30  ;;  %v8065_v39 = vunpack.c.l.bf16 %v8029_v5  ;;  %10479 = vst [vmem:[#allocation45_spill] sm:$0xff] %v10478_v52  ;;  %v1047_v9 = vsel %vm10249_vm3, %v1044_v1, %v1046_v24 }
  0x8a   : > { %6922 = vmatprep.subr.bf16.mxu0 %v7311_v41  ;;  %6074 = vmatmul.mubr.msk.bf16.gmra.mxu0 %vm7865_vm7, %v7871_v11  ;;  %v1037_v11 = vsel %vm10249_vm3, %v1034_v4, %v1036_v51  ;;  %10474 = vst [vmem:[#allocation42_spill] sm:$0xff] %v10473_v30  ;;  %v1043_v4 = vsel %vm10249_vm3, %v1040_v63, %v1042_v3  ;;  %v7301_v51 = vld [vmem:[#allocation7 + $0xf0] ss:$12 sps:$4 sm:$0xff]  }
  0x8b   : > { %6887 = vmatmul.mubr.msk.bf16.gmra.mxu1 %vm7949_vm14, %v8010_v50  ;;  %1390 = vmatprep.mubr.bf16.mxu0 %v10205_v0  ;;  %10475 = vst [vmem:[#allocation43_spill] sm:$0xff] %v8065_v39  ;;  %v7315_v0 = vld [vmem:[#allocation7 + $0xe0] ss:$12 sps:$4 sm:$0xff]   ;;  %v8072_v7 = vpack.c.bf16 %v1039_v27, %v1037_v11  ;;  %v8079_v32 = vpack.c.bf16 %v1043_v4, %v1041_v15  ;;  %v8091_v63 = vld [vmem:[%s7768_s13 + $0x58] sm:$0xff]   ;;  %v7310_v11 = vld [vmem:[#allocation7 + $0xc4] ss:$12 sps:$4 sm:$0xff]   ;;  %v8094_v15 = vunpack.c.l.bf16 %v8077_v21 }
  0x8c   : > { %6890 = vmatprep.mubr.msk.bf16.mxu1 %vm7987_vm0, %v8017_v57  ;;  %1992 = vmatpush1.bf16.msra.mxu1 %v7298_v62  ;;  %v1050_v62 = vrot.slane %v8068_v40, 7  ;;  %v7317_v27 = vld [vmem:[#allocation7 + $0xc8] ss:$12 sps:$4 sm:$0xff]   ;;  %v455_v4 = vand.u32 15, %v8032_v8  ;;  %v273_v40 = vadd.s32 208, %v7779_v10  ;;  %v8129_v31 = vunpack.c.l.bf16 %v8091_v63 }
  0x8d   : > { %6923 = vmatpush3.bf16.msra.mxu0 %v7311_v41  ;;  %1993 = vmatprep.subr.bf16.mxu1 %v7303_v18  ;;  %v1048_v41 = vrot.slane %v8065_v39, 7  ;;  %v7305_v18 = vld [vmem:[#allocation7 + $0xd8] ss:$12 sps:$4 sm:$0xff]   ;;  %10480 = vst [vmem:[#allocation46_spill] sm:$0xff] %v8094_v15  ;;  %v8124_v39 = vld [vmem:[#allocation7 + $0x230] ss:$12 sps:$4 sm:$0xff]  }
  0x8e   : > { %6924 = vmatprep.subr.bf16.mxu0 %v7313_v25  ;;  %v7321_v8 = vld [vmem:[#allocation7 + $0x22c] ss:$12 sps:$4 sm:$0xff]   ;;  %10488 = vst [vmem:[#allocation49_spill] sm:$0xff] %v8129_v31  ;;  %v1052_v2 = vrot.slane %v8094_v15, 7  ;;  %vm8141_vm5 = vcmp.ne.s32.totalorder %v455_v4, 0 }
  0x8f   : > { %v1049_v14 = vsel %vm10249_vm3, %v1046_v24, %v1048_v41  ;;  %v1051_v19 = vsel %vm10249_vm3, %v1048_v41, %v1050_v62  ;;  %vm8178_vm4 = vmpackc.low %vm10254_vm1, %vm8141_vm5 }
  0x90   : > { %1994 = vmatpush1.bf16.msra.mxu1 %v7301_v51  ;;  %v7308_v51 = vld [vmem:[#allocation7 + $0xc0] ss:$12 sps:$4 sm:$0xff]   ;;  %v8148_v43 = vpack.c.bf16 %v1051_v19, %v1049_v14  ;;  %v1053_v14 = vsel %vm10249_vm3, %v1050_v62, %v1052_v2  ;;  %v8191_v62 = vunpack.c.h.bf16 %v8146_v12 }
  0x91   : > { %6925 = vmatpush3.bf16.msra.mxu0 %v7313_v25  ;;  %1995 = vmatprep.subr.bf16.mxu1 %v7307_v23  ;;  %v8110_v25 = vunpack.c.h.bf16 %v8077_v21  ;;  %v10485_v23 = vmov 0  }
  0x92   : > { %6926 = vmatprep.subr.bf16.mxu0 %v7315_v0  ;;  %6077 = vmatmul.mubr.msk.bf16.gmra.mxu0 %vm7924_vm11, %v7928_v47  ;;  %v1045_v47 = vsel %vm10249_vm3, %v1042_v3, %v1044_v1  ;;  %v8132_v3 = vunpack.c.h.bf16 %v8091_v63  ;;  %v8135_v1 = vld [vmem:[%s7768_s13 + $0x60] sm:$0xff]   ;;  %10501 = vst [vmem:[#allocation56_spill] sm:$0xff] %v8191_v62 }
  0x93   : > { %6891 = vmatmul.mubr.msk.bf16.gmra.mxu1 %vm8022_vm8, %v8072_v7  ;;  %10484 = vst [vmem:[#allocation48_spill] sm:$0xff] %v8110_v25  ;;  %1400 = vmatprep.mubr.bf16.mxu0 %v10485_v23  ;;  %v8138_v13 = vpack.c.bf16 %v1047_v9, %v1045_v47  ;;  %v1054_v24 = vrot.slane %v8110_v25, 7  ;;  %v469_v47 = vand.u32 15, %v273_v40  ;;  %v8161_v9 = vunpack.c.l.bf16 %v8135_v1  ;;  %v8198_v25 = vld [vmem:[%s7768_s13 + $0x70] sm:$0xff]  }
  0x94   : > { %6894 = vmatprep.mubr.msk.bf16.mxu1 %vm8060_vm10, %v8079_v32  ;;  %10489 = vst [vmem:[#allocation50_spill] sm:$0xff] %v8132_v3  ;;  %1996 = vmatpush1.bf16.msra.mxu1 %v7305_v18  ;;  %v275_v18 = vadd.s32 224, %v7779_v10  ;;  %v1058_v4 = vrot.slane %v8132_v3, 7  ;;  %v8164_v19 = vunpack.c.h.bf16 %v8135_v1  ;;  %v10497_v40 = vmov 0 }
  0x95   : > { %6927 = vmatpush3.bf16.msra.mxu0 %v7315_v0  ;;  %1997 = vmatprep.subr.bf16.mxu1 %v7310_v11  ;;  %v10492_v0 = vmov 0  ;;  %v1056_v11 = vrot.slane %v8129_v31, 7  ;;  %10495 = vst [vmem:[#allocation52_spill] sm:$0xff] %v8161_v9  ;;  %v10498_v40 = vsel %vm8178_vm4, 4294967295, %v10497_v40  ;;  %vm887_vm5 = vcmp.ne.s32.totalorder %v469_v47, 0  ;;  %v8213_v47 = vld [vmem:[%s7768_s13 + $0x78] sm:$0xff]  }
  0x96   : > { %6928 = vmatprep.subr.bf16.mxu0 %v7317_v27  ;;  %v10493_v0 = vsel %vm8153_vm9, 4294967295, %v10492_v0  ;;  %10496 = vst [vmem:[#allocation53_spill] sm:$0xff] %v8164_v19  ;;  %10499 = vst [vmem:[#allocation54_spill] sm:$0xff] %v10498_v40  ;;  %v1060_v49 = vrot.slane %v8161_v9, 7  ;;  %v1062_v3 = vrot.slane %v8164_v19, 7  ;;  %v497_v31 = vand.u32 15, %v277_v46 }
  0x97   : > { %10494 = vst [vmem:[#allocation51_spill] sm:$0xff] %v10493_v0  ;;  %v1059_v41 = vsel %vm10249_vm3, %v1056_v11, %v1058_v4  ;;  %v10505_v46 = vmov 0 }
  0x98   : > { %1998 = vmatpush1.bf16.msra.mxu1 %v7308_v51  ;;  %v8188_v51 = vunpack.c.l.bf16 %v8146_v12  ;;  %vm891_vm11 = vcmp.ne.s32.totalorder %v497_v31, 0  ;;  %v8244_v31 = vunpack.c.h.bf16 %v8213_v47 }
  0x99   : > { %6929 = vmatpush3.bf16.msra.mxu0 %v7317_v27  ;;  %6966 = vmatprep.subr.bf16.mxu1 %v8124_v39  ;;  %v483_v27 = vand.u32 15, %v275_v18  ;;  %v279_v18 = vadd.s32 256, %v7779_v10 }
  0x9a   : > { %2891 = vmatprep.subr.bf16.mxu0 %v7321_v8  ;;  %6080 = vmatmul.mubr.msk.bf16.gmra.mxu0 %vm7933_vm12, %v7942_v53  ;;  %v1055_v53 = vsel %vm10249_vm3, %v1052_v2, %v1054_v24  ;;  %10500 = vst [vmem:[#allocation55_spill] sm:$0xff] %v8188_v51  ;;  %v1057_v8 = vsel %vm10249_vm3, %v1054_v24, %v1056_v11  ;;  %vm8206_vm12 = vmpackc.low %vm10254_vm1, %vm887_vm5  ;;  %v1064_v24 = vrot.slane %v8188_v51, 7  ;;  %v1066_v11 = vrot.slane %v8191_v62, 7 }
  0x9b   : > { %6895 = vmatmul.mubr.msk.bf16.gmra.mxu1 %vm8084_vm13, %v8138_v13  ;;  %1410 = vmatprep.mubr.bf16.mxu0 %v10485_v23  ;;  %v8200_v2 = vpack.c.bf16 %v1055_v53, %v1053_v14  ;;  %v8203_v15 = vpack.c.bf16 %v1059_v41, %v1057_v8  ;;  %v10503_v42 = vsel %vm8206_vm12, 4294967295, %v10502_v42  ;;  %vm889_vm3 = vcmp.ne.s32.totalorder %v483_v27, 0  ;;  %10515 = vst [vmem:[#allocation62_spill] sm:$0xff] %v8244_v31 }
  0x9c   : > { %6898 = vmatprep.mubr.msk.bf16.mxu1 %vm8105_vm15, %v8148_v43  ;;  %10504 = vst [vmem:[#allocation57_spill] sm:$0xff] %v10503_v42  ;;  %vm8222_vm5 = vmpackc.low %vm10254_vm1, %vm889_vm3  ;;  %v8227_v14 = vunpack.c.l.bf16 %v8198_v25  ;;  %v8230_v53 = vunpack.c.h.bf16 %v8198_v25  ;;  %v511_v27 = vand.u32 15, %v279_v18  ;;  %v8241_v62 = vunpack.c.l.bf16 %v8213_v47 }
  0x9d   : > { %v10506_v46 = vsel %vm8222_vm5, 4294967295, %v10505_v46 }
  0x9e   : > { %10507 = vst [vmem:[#allocation58_spill] sm:$0xff] %v10506_v46  ;;  %10508 = vst [vmem:[#allocation59_spill] sm:$0xff] %v8227_v14  ;;  %v1068_v51 = vrot.slane %v8227_v14, 7  ;;  %v1070_v19 = vrot.slane %v8230_v53, 7  ;;  %v10579_v46 = vld [vmem:[#allocation44_spill] sm:$0xff] }
  0x9f   : > { %10509 = vst [vmem:[#allocation60_spill] sm:$0xff] %v8230_v53  ;;  %10514 = vst [vmem:[#allocation61_spill] sm:$0xff] %v8241_v62 }
  0xa2   : > { %6083 = vmatmul.mubr.msk.bf16.gmra.mxu0 %vm7949_vm14, %v8010_v50  ;;  %vm10510_vm14 = vcmask 1040384  }
  0xa3   : > { %6899 = vmatmul.mubr.msk.bf16.gmra.mxu1 %vm8153_vm9, %v8200_v2  ;;  %1420 = vmatprep.mubr.bf16.mxu0 %v10485_v23  ;;  %v1061_v50 = vsel %vm10510_vm14, %v1058_v4, %v1060_v49  ;;  %vm10511_vm3 = vmmov %vm10510_vm14  ;;  %vm10516_vm14 = vmmov 1   ;;  %v1072_v4 = vrot.slane %v8241_v62, 7 }
  0xa4   : > { %6902 = vmatprep.mubr.msk.bf16.mxu1 %vm8178_vm4, %v8203_v15  ;;  %v1063_v8 = vsel %vm10511_vm3, %v1060_v49, %v1062_v3  ;;  %vm10512_vm1 = vmmov %vm10511_vm3  ;;  %v10517_v49 = vmov 0 }
  0xa5   : > { %v1065_v41 = vsel %vm10512_vm1, %v1062_v3, %v1064_v24  ;;  %vm10513_vm7 = vmmov %vm10512_vm1  ;;  %v8246_v18 = vpack.c.bf16 %v1063_v8, %v1061_v50  ;;  %vm893_vm1 = vcmp.ne.s32.totalorder %v511_v27, 0  ;;  %v281_v3 = vadd.s32 272, %v7779_v10 }
  0xa6   : > { %v1067_v58 = vsel %vm10513_vm7, %v1064_v24, %v1066_v11  ;;  %vm8253_vm3 = vmpackc.low %vm10516_vm14, %vm891_vm11  ;;  %v1074_v24 = vrot.slane %v8244_v31, 7  ;;  %vm10523_vm11 = vcmask 1040384  }
  0xa7   : > { %v8250_v9 = vpack.c.bf16 %v1067_v58, %v1065_v41  ;;  %v10518_v49 = vsel %vm8253_vm3, 4294967295, %v10517_v49  ;;  %vm8267_vm7 = vmpackc.low %vm10516_vm14, %vm893_vm1  ;;  %v10520_v58 = vmov 0  ;;  %v1069_v27 = vsel %vm10523_vm11, %v1066_v11, %v1068_v51 }
  0xa8   : > { %10519 = vst [vmem:[#allocation63_spill] sm:$0xff] %v10518_v49  ;;  %v10521_v58 = vsel %vm8267_vm7, 4294967295, %v10520_v58  ;;  %vm10524_vm6 = vmmov %vm10523_vm11  ;;  %v10527_v11 = vmov 0 }
  0xa9   : > { %10522 = vst [vmem:[#allocation64_spill] sm:$0xff] %v10521_v58  ;;  %v1071_v50 = vsel %vm10524_vm6, %v1068_v51, %v1070_v19  ;;  %v10575_v58 = vld [vmem:[#allocation43_spill] sm:$0xff] }
  0xaa   : > { %6086 = vmatmul.mubr.msk.bf16.gmra.mxu0 %vm7987_vm0, %v8017_v57  ;;  %v525_v57 = vand.u32 15, %v281_v3  ;;  %vm10525_vm0 = vmmov %vm10524_vm6  ;;  %v6112_v20 = vpack.c.bf16 %v1071_v50, %v1069_v27  ;;  %v10289_v3 = vmov 0.0|0.0   ;;  %v7330_v27 = vld [vmem:[#allocation7 + $0x1e0] ss:$12 sps:$4 sm:$0xff]   ;;  %vm10280_vm6 = vcmask 1046528  }
  0xab   : > { %6903 = vmatmul.mubr.msk.bf16.gmra.mxu1 %vm8206_vm12, %v8246_v18  ;;  %1430 = vmatprep.mubr.bf16.mxu0 %v10485_v23  ;;  %v1073_v8 = vsel %vm10525_vm0, %v1070_v19, %v1072_v4  ;;  %vm10526_vm2 = vmmov %vm10525_vm0  ;;  %v7335_v50 = vld [vmem:[#allocation7 + $0x1cc] ss:$12 sps:$4 sm:$0xff]  }
  0xac   : > { %6906 = vmatprep.mubr.msk.bf16.mxu1 %vm8222_vm5, %v8250_v9  ;;  %v1075_v41 = vsel %vm10526_vm2, %v1072_v4, %v1074_v24  ;;  %vm895_vm1 = vcmp.ne.s32.totalorder %v525_v57, 0  ;;  %vm10530_vm2 = vmmov %vm10525_vm0  ;;  %v7318_v4 = vld [vmem:[#allocation7 + $0x1e8] ss:$12 sps:$4 sm:$0xff]  }
  0xad   : > { %v8279_v31 = vpack.c.bf16 %v1075_v41, %v1073_v8  ;;  %vm8287_vm11 = vmpackc.low %vm10516_vm14, %vm895_vm1  ;;  %v1077_v19 = vsel %vm10530_vm2, %v1074_v24, %v7783_v16  ;;  %v7446_v24 = vld [vmem:[%s7768_s13 + $0x18] sm:$0xff]   ;;  %v7333_v57 = vld [vmem:[#allocation7 + $0x1c8] ss:$12 sps:$4 sm:$0xff]  }
  0xae   : > { %v10528_v11 = vsel %vm8287_vm11, 4294967295, %v10527_v11  ;;  %v6118_v51 = vpack.c.bf16 %v7783_v16, %v1077_v19  ;;  %v7339_v8 = vld [vmem:[#allocation7 + $0x1b4] ss:$12 sps:$4 sm:$0xff]   ;;  %v7337_v41 = vld [vmem:[#allocation7 + $0x1b0] ss:$12 sps:$4 sm:$0xff]  }
  0xaf   : > { %10529 = vst [vmem:[#allocation65_spill] sm:$0xff] %v10528_v11  ;;  %v7342_v19 = vld [vmem:[#allocation7 + $0x19c] ss:$12 sps:$4 sm:$0xff]   ;;  %v7355_v16 = vld [vmem:[#allocation9 + $0x78] ss:$12 sps:$4 sm:$0xff]  }
  0xb2   : > { %6089 = vmatmul.mubr.msk.bf16.gmra.mxu0 %vm8022_vm8, %v8072_v7  ;;  %v7314_v7 = vld [vmem:[#allocation7 + $0x218] ss:$12 sps:$4 sm:$0xff]  }
  0xb3   : > { %6907 = vmatmul.mubr.msk.bf16.gmra.mxu1 %vm8253_vm3, %v6112_v20  ;;  %1440 = vmatprep.mubr.bf16.mxu0 %v10485_v23 }
  0xb4   : > { %6910 = vmatprep.mubr.msk.bf16.mxu1 %vm8267_vm7, %v8279_v31 }
  0xba   : > { %6092 = vmatmul.mubr.msk.bf16.gmra.mxu0 %vm8060_vm10, %v8079_v32  ;;  %v7316_v32 = vld [vmem:[#allocation7 + $0x200] ss:$12 sps:$4 sm:$0xff]  }
  0xbb   : > { %6911 = vmatmul.mubr.msk.bf16.gmra.mxu1 %vm8287_vm11, %v6118_v51  ;;  %1450 = vmatprep.mubr.bf16.mxu0 %v10485_v23 }
  0xbc   : > { %2015 = vmatprep.mubr.bf16.mxu1 %v10485_v23 }
  0xc2   : > { %6095 = vmatmul.mubr.msk.bf16.gmra.mxu0 %vm8084_vm13, %v8138_v13  ;;  %v7322_v13 = vld [vmem:[#allocation7 + $0x1d0] ss:$12 sps:$4 sm:$0xff]  }
  0xc3   : > { %2016 = vmatmul.mubr.bf16.vlgmr.msra.gmra.mxu1 %v10289_v3  ;;  %1460 = vmatprep.mubr.bf16.mxu0 %v10485_v23 }
  0xc4   : > { %6967 = vmatpush3.bf16.msra.mxu1 %v8124_v39  ;;  %2023 = vmatprep.mubr.bf16.mxu1 %v10485_v23  ;;  %v7329_v39 = vld [vmem:[#allocation7 + $0x1b8] ss:$12 sps:$4 sm:$0xff]  }
  0xc5   : > { %6968 = vmatprep.subr.bf16.mxu1 %v7314_v7 }
  0xc8   : > { %6969 = vmatpush3.bf16.msra.mxu1 %v7314_v7  ;;  %v7346_v7 = vld [vmem:[#allocation7 + $0x184] ss:$12 sps:$4 sm:$0xff]  }
  0xc9   : > { %6970 = vmatprep.subr.bf16.mxu1 %v7316_v32 }
  0xca   : > { %6098 = vmatmul.mubr.msk.bf16.gmra.mxu0 %vm8105_vm15, %v8148_v43  ;;  %v7343_v43 = vld [vmem:[#allocation7 + $0x188] ss:$12 sps:$4 sm:$0xff]  }
  0xcb   : > { %2024 = vmatmul.mubr.bf16.gmra.mxu1 %v7799_v26  ;;  %1470 = vmatprep.mubr.bf16.mxu0 %v10485_v23  ;;  %v7336_v26 = vld [vmem:[#allocation7 + $0x1a0] ss:$12 sps:$4 sm:$0xff]  }
  0xcc   : > { %2033 = vmatprep.mubr.bf16.mxu1 %v10485_v23  ;;  %6971 = vmatpush3.bf16.msra.mxu1 %v7316_v32 }
  0xcd   : > { %6972 = vmatprep.subr.bf16.mxu1 %v7318_v4 }
  0xd0   : > { %6973 = vmatpush3.bf16.msra.mxu1 %v7318_v4 }
  0xd1   : > { %6974 = vmatprep.subr.bf16.mxu1 %v7322_v13 }
  0xd2   : > { %6101 = vmatmul.mubr.msk.bf16.gmra.mxu0 %vm8153_vm9, %v8200_v2  ;;  %v7326_v2 = vld [vmem:[#allocation7 + $0x1f8] ss:$12 sps:$4 sm:$0xff]  }
  0xd3   : > { %2034 = vmatmul.mubr.bf16.gmra.mxu1 %v7809_v33  ;;  %1480 = vmatprep.mubr.bf16.mxu0 %v10485_v23  ;;  %v7319_v33 = vld [vmem:[#allocation7 + $0x228] ss:$12 sps:$4 sm:$0xff]  }
  0xd4   : > { %2043 = vmatprep.mubr.bf16.mxu1 %v10485_v23  ;;  %6975 = vmatpush3.bf16.msra.mxu1 %v7322_v13 }
  0xd5   : > { %6976 = vmatprep.subr.bf16.mxu1 %v7329_v39 }
  0xd8   : > { %6977 = vmatpush3.bf16.msra.mxu1 %v7329_v39  ;;  %v10531_v39 = vmov 0.0  }
  0xd9   : > { %6978 = vmatprep.subr.bf16.mxu1 %v7336_v26 }
  0xda   : > { %6104 = vmatmul.mubr.msk.bf16.gmra.mxu0 %vm8178_vm4, %v8203_v15  ;;  %v7444_v15 = vld [vmem:[%s7768_s13 + $0x8] sm:$0xff]  }
  0xdb   : > { %2044 = vmatmul.mubr.bf16.gmra.mxu1 %v7821_v44  ;;  %1490 = vmatprep.mubr.bf16.mxu0 %v10485_v23  ;;  %v7325_v44 = vld [vmem:[#allocation7 + $0x214] ss:$12 sps:$4 sm:$0xff]  }
  0xdc   : > { %2053 = vmatprep.mubr.bf16.mxu1 %v10485_v23  ;;  %6979 = vmatpush3.bf16.msra.mxu1 %v7336_v26  ;;  %v2570_v26 = vrot.slane %v7802_v28, 1 }
  0xdd   : > { %6980 = vmatprep.subr.bf16.mxu1 %v7343_v43 }
  0xe0   : > { %6981 = vmatpush3.bf16.msra.mxu1 %v7343_v43 }
  0xe2   : > { %6107 = vmatmul.mubr.msk.bf16.gmra.mxu0 %vm8206_vm12, %v8246_v18  ;;  %v7445_v18 = vld [vmem:[%s7768_s13 + $0x10] sm:$0xff]  }
  0xe3   : > { %2054 = vmatmul.mubr.bf16.gmra.mxu1 %v7827_v48  ;;  %1500 = vmatprep.mubr.bf16.mxu0 %v10485_v23  ;;  %v7443_v48 = vld [vmem:[%s7768_s13] sm:$0xff]   ;;  %s7532_s13 = sshll.u32 %s7609_s12, 4  ;;  %s7533_s13 = int_to_ptr.vmem [resolvable:$false] %s7532_s13 }
  0xe4   : > { %2063 = vmatprep.mubr.bf16.mxu1 %v10485_v23  ;;  %s7534_s21 = scalar_lea.vmem %s7533_s13, 8192  ;;  %p7535_p6 = scmp.lt.s32.totalorder %s10151_s27, %s7533_s13 }
  0xe5   : > { %p7536_p12 = scmp.lt.s32.totalorder %s7534_s21, %s7528_s10 }
  0xe7   : > { %p7537_p7 = por %p7536_p12, %p7535_p6 }
  0xe9   : > { %p7538_p9 = pnand %p7537_p7, %p7531_p2 }
  0xea   : > { %6110 = vmatmul.mubr.msk.bf16.gmra.mxu0 %vm8222_vm5, %v8250_v9  ;;  %v7328_v9 = vld [vmem:[#allocation7 + $0x1fc] ss:$12 sps:$4 sm:$0xff]  }
  0xeb   : > { %2064 = vmatmul.mubr.bf16.gmra.mxu1 %v7880_v17  ;;  %1510 = vmatprep.mubr.bf16.mxu0 %v10485_v23 }
  0xec   : > { %2073 = vmatprep.mubr.bf16.mxu1 %v10485_v23 }
  0xf2   : > { %6113 = vmatmul.mubr.msk.bf16.gmra.mxu0 %vm8253_vm3, %v6112_v20  ;;  %v7323_v20 = vld [vmem:[#allocation7 + $0x210] ss:$12 sps:$4 sm:$0xff]  }
  0xf3   : > { %2074 = vmatmul.mubr.bf16.gmra.mxu1 %v7887_v22  ;;  %1520 = vmatprep.mubr.bf16.mxu0 %v10485_v23 }
  0xf4   : > { %2083 = vmatprep.mubr.bf16.mxu1 %v10485_v23 }
  0xfa   : > { %6116 = vmatmul.mubr.msk.bf16.gmra.mxu0 %vm8267_vm7, %v8279_v31  ;;  %v7332_v31 = vld [vmem:[#allocation7 + $0x1e4] ss:$12 sps:$4 sm:$0xff]  }
  0xfb   : > { %2084 = vmatmul.mubr.bf16.gmra.mxu1 %v7954_v61  ;;  %1528 = vmatprep.mubr.bf16.mxu0 %v10485_v23 }
  0xfc   : > { %2093 = vmatprep.mubr.bf16.mxu1 %v10485_v23 }
 0x102   : > { %6119 = vmatmul.mubr.msk.bf16.gmra.mxu0 %vm8287_vm11, %v6118_v51  ;;  %v7340_v51 = vld [vmem:[#allocation7 + $0x198] ss:$12 sps:$4 sm:$0xff]  }
 0x103   : > { %2094 = vmatmul.mubr.bf16.gmra.mxu1 %v7959_v6  ;;  %6930 = vmatprep.mubr.bf16.mxu0 %v10289_v3 }
 0x104   : > { %2103 = vmatprep.mubr.bf16.mxu1 %v10485_v23 }
 0x10a   : > { %6931 = vmatmul.mubr.bf16.vlgmr.msra.gmra.mxu0 %v7443_v48 }
 0x10b   : > { %2104 = vmatmul.mubr.bf16.gmra.mxu1 %v8015_v54  ;;  %2892 = vmatpush1.bf16.msra.mxu0 %v7319_v33 }
 0x10c   : > { %2113 = vmatprep.mubr.bf16.mxu1 %v10485_v23  ;;  %6934 = vmatprep.mubr.bf16.mxu0 %v7444_v15 }
 0x10d   : > { %2893 = vmatprep.subr.bf16.mxu0 %v7325_v44 }
 0x10f   : > { %2894 = vmatpush1.bf16.msra.mxu0 %v7323_v20  ;;  %v250_v20 = vadd.s32 24, %v7779_v10 }
 0x110   : > { %2895 = vmatprep.subr.bf16.mxu0 %v7328_v9  ;;  %v252_v9 = vadd.s32 40, %v7779_v10 }
 0x112   : > { %6935 = vmatmul.mubr.bf16.gmra.mxu0 %v7445_v18  ;;  %v2574_v18 = vrot.slane %v7812_v35, 1  ;;  %v10566_v35 = vld [vmem:[#allocation38_spill] sm:$0xff] }
 0x113   : > { %2114 = vmatmul.mubr.bf16.gmra.mxu1 %v8029_v5  ;;  %6938 = vmatprep.mubr.bf16.mxu0 %v7446_v24  ;;  %v2572_v24 = vrot.slane %v7805_v29, 1  ;;  %v264_v29 = vadd.s32 136, %v7779_v10 }
 0x114   : > { %2123 = vmatprep.mubr.bf16.mxu1 %v10485_v23  ;;  %2896 = vmatpush1.bf16.msra.mxu0 %v7326_v2 }
 0x115   : > { %2897 = vmatprep.subr.bf16.mxu0 %v7332_v31 }
 0x118   : > { %2898 = vmatpush1.bf16.msra.mxu0 %v7330_v27 }
 0x119   : > { %2899 = vmatprep.subr.bf16.mxu0 %v7335_v50 }
 0x11a   : > { %6939 = vmatmul.mubr.bf16.gmra.mxu0 %v7880_v17  ;;  %v7344_v17 = vld [vmem:[#allocation7 + $0x180] ss:$12 sps:$4 sm:$0xff]  }
 0x11b   : > { %2124 = vmatmul.mubr.bf16.gmra.mxu1 %v8077_v21  ;;  %6942 = vmatprep.mubr.bf16.mxu0 %v7887_v22 }
 0x11c   : > { %2133 = vmatprep.mubr.bf16.mxu1 %v10485_v23  ;;  %2900 = vmatpush1.bf16.msra.mxu0 %v7333_v57  ;;  %v10533_v57 = vmov 0 }
 0x11d   : > { %2901 = vmatprep.subr.bf16.mxu0 %v7339_v8  ;;  %v308_v8 = vand.u32 15, %v250_v20 }
 0x11f   : > { %vm2460_vm2 = vcmp.ne.s32.totalorder %v308_v8, 15  ;;  %v2584_v8 = vrot.slane %v7847_v60, 1  ;;  %v10554_v60 = vld [vmem:[#allocation34_spill] sm:$0xff] }
 0x120   : > { %2902 = vmatpush1.bf16.msra.mxu0 %v7337_v41  ;;  %v2576_v41 = vrot.slane %v7815_v36, 1  ;;  %vm8429_vm11 = vmpackc.low %vm2460_vm2, %vm10516_vm14  ;;  %vm10542_vm2 = vcmask 1046528   ;;  %v10562_v36 = vld [vmem:[#allocation37_spill] sm:$0xff] }
 0x121   : > { %2903 = vmatprep.subr.bf16.mxu0 %v7342_v19  ;;  %v2578_v19 = vrot.slane %v7838_v55, 1 }
 0x122   : > { %6943 = vmatmul.mubr.bf16.gmra.mxu0 %v7954_v61 }
 0x123   : > { %2134 = vmatmul.mubr.bf16.gmra.mxu1 %v8091_v63  ;;  %6946 = vmatprep.mubr.bf16.mxu0 %v7959_v6 }
 0x124   : > { %2143 = vmatprep.mubr.bf16.mxu1 %v10485_v23  ;;  %2904 = vmatpush1.bf16.msra.mxu0 %v7340_v51 }
 0x125   : > { %2905 = vmatprep.subr.bf16.mxu0 %v7346_v7  ;;  %v322_v7 = vand.u32 15, %v252_v9  ;;  %v2582_v9 = vrot.slane %v7844_v59, 1 }
 0x128   : > { %2906 = vmatpush1.bf16.msra.mxu0 %v7344_v17 }
 0x12a   : > { %6947 = vmatmul.mubr.bf16.gmra.mxu0 %v8015_v54 }
 0x12b   : > { %2144 = vmatmul.mubr.bf16.gmra.mxu1 %v8135_v1  ;;  %6950 = vmatprep.mubr.bf16.mxu0 %v8029_v5  ;;  %v248_v5 = vadd.s32 8, %v7779_v10 }
 0x12c   : > { %2153 = vmatprep.mubr.bf16.mxu1 %v10485_v23 }
 0x12d   : > { %v294_v43 = vand.u32 15, %v248_v5 }
 0x12f   : > { %vm2458_vm0 = vcmp.ne.s32.totalorder %v294_v43, 15  ;;  %v256_v43 = vadd.s32 72, %v7779_v10 }
 0x130   : > { %vm8405_vm1 = vmpackc.low %vm2458_vm0, %vm10516_vm14  ;;  %vm2462_vm0 = vcmp.ne.s32.totalorder %v322_v7, 15 }
 0x131   : > { %v10534_v57 = vsel %vm8405_vm1, 4294967295, %v10533_v57  ;;  %v350_v7 = vand.u32 15, %v256_v43 }
 0x132   : > { %6951 = vmatmul.mubr.bf16.gmra.mxu0 %v8077_v21  ;;  %10535 = vst [vmem:[#allocation67_spill] sm:$0xff] %v10534_v57 }
 0x133   : > { %2154 = vmatmul.mubr.bf16.gmra.mxu1 %v8146_v12  ;;  %6954 = vmatprep.mubr.bf16.mxu0 %v8091_v63  ;;  %v8388_v63 = vrot.slane %v10531_v39, 1  ;;  %vm2466_vm5 = vcmp.ne.s32.totalorder %v350_v7, 15 }
 0x134   : > { %2163 = vmatprep.mubr.bf16.mxu1 %v10485_v23 }
 0x135   : > { %10532 = vst [vmem:[#allocation66_spill] sm:$0xff] %v8388_v63  ;;  %v2571_v48 = vsel %vm10280_vm6, %v8388_v63, %v2570_v26 }
 0x13a   : > { %v1364_v22 = vpop.f32.mrf.mxu0  ;;  %6955 = vmatmul.mubr.bf16.gmra.mxu0 %v8135_v1 }
 0x13b   : > { %v6880_v61 = vpop.f32.mrf.mxu1  ;;  %2164 = vmatmul.mubr.bf16.gmra.mxu1 %v8198_v25  ;;  %6958 = vmatprep.mubr.bf16.mxu0 %v8146_v12 }
 0x13c   : > { %2173 = vmatprep.mubr.bf16.mxu1 %v10485_v23  ;;  %v1366_v6 = vpop.f32.mrf.mxu0 }
 0x13d   : > { %v1569_v54 = vpop.f32.mrf.mxu1  ;;  %v2573_v6 = vsel %vm10280_vm6, %v2570_v26, %v2572_v24 }
 0x13e   : > { %v1367_v32 = vpop.f32.mrf.mxu0  ;;  %v2575_v54 = vsel %vm10280_vm6, %v2572_v24, %v2574_v18 }
 0x13f   : > { %v6881_v21 = vpop.f32.mrf.mxu1 }
 0x140   : > { %v1369_v4 = vpop.f32.mrf.mxu0  ;;  %v2577_v21 = vsel %vm10280_vm6, %v2574_v18, %v2576_v41 }
 0x141   : > { %v1571_v13 = vpop.f32.mrf.mxu1  ;;  %v2579_v4 = vsel %vm10280_vm6, %v2576_v41, %v2578_v19  ;;  %vm8440_vm6 = vmpackc.low %vm2462_vm0, %vm10516_vm14  ;;  %v2586_v41 = vrot.slane %v7904_v37, 1  ;;  %v10553_v37 = vld [vmem:[#allocation30_spill] sm:$0xff] }
 0x142   : > { %v1372_v1 = vpop.f32.mrf.mxu0  ;;  %6959 = vmatmul.mubr.bf16.gmra.mxu0 %v8198_v25  ;;  %v254_v13 = vadd.s32 56, %v7779_v10  ;;  %v8433_v20 = vpack.c.bf16 %v2579_v4, %v2577_v21  ;;  %vm10543_vm0 = vmmov %vm10542_vm2 }
 0x143   : > { %v6884_v33 = vpop.f32.mrf.mxu1  ;;  %2174 = vmatmul.mubr.bf16.gmra.mxu1 %v8213_v47  ;;  %6962 = vmatprep.mubr.bf16.mxu0 %v8213_v47  ;;  %v6223_v47 = vpack.c.bf16 %v2571_v48, %v8388_v63  ;;  %v10536_v48 = vmov 0  ;;  %vm10545_vm3 = vmmov %vm10543_vm0 }
 0x144   : > { %2181 = vmatprep.mubr.bf16.mxu1 %v10485_v23  ;;  %v1374_v12 = vpop.f32.mrf.mxu0  ;;  %v10537_v48 = vsel %vm8429_vm11, 4294967295, %v10536_v48 }
 0x145   : > { %v1581_v44 = vpop.f32.mrf.mxu1  ;;  %v1740_v15 = vadd.f32 %v1374_v12, %v1364_v22  ;;  %10538 = vst [vmem:[#allocation68_spill] sm:$0xff] %v10537_v48 }
 0x146   : > { %v1376_v2 = vpop.f32.mrf.mxu0 }
 0x147   : > { %v6885_v31 = vpop.f32.mrf.mxu1  ;;  %v8400_v25 = vadd.f32 %v1740_v15, %v1581_v44  ;;  %v6226_v44 = vpack.c.bf16 %v2575_v54, %v2573_v6  ;;  %v2580_v15 = vrot.slane %v7841_v56, 1  ;;  %v2592_v56 = vrot.slane %v10553_v37, 1 }
 0x148   : > { %v1378_v27 = vpop.f32.mrf.mxu0 }
 0x149   : > { %v1584_v50 = vpop.f32.mrf.mxu1  ;;  %v1741_v51 = vadd.f32 %v1378_v27, %v1367_v32  ;;  %v10539_v27 = vmov 0 }
 0x14a   : > { %v1382_v17 = vpop.f32.mrf.mxu0  ;;  %6963 = vmatmul.mubr.bf16.gmra.mxu0 %v10289_v3  ;;  %v10540_v27 = vsel %vm8440_vm6, 4294967295, %v10539_v27 }
 0x14b   : > { %v8411_v22 = vpop.f32.mrf.mxu1  ;;  %2182 = vmatmul.mubr.bf16.gmra.mxu1 %v10289_v3  ;;  %v8415_v61 = vadd.f32 %v1741_v51, %v1584_v50  ;;  %2923 = vmatprep.mubr.bf16.mxu0 %v10485_v23  ;;  %10541 = vst [vmem:[#allocation69_spill] sm:$0xff] %v10540_v27  ;;  %v336_v50 = vand.u32 15, %v254_v13  ;;  %v2587_v13 = vsel %vm10545_vm3, %v2584_v8, %v2586_v41  ;;  %vm8484_vm3 = vmpackc.low %vm2466_vm5, %vm10516_vm14 }
 0x14c   : > { %6982 = vmatprep.mubr.msk.bf16.mxu1 %vm8405_vm1, %v6223_v47  ;;  %v1384_v5 = vpop.f32.mrf.mxu0  ;;  %vm10555_vm5 = vmmov %vm10543_vm0 }
 0x14d   : > { %v1597_v32 = vpop.f32.mrf.mxu1  ;;  %v1742_v39 = vadd.f32 %v1384_v5, %v1372_v1  ;;  %vm2464_vm7 = vcmp.ne.s32.totalorder %v336_v50, 15 }
 0x14e   : > { %v1386_v12 = vpop.f32.mrf.mxu0 }
 0x14f   : > { %v8426_v26 = vpop.f32.mrf.mxu1  ;;  %v8437_v18 = vadd.f32 %v6884_v33, %v1742_v39  ;;  %v2581_v33 = vsel %vm10542_vm2, %v2578_v19, %v2580_v15  ;;  %v258_v39 = vadd.s32 88, %v7779_v10  ;;  %vm8471_vm2 = vmpackc.low %vm2464_vm7, %vm10516_vm14 }
 0x150   : > { %v1388_v1 = vpop.f32.mrf.mxu0  ;;  %vm10556_vm7 = vmmov %vm10543_vm0 }
 0x151   : > { %v1600_v24 = vpop.f32.mrf.mxu1  ;;  %v1743_v51 = vadd.f32 %v1388_v1, %v1376_v2  ;;  %v2583_v2 = vsel %vm10543_vm0, %v2580_v15, %v2582_v9  ;;  %v260_v1 = vadd.s32 104, %v7779_v10 }
 0x152   : > { %v1392_v6 = vpop.f32.mrf.mxu0  ;;  %6224 = vmatmul.mubr.msk.bf16.vlgmr.msra.gmra.mxu0 %vm8405_vm1, %v6223_v47  ;;  %vm10544_vm1 = vmmov %vm10543_vm0  ;;  %v8468_v15 = vpack.c.bf16 %v2583_v2, %v2581_v33  ;;  %v10550_v33 = vmov 0  ;;  %v364_v2 = vand.u32 15, %v258_v39 }
 0x153   : > { %v8446_v54 = vpop.f32.mrf.mxu1  ;;  %6983 = vmatmul.mubr.msk.bf16.vlgmr.msra.gmra.mxu1 %vm8429_vm11, %v6226_v44  ;;  %2931 = vmatprep.mubr.bf16.mxu0 %v10485_v23  ;;  %v8458_v5 = vadd.f32 %v6885_v31, %v1743_v51  ;;  %v2585_v47 = vsel %vm10544_vm1, %v2582_v9, %v2584_v8  ;;  %v10546_v31 = vmov 0  ;;  %v2588_v9 = vrot.slane %v7907_v38, 1  ;;  %v10549_v8 = vld [vmem:[#allocation29_spill] sm:$0xff] }
 0x154   : > { %6986 = vmatprep.mubr.msk.bf16.mxu1 %vm8440_vm6, %v8433_v20  ;;  %v1394_v21 = vpop.f32.mrf.mxu0  ;;  %v10547_v31 = vsel %vm8471_vm2, 4294967295, %v10546_v31  ;;  %v8475_v50 = vpack.c.bf16 %v2587_v13, %v2585_v47  ;;  %v2590_v51 = vrot.slane %v10549_v8, 1  ;;  %v10551_v33 = vsel %vm8484_vm3, 4294967295, %v10550_v33  ;;  %v7347_v38 = vld [vmem:[#allocation9 + $0xb0] ss:$12 sps:$4 sm:$0xff]  }
 0x155   : > { %v8460_v4 = vpop.f32.mrf.mxu1  ;;  %v1744_v43 = vadd.f32 %v1394_v21, %v1382_v17  ;;  %10548 = vst [vmem:[#allocation70_spill] sm:$0xff] %v10547_v31  ;;  %10552 = vst [vmem:[#allocation71_spill] sm:$0xff] %v10551_v33  ;;  %v2594_v47 = vrot.slane %v10554_v60, 1  ;;  %v378_v55 = vand.u32 15, %v260_v1  ;;  %vm2468_vm1 = vcmp.ne.s32.totalorder %v364_v2, 15  ;;  %7018 = vmatprep.subr.bf16.mxu0 %v7347_v38 }
 0x156   : > { %v1396_v3 = vpop.f32.mrf.mxu0  ;;  %v262_v60 = vadd.s32 120, %v7779_v10  ;;  %7019 = vmatpush3.bf16.msra.mxu0 %v7347_v38  ;;  %v10558_v2 = vmov 0  ;;  %v7350_v38 = vld [vmem:[#allocation9 + $0xac] ss:$12 sps:$4 sm:$0xff]   ;;  %v270_v31 = vadd.s32 184, %v7779_v10 }
 0x157   : > { %v8466_v19 = vpop.f32.mrf.mxu1  ;;  %v8479_v17 = vadd.f32 %v1744_v43, %v1597_v32  ;;  %v2589_v32 = vsel %vm10555_vm5, %v2586_v41, %v2588_v9  ;;  %vm2470_vm12 = vcmp.ne.s32.totalorder %v378_v55, 15  ;;  %vm8516_vm5 = vmpackc.low %vm2468_vm1, %vm10516_vm14  ;;  %3864 = vmatprep.subr.bf16.mxu1 %v7350_v38 }
 0x158   : > { %v1398_v7 = vpop.f32.mrf.mxu0  ;;  %v10559_v2 = vsel %vm8516_vm5, 4294967295, %v10558_v2 }
 0x159   : > { %v8481_v21 = vpop.f32.mrf.mxu1  ;;  %v1745_v13 = vadd.f32 %v1398_v7, %v1386_v12  ;;  %v2591_v12 = vsel %vm10556_vm7, %v2588_v9, %v2590_v51  ;;  %10560 = vst [vmem:[#allocation72_spill] sm:$0xff] %v10559_v2  ;;  %vm10569_vm7 = vmmov %vm10543_vm0 }
 0x15a   : > { %v1402_v59 = vpop.f32.mrf.mxu0  ;;  %6227 = vmatmul.mubr.msk.bf16.gmra.mxu0 %vm8429_vm11, %v6226_v44  ;;  %v2593_v44 = vsel %vm10543_vm0, %v2590_v51, %v2592_v56  ;;  %vm10557_vm11 = vmmov %vm10543_vm0 }
 0x15b   : > { %v8490_v8 = vpop.f32.mrf.mxu1  ;;  %6987 = vmatmul.mubr.msk.bf16.gmra.mxu1 %vm8471_vm2, %v8468_v15  ;;  %2941 = vmatprep.mubr.bf16.mxu0 %v10485_v23  ;;  %v8503_v39 = vadd.f32 %v1745_v13, %v1600_v24  ;;  %v2595_v7 = vsel %vm10557_vm11, %v2592_v56, %v2594_v47  ;;  %v8513_v24 = vpack.c.bf16 %v2591_v12, %v2589_v32  ;;  %v10561_v56 = vld [vmem:[#allocation35_spill] sm:$0xff]  ;;  %vm8530_vm11 = vmpackc.low %vm2470_vm12, %vm10516_vm14  ;;  %v10563_v32 = vmov 0 }
 0x15c   : > { %6990 = vmatprep.mubr.msk.bf16.mxu1 %vm8484_vm3, %v8475_v50  ;;  %v1404_v43 = vpop.f32.mrf.mxu0  ;;  %v8520_v51 = vpack.c.bf16 %v2595_v7, %v2593_v44  ;;  %v2596_v13 = vrot.slane %v10561_v56, 1  ;;  %v10564_v32 = vsel %vm8530_vm11, 4294967295, %v10563_v32  ;;  %v392_v12 = vand.u32 15, %v262_v60  ;;  %v10567_v7 = vld [vmem:[#allocation40_spill] sm:$0xff]  ;;  %vm10568_vm12 = vmmov %vm10543_vm0 }
 0x15d   : > { %v8505_v1 = vpop.f32.mrf.mxu1  ;;  %v1746_v37 = vadd.f32 %v1404_v43, %v1392_v6  ;;  %v2598_v6 = vrot.slane %v10562_v36, 1  ;;  %10565 = vst [vmem:[#allocation73_spill] sm:$0xff] %v10564_v32  ;;  %v2600_v44 = vrot.slane %v10566_v35, 1  ;;  %v2602_v48 = vrot.slane %v10567_v7, 1  ;;  %v7348_v56 = vld [vmem:[#allocation9 + $0xa8] ss:$12 sps:$4 sm:$0xff]  }
 0x15e   : > { %v1406_v41 = vpop.f32.mrf.mxu0  ;;  %v406_v36 = vand.u32 15, %v264_v29  ;;  %v2597_v29 = vsel %vm10568_vm12, %v2594_v47, %v2596_v13  ;;  %vm2472_vm1 = vcmp.ne.s32.totalorder %v392_v12, 15  ;;  %v266_v35 = vadd.s32 152, %v7779_v10  ;;  %3865 = vmatpush1.bf16.msra.mxu1 %v7348_v56  ;;  %v10574_v12 = vld [vmem:[#allocation41_spill] sm:$0xff] }
 0x15f   : > { %v8511_v9 = vpop.f32.mrf.mxu1  ;;  %v8525_v55 = vadd.f32 %v8411_v22, %v1746_v37  ;;  %v2599_v60 = vsel %vm10569_vm7, %v2596_v13, %v2598_v6  ;;  %v268_v47 = vadd.s32 168, %v7779_v10  ;;  %vm8564_vm12 = vmpackc.low %vm2472_vm1, %vm10516_vm14  ;;  %v2606_v56 = vrot.slane %v10575_v58, 1 }
 0x160   : > { %v1408_v43 = vpop.f32.mrf.mxu0  ;;  %vm2474_vm4 = vcmp.ne.s32.totalorder %v406_v36, 15  ;;  %vm10582_vm7 = vmmov %vm10543_vm0 }
 0x161   : > { %v8527_v28 = vpop.f32.mrf.mxu1  ;;  %v1747_v57 = vadd.f32 %v1408_v43, %v1396_v3  ;;  %v434_v58 = vand.u32 15, %v268_v47 }
 0x162   : > { %v1412_v37 = vpop.f32.mrf.mxu0  ;;  %6230 = vmatmul.mubr.msk.bf16.gmra.mxu0 %vm8440_vm6, %v8433_v20  ;;  %v2601_v20 = vsel %vm10543_vm0, %v2598_v6, %v2600_v44  ;;  %vm10570_vm6 = vmmov %vm10543_vm0 }
 0x163   : > { %v8536_v22 = vpop.f32.mrf.mxu1  ;;  %6991 = vmatmul.mubr.msk.bf16.gmra.mxu1 %vm8516_vm5, %v8513_v24  ;;  %2951 = vmatprep.mubr.bf16.mxu0 %v10485_v23  ;;  %v8551_v3 = vadd.f32 %v8426_v26, %v1747_v57  ;;  %v2603_v7 = vsel %vm10570_vm6, %v2600_v44, %v2602_v48  ;;  %v8561_v57 = vpack.c.bf16 %v2599_v60, %v2597_v29  ;;  %v10571_v26 = vmov 0  ;;  %vm8578_vm6 = vmpackc.low %vm2474_vm4, %vm10516_vm14 }
 0x164   : > { %6994 = vmatprep.mubr.msk.bf16.mxu1 %vm8530_vm11, %v8520_v51  ;;  %v1414_v38 = vpop.f32.mrf.mxu0  ;;  %v10572_v26 = vsel %vm8564_vm12, 4294967295, %v10571_v26  ;;  %v8568_v6 = vpack.c.bf16 %v2603_v7, %v2601_v20  ;;  %v2604_v44 = vrot.slane %v10574_v12, 1  ;;  %v10576_v29 = vmov 0  ;;  %v10580_v20 = vld [vmem:[#allocation46_spill] sm:$0xff]  ;;  %v7351_v12 = vld [vmem:[#allocation9 + $0x90] ss:$12 sps:$4 sm:$0xff]   ;;  %vm10581_vm4 = vmmov %vm10543_vm0 }
 0x165   : > { %v8553_v43 = vpop.f32.mrf.mxu1  ;;  %v1748_v27 = vadd.f32 %v1414_v38, %v1402_v59  ;;  %10573 = vst [vmem:[#allocation74_spill] sm:$0xff] %v10572_v26  ;;  %v7353_v59 = vld [vmem:[#allocation9 + $0x94] ss:$12 sps:$4 sm:$0xff]   ;;  %v10577_v29 = vsel %vm8578_vm6, 4294967295, %v10576_v29  ;;  %v420_v60 = vand.u32 15, %v266_v35  ;;  %v2608_v7 = vrot.slane %v10579_v46, 1 }
 0x166   : > { %v1416_v11 = vpop.f32.mrf.mxu0  ;;  %10578 = vst [vmem:[#allocation75_spill] sm:$0xff] %v10577_v29  ;;  %v2610_v42 = vrot.slane %v10580_v20, 1  ;;  %3866 = vmatprep.subr.bf16.mxu1 %v7353_v59  ;;  %v2605_v35 = vsel %vm10581_vm4, %v2602_v48, %v2604_v44  ;;  %v7354_v59 = vld [vmem:[#allocation9 + $0x98] ss:$12 sps:$4 sm:$0xff]   ;;  %vm2478_vm9 = vcmp.ne.s32.totalorder %v434_v58, 15  ;;  %v272_v48 = vadd.s32 200, %v7779_v10 }
 0x167   : > { %v8559_v13 = vpop.f32.mrf.mxu1  ;;  %v8573_v36 = vadd.f32 %v1748_v27, %v8460_v4  ;;  %vm2476_vm1 = vcmp.ne.s32.totalorder %v420_v60, 15  ;;  %v2609_v20 = vsel %vm10543_vm0, %v2606_v56, %v2608_v7  ;;  %3867 = vmatpush1.bf16.msra.mxu1 %v7351_v12  ;;  %7020 = vmatprep.subr.bf16.mxu0 %v7354_v59  ;;  %v10585_v60 = vmov 0 }
 0x168   : > { %v1418_v38 = vpop.f32.mrf.mxu0  ;;  %7021 = vmatpush3.bf16.msra.mxu0 %v7354_v59  ;;  %vm8612_vm4 = vmpackc.low %vm2476_vm1, %vm10516_vm14  ;;  %v10594_v59 = vld [vmem:[#allocation50_spill] sm:$0xff] }
 0x169   : > { %v8575_v49 = vpop.f32.mrf.mxu1  ;;  %v1749_v40 = vadd.f32 %v1418_v38, %v1406_v41  ;;  %v2607_v41 = vsel %vm10582_vm7, %v2604_v44, %v2606_v56  ;;  %v10586_v60 = vsel %vm8612_vm4, 4294967295, %v10585_v60  ;;  %v2616_v30 = vrot.slane %v10594_v59, 1  ;;  %vm10598_vm7 = vmmov %vm10543_vm0 }
 0x16a   : > { %v1422_v27 = vpop.f32.mrf.mxu0  ;;  %6233 = vmatmul.mubr.msk.bf16.gmra.mxu0 %vm8471_vm2, %v8468_v15  ;;  %vm10584_vm2 = vmmov %vm10543_vm0  ;;  %10587 = vst [vmem:[#allocation77_spill] sm:$0xff] %v10586_v60  ;;  %v274_v59 = vadd.s32 216, %v7779_v10 }
 0x16b   : > { %v8584_v4 = vpop.f32.mrf.mxu1  ;;  %6995 = vmatmul.mubr.msk.bf16.gmra.mxu1 %vm8564_vm12, %v8561_v57  ;;  %2961 = vmatprep.mubr.bf16.mxu0 %v10485_v23  ;;  %v8599_v47 = vadd.f32 %v1749_v40, %v8481_v21  ;;  %v2611_v46 = vsel %vm10584_vm2, %v2608_v7, %v2610_v42  ;;  %v8609_v21 = vpack.c.bf16 %v2607_v41, %v2605_v35  ;;  %v10588_v7 = vld [vmem:[#allocation48_spill] sm:$0xff]  ;;  %vm8626_vm2 = vmpackc.low %vm2478_vm9, %vm10516_vm14  ;;  %v10591_v35 = vmov 0 }
 0x16c   : > { %6998 = vmatprep.mubr.msk.bf16.mxu1 %vm8578_vm6, %v8568_v6  ;;  %v1424_v38 = vpop.f32.mrf.mxu0  ;;  %v8616_v56 = vpack.c.bf16 %v2611_v46, %v2609_v20  ;;  %v2612_v12 = vrot.slane %v10588_v7, 1  ;;  %v10592_v35 = vsel %vm8626_vm2, 4294967295, %v10591_v35  ;;  %v448_v41 = vand.u32 15, %v270_v31  ;;  %v10595_v46 = vld [vmem:[#allocation52_spill] sm:$0xff]  ;;  %vm10597_vm9 = vmmov %vm10543_vm0 }
 0x16d   : > { %10583 = vst [vmem:[#allocation76_spill] sm:$0xff] %v8599_v47  ;;  %v8601_v15 = vpop.f32.mrf.mxu1  ;;  %v1750_v0 = vadd.f32 %v1424_v38, %v1412_v37  ;;  %v10589_v37 = vld [vmem:[#allocation49_spill] sm:$0xff]  ;;  %10593 = vst [vmem:[#allocation79_spill] sm:$0xff] %v10592_v35  ;;  %v2618_v20 = vrot.slane %v10595_v46, 1  ;;  %v462_v7 = vand.u32 15, %v272_v48 }
 0x16e   : > { %v1426_v44 = vpop.f32.mrf.mxu0  ;;  %v2614_v58 = vrot.slane %v10589_v37, 1  ;;  %v7357_v37 = vld [vmem:[#allocation9 + $0x7c] ss:$12 sps:$4 sm:$0xff]   ;;  %vm2480_vm1 = vcmp.ne.s32.totalorder %v448_v41, 15 }
 0x16f   : > { %v8607_v40 = vpop.f32.mrf.mxu1  ;;  %v8621_v38 = vadd.f32 %v8446_v54, %v1750_v0  ;;  %3868 = vmatprep.subr.bf16.mxu1 %v7357_v37  ;;  %vm2482_vm15 = vcmp.ne.s32.totalorder %v462_v7, 15  ;;  %v10607_v37 = vld [vmem:[#allocation55_spill] sm:$0xff] }
 0x170   : > { %v1428_v34 = vpop.f32.mrf.mxu0  ;;  %3869 = vmatpush1.bf16.msra.mxu1 %v7355_v16 }
 0x171   : > { %10590 = vst [vmem:[#allocation78_spill] sm:$0xff] %v8621_v38  ;;  %v8623_v52 = vpop.f32.mrf.mxu1  ;;  %v1751_v45 = vadd.f32 %v1428_v34, %v1416_v11  ;;  %v2613_v34 = vsel %vm10597_vm9, %v2610_v42, %v2612_v12  ;;  %v2615_v11 = vsel %vm10598_vm7, %v2612_v12, %v2614_v58  ;;  %v276_v42 = vadd.s32 232, %v7779_v10  ;;  %vm8660_vm9 = vmpackc.low %vm2480_vm1, %vm10516_vm14  ;;  %v7358_v38 = vld [vmem:[#allocation9 + $0x60] ss:$12 sps:$4 sm:$0xff]  }
 0x172   : > { %v1432_v47 = vpop.f32.mrf.mxu0  ;;  %6236 = vmatmul.mubr.msk.bf16.gmra.mxu0 %vm8484_vm3, %v8475_v50  ;;  %v2617_v50 = vsel %vm10543_vm0, %v2614_v58, %v2616_v30  ;;  %vm10601_vm3 = vmmov %vm10543_vm0 }
 0x173   : > { %v8632_v0 = vpop.f32.mrf.mxu1  ;;  %6999 = vmatmul.mubr.msk.bf16.gmra.mxu1 %vm8612_vm4, %v8609_v21  ;;  %2971 = vmatprep.mubr.bf16.mxu0 %v10485_v23  ;;  %v8647_v54 = vadd.f32 %v8466_v19, %v1751_v45  ;;  %v2619_v46 = vsel %vm10601_vm3, %v2616_v30, %v2618_v20  ;;  %v8657_v45 = vpack.c.bf16 %v2615_v11, %v2613_v34  ;;  %v10603_v19 = vmov 0  ;;  %v10606_v30 = vld [vmem:[#allocation53_spill] sm:$0xff]  ;;  %vm8674_vm3 = vmpackc.low %vm2482_vm15, %vm10516_vm14 }
 0x174   : > { %10596 = vst [vmem:[#allocation80_spill] sm:$0xff] %v8632_v0  ;;  %7002 = vmatprep.mubr.msk.bf16.mxu1 %vm8626_vm2, %v8616_v56  ;;  %v1434_v31 = vpop.f32.mrf.mxu0  ;;  %v10604_v19 = vsel %vm8660_vm9, 4294967295, %v10603_v19  ;;  %v8664_v58 = vpack.c.bf16 %v2619_v46, %v2617_v50  ;;  %v2620_v41 = vrot.slane %v10606_v30, 1  ;;  %v10608_v34 = vmov 0  ;;  %vm10613_vm15 = vmmov %vm10543_vm0  ;;  %v10642_v60 = vld [vmem:[#allocation76_spill] sm:$0xff] }
 0x175   : > { %10599 = vst [vmem:[#allocation81_spill] sm:$0xff] %v8647_v54  ;;  %v8649_v48 = vpop.f32.mrf.mxu1  ;;  %v1752_v33 = vadd.f32 %v1434_v31, %v1422_v27  ;;  %10605 = vst [vmem:[#allocation84_spill] sm:$0xff] %v10604_v19  ;;  %v2622_v27 = vrot.slane %v10607_v37, 1  ;;  %v10609_v34 = vsel %vm8674_vm3, 4294967295, %v10608_v34  ;;  %v476_v11 = vand.u32 15, %v274_v59 }
 0x176   : > { %10600 = vst [vmem:[#allocation82_spill] sm:$0xff] %v8649_v48  ;;  %v1436_v12 = vpop.f32.mrf.mxu0  ;;  %10610 = vst [vmem:[#allocation85_spill] sm:$0xff] %v10609_v34  ;;  %v2626_v46 = vrot.slane %v8227_v14, 1  ;;  %v490_v30 = vand.u32 15, %v276_v42  ;;  %v7360_v37 = vld [vmem:[#allocation9 + $0x64] ss:$12 sps:$4 sm:$0xff]  }
 0x177   : > { %v8655_v0 = vpop.f32.mrf.mxu1  ;;  %v8669_v7 = vadd.f32 %v1752_v33, %v8505_v1  ;;  %v2621_v1 = vsel %vm10613_vm15, %v2618_v20, %v2620_v41  ;;  %vm10614_vm7 = vmmov %vm10543_vm0  ;;  %vm2484_vm1 = vcmp.ne.s32.totalorder %v476_v11, 15  ;;  %3870 = vmatprep.subr.bf16.mxu1 %v7360_v37  ;;  %v280_v20 = vadd.s32 264, %v7779_v10 }
 0x178   : > { %10602 = vst [vmem:[#allocation83_spill] sm:$0xff] %v8655_v0  ;;  %v1438_v16 = vpop.f32.mrf.mxu0  ;;  %v10611_v0 = vld [vmem:[#allocation56_spill] sm:$0xff]  ;;  %vm8702_vm13 = vcmp.ne.s32.totalorder %v490_v30, 15  ;;  %3871 = vmatpush1.bf16.msra.mxu1 %v7358_v38  ;;  %v2630_v30 = vrot.slane %v8241_v62, 1 }
 0x179   : > { %v8671_v31 = vpop.f32.mrf.mxu1  ;;  %v2624_v54 = vrot.slane %v10611_v0, 1  ;;  %v1753_v50 = vadd.f32 %v1438_v16, %v1426_v44  ;;  %v2623_v44 = vsel %vm10614_vm7, %v2620_v41, %v2622_v27  ;;  %v278_v0 = vadd.s32 248, %v7779_v10  ;;  %vm8728_vm15 = vmpackc.low %vm8702_vm13, %vm10516_vm14 }
 0x17a   : > { %v1442_v48 = vpop.f32.mrf.mxu0  ;;  %6239 = vmatmul.mubr.msk.bf16.gmra.mxu0 %vm8516_vm5, %v8513_v24  ;;  %vm10615_vm5 = vmmov %vm10543_vm0  ;;  %v8709_v11 = vpack.c.bf16 %v2623_v44, %v2621_v1  ;;  %v10622_v1 = vmov 0  ;;  %v518_v62 = vand.u32 15, %v280_v20  ;;  %v7364_v20 = vld [vmem:[#allocation9 + $0x4c] ss:$12 sps:$4 sm:$0xff]  }
 0x17b   : > { %v8680_v33 = vpop.f32.mrf.mxu1  ;;  %7003 = vmatmul.mubr.msk.bf16.gmra.mxu1 %vm8660_vm9, %v8657_v45  ;;  %2981 = vmatprep.mubr.bf16.mxu0 %v10485_v23  ;;  %v8695_v59 = vadd.f32 %v1753_v50, %v8527_v28  ;;  %v2625_v24 = vsel %vm10543_vm0, %v2622_v27, %v2624_v54  ;;  %v2627_v14 = vsel %vm10615_vm5, %v2624_v54, %v2626_v46  ;;  %v7361_v28 = vld [vmem:[#allocation9 + $0x80] ss:$12 sps:$4 sm:$0xff]   ;;  %v2628_v27 = vrot.slane %v8230_v53, 1  ;;  %vm8713_vm5 = vmpackc.low %vm2484_vm1, %vm10516_vm14 }
 0x17c   : > { %10612 = vst [vmem:[#allocation86_spill] sm:$0xff] %v8680_v33  ;;  %7006 = vmatprep.mubr.msk.bf16.mxu1 %vm8674_vm3, %v8664_v58  ;;  %v1444_v42 = vpop.f32.mrf.mxu0  ;;  %v10619_v54 = vmov 0  ;;  %7022 = vmatprep.subr.bf16.mxu0 %v7361_v28  ;;  %v10623_v1 = vsel %vm8728_vm15, 4294967295, %v10622_v1  ;;  %v504_v44 = vand.u32 15, %v278_v0  ;;  %v10625_v53 = vld [vmem:[#allocation62_spill] sm:$0xff]  ;;  %vm10626_vm13 = vmmov %vm10543_vm0  ;;  %v10645_v26 = vld [vmem:[#allocation81_spill] sm:$0xff] }
 0x17d   : > { %v8697_v16 = vpop.f32.mrf.mxu1  ;;  %v1754_v2 = vadd.f32 %v1444_v42, %v1432_v47  ;;  %v10620_v54 = vsel %vm8713_vm5, 4294967295, %v10619_v54  ;;  %v8717_v47 = vpack.c.bf16 %v2627_v14, %v2625_v24  ;;  %10624 = vst [vmem:[#allocation89_spill] sm:$0xff] %v10623_v1  ;;  %v2632_v14 = vrot.slane %v10625_v53, 1  ;;  %7023 = vmatpush3.bf16.msra.mxu0 %v7361_v28  ;;  %vm10627_vm7 = vmmov %vm10543_vm0  ;;  %3872 = vmatprep.subr.bf16.mxu1 %v7364_v20 }
 0x17e   : > { %v1446_v41 = vpop.f32.mrf.mxu0  ;;  %10621 = vst [vmem:[#allocation88_spill] sm:$0xff] %v10620_v54  ;;  %v2631_v0 = vsel %vm10627_vm7, %v2628_v27, %v2630_v30  ;;  %vm2488_vm1 = vcmp.ne.s32.totalorder %v504_v44, 15  ;;  %v10629_v44 = vmov 0 }
 0x17f   : > { %v8707_v50 = vpop.f32.mrf.mxu1  ;;  %v8721_v37 = vadd.f32 %v8490_v8, %v1754_v2  ;;  %v2629_v2 = vsel %vm10626_vm13, %v2626_v46, %v2628_v27  ;;  %v2633_v46 = vsel %vm10543_vm0, %v2630_v30, %v2632_v14  ;;  %vm10628_vm13 = vmmov %vm10543_vm0 }
 0x180   : > { %10618 = vst [vmem:[#allocation87_spill] sm:$0xff] %v8707_v50  ;;  %v1448_v38 = vpop.f32.mrf.mxu0  ;;  %v8753_v1 = vpack.c.bf16 %v2631_v0, %v2629_v2  ;;  %vm8759_vm7 = vmpackc.low %vm2488_vm1, %vm10516_vm14 }
 0x181   : > { %v8723_v42 = vpop.f32.mrf.mxu1  ;;  %v1755_v24 = vadd.f32 %v1448_v38, %v1436_v12  ;;  %v10630_v44 = vsel %vm8759_vm7, 4294967295, %v10629_v44 }
 0x182   : > { %v1452_v50 = vpop.f32.mrf.mxu0  ;;  %6242 = vmatmul.mubr.msk.bf16.gmra.mxu0 %vm8530_vm11, %v8520_v51  ;;  %v7362_v51 = vld [vmem:[#allocation9 + $0x48] ss:$12 sps:$4 sm:$0xff]   ;;  %vm2490_vm11 = vcmp.ne.s32.totalorder %v518_v62, 15  ;;  %10631 = vst [vmem:[#allocation90_spill] sm:$0xff] %v10630_v44 }
 0x183   : > { %v2017_v8 = vpop.f32.mrf.mxu1  ;;  %7007 = vmatmul.mubr.msk.bf16.gmra.mxu1 %vm8713_vm5, %v8709_v11  ;;  %2991 = vmatprep.mubr.bf16.mxu0 %v10485_v23  ;;  %v8747_v12 = vadd.f32 %v8511_v9, %v1755_v24  ;;  %vm8769_vm0 = vmpackc.low %vm2490_vm11, %vm10516_vm14 }
 0x184   : > { %v2361_v33 = vadd.f32 %v2017_v8, %v8400_v25  ;;  %7010 = vmatprep.mubr.msk.bf16.mxu1 %vm8728_vm15, %v8717_v47  ;;  %v1454_v28 = vpop.f32.mrf.mxu0  ;;  %v2635_v25 = vsel %vm10628_vm13, %v2632_v14, %v8388_v63  ;;  %v282_v8 = vadd.s32 280, %v7779_v10  ;;  %3873 = vmatpush1.bf16.msra.mxu1 %v7362_v51  ;;  %v10632_v14 = vmov 0  ;;  %v7367_v51 = vld [vmem:[#allocation9 + $0x34] ss:$12 sps:$4 sm:$0xff]  }
 0x185   : > { %v2019_v38 = vpop.f32.mrf.mxu1  ;;  %v1756_v53 = vadd.f32 %v1454_v28, %v1442_v48  ;;  %v8766_v10 = vpack.c.bf16 %v2635_v25, %v2633_v46  ;;  %v10633_v14 = vsel %vm8769_vm0, 4294967295, %v10632_v14  ;;  %3874 = vmatprep.subr.bf16.mxu1 %v7367_v51  ;;  %v8791_v25 = vpack.c.bf16 %v8388_v63, %v8388_v63  ;;  %v7371_v51 = vld [vmem:[#allocation9 + $0x1c] ss:$12 sps:$4 sm:$0xff]  }
 0x186   : > { %v1456_v32 = vpop.f32.mrf.mxu0  ;;  %10634 = vst [vmem:[#allocation91_spill] sm:$0xff] %v10633_v14  ;;  %v532_v24 = vand.u32 15, %v282_v8  ;;  %v10636_v8 = vmov 0  ;;  %vm10665_vm13 = vcmask 1040384  }
 0x187   : > { %v2020_v27 = vpop.f32.mrf.mxu1  ;;  %v8764_v30 = vadd.f32 %v1756_v53, %v8553_v43  ;;  %10635 = vst [vmem:[#allocation92_spill] sm:$0xff] %v8791_v25 }
 0x188   : > { %v8756_v9 = vadd.f32 %v2020_v27, %v8415_v61  ;;  %v1458_v62 = vpop.f32.mrf.mxu0  ;;  %vm2492_vm11 = vcmp.ne.s32.totalorder %v532_v24, 15 }
 0x189   : > { %v2022_v48 = vpop.f32.mrf.mxu1  ;;  %v1757_v61 = vadd.f32 %v1458_v62, %v1446_v41  ;;  %v7365_v41 = vld [vmem:[#allocation9 + $0x30] ss:$12 sps:$4 sm:$0xff]   ;;  %vm8797_vm1 = vmpackc.low %vm2492_vm11, %vm10516_vm14 }
 0x18a   : > { %v1462_v2 = vpop.f32.mrf.mxu0  ;;  %6245 = vmatmul.mubr.msk.bf16.gmra.mxu0 %vm8564_vm12, %v8561_v57  ;;  %3875 = vmatpush1.bf16.msra.mxu1 %v7365_v41  ;;  %v10637_v8 = vsel %vm8797_vm1, 4294967295, %v10636_v8  ;;  %v7369_v41 = vld [vmem:[#allocation9 + $0x18] ss:$12 sps:$4 sm:$0xff]   ;;  %vm10666_vm11 = vmmov %vm10665_vm13 }
 0x18b   : > { %v2025_v0 = vpop.f32.mrf.mxu1  ;;  %7011 = vmatmul.mubr.msk.bf16.gmra.mxu1 %vm8759_vm7, %v8753_v1  ;;  %3001 = vmatprep.mubr.bf16.mxu0 %v10485_v23  ;;  %v8782_v43 = vadd.f32 %v1757_v61, %v8575_v49  ;;  %10638 = vst [vmem:[#allocation93_spill] sm:$0xff] %v10637_v8 }
 0x18c   : > { %v2363_v53 = vadd.f32 %v2025_v0, %v8437_v18  ;;  %7014 = vmatprep.mubr.msk.bf16.mxu1 %vm8769_vm0, %v8766_v10  ;;  %v1464_v20 = vpop.f32.mrf.mxu0  ;;  %3876 = vmatprep.subr.bf16.mxu1 %v7371_v51 }
 0x18d   : > { %v2027_v28 = vpop.f32.mrf.mxu1  ;;  %v1758_v57 = vadd.f32 %v1464_v20, %v1452_v50 }
 0x18e   : > { %v8787_v38 = vadd.f32 %v2361_v33, %v2027_v28  ;;  %v1466_v46 = vpop.f32.mrf.mxu0  ;;  %v7368_v33 = vld [vmem:[#allocation9 + $0x68] ss:$12 sps:$4 sm:$0xff]   ;;  %3877 = vmatpush1.bf16.msra.mxu1 %v7369_v41  ;;  %v7375_v41 = vld [vmem:[#allocation9 + $0x50] ss:$12 sps:$4 sm:$0xff]  }
 0x18f   : > { %v2029_v18 = vpop.f32.mrf.mxu1  ;;  %v8802_v50 = vadd.f32 %v8536_v22, %v1758_v57  ;;  %7024 = vmatprep.subr.bf16.mxu0 %v7368_v33 }
 0x190   : > { %v8794_v49 = vadd.f32 %v2029_v18, %v8458_v5  ;;  %v1468_v27 = vpop.f32.mrf.mxu0  ;;  %7025 = vmatpush3.bf16.msra.mxu0 %v7368_v33 }
 0x191   : > { %v8804_v62 = vpop.f32.mrf.mxu1  ;;  %v1759_v48 = vadd.f32 %v1468_v27, %v1456_v32  ;;  %7026 = vmatprep.subr.bf16.mxu0 %v7375_v41 }
 0x192   : > { %v1472_v24 = vpop.f32.mrf.mxu0  ;;  %6248 = vmatmul.mubr.msk.bf16.gmra.mxu0 %vm8578_vm6, %v8568_v6 }
 0x193   : > { %v2035_v61 = vpop.f32.mrf.mxu1  ;;  %7015 = vmatmul.mubr.msk.bf16.gmra.mxu1 %vm8797_vm1, %v8791_v25  ;;  %3011 = vmatprep.mubr.bf16.mxu0 %v10485_v23  ;;  %v8815_v22 = vadd.f32 %v8559_v13, %v1759_v48 }
 0x194   : > { %v2365_v5 = vadd.f32 %v2035_v61, %v8479_v17  ;;  %v1474_v32 = vpop.f32.mrf.mxu0  ;;  %3896 = vmatprep.mubr.bf16.mxu1 %v10485_v23  ;;  %7027 = vmatpush3.bf16.msra.mxu0 %v7375_v41 }
 0x195   : > { %v2037_v0 = vpop.f32.mrf.mxu1  ;;  %v1760_v20 = vadd.f32 %v1474_v32, %v1462_v2  ;;  %v7374_v2 = vld [vmem:[#allocation9 + $0x4] ss:$12 sps:$4 sm:$0xff]  }
 0x196   : > { %v8818_v6 = vadd.f32 %v2363_v53, %v2037_v0  ;;  %v1476_v28 = vpop.f32.mrf.mxu0  ;;  %3878 = vmatprep.subr.bf16.mxu1 %v7374_v2 }
 0x197   : > { %v2039_v57 = vpop.f32.mrf.mxu1  ;;  %v8824_v18 = vadd.f32 %v1760_v20, %v8601_v15  ;;  %v7372_v15 = vld [vmem:[#allocation9] ss:$12 sps:$4 sm:$0xff]  }
 0x198   : > { %v8821_v17 = vadd.f32 %v2039_v57, %v8503_v39  ;;  %v1478_v13 = vpop.f32.mrf.mxu0  ;;  %3879 = vmatpush1.bf16.msra.mxu1 %v7372_v15 }
 0x199   : > { %v8826_v33 = vpop.f32.mrf.mxu1  ;;  %v1761_v27 = vadd.f32 %v1478_v13, %v1466_v46 }
 0x19a   : > { %v1482_v48 = vpop.f32.mrf.mxu0  ;;  %6251 = vmatmul.mubr.msk.bf16.gmra.mxu0 %vm8612_vm4, %v8609_v21 }
 0x19b   : > { %v2045_v61 = vpop.f32.mrf.mxu1  ;;  %3021 = vmatprep.mubr.bf16.mxu0 %v10485_v23  ;;  %v8834_v39 = vadd.f32 %v1761_v27, %v8623_v52  ;;  %v10639_v27 = vld [vmem:[#allocation15_spill] sm:$0xff] }
 0x19c   : > { %v2367_v53 = vadd.f32 %v2045_v61, %v8525_v55  ;;  %v1484_v32 = vpop.f32.mrf.mxu0  ;;  %v10640_v61 = vld [vmem:[#allocation16_spill] sm:$0xff] }
 0x19d   : > { %v2047_v0 = vpop.f32.mrf.mxu1  ;;  %v1762_v46 = vadd.f32 %v1484_v32, %v1472_v24  ;;  %vm10641_vm14 = vnez %v10640_v61  ;;  %v7376_v24 = vld [vmem:[#allocation9 + $0x38] ss:$12 sps:$4 sm:$0xff]  }
 0x19e   : > { %v8836_v51 = vadd.f32 %v2365_v5, %v2047_v0  ;;  %v1486_v20 = vpop.f32.mrf.mxu0  ;;  %6357 = vmatmul.mubr.msk.bf16.vlgmr.msra.gmra.mxu1 %vm10641_vm14, %v10639_v27  ;;  %7028 = vmatprep.subr.bf16.mxu0 %v7376_v24 }
 0x19f   : > { %v2049_v57 = vpop.f32.mrf.mxu1  ;;  %v8842_v55 = vadd.f32 %v8584_v4, %v1762_v46  ;;  %3904 = vmatprep.mubr.bf16.mxu1 %v10485_v23  ;;  %7029 = vmatpush3.bf16.msra.mxu0 %v7376_v24  ;;  %v7377_v46 = vld [vmem:[#allocation9 + $0x20] ss:$12 sps:$4 sm:$0xff]   ;;  %v7379_v24 = vld [vmem:[#allocation9 + $0x8] ss:$12 sps:$4 sm:$0xff]  }
 0x1a0   : > { %v8839_v21 = vadd.f32 %v2049_v57, %v8551_v3  ;;  %v1488_v52 = vpop.f32.mrf.mxu0  ;;  %7030 = vmatprep.subr.bf16.mxu0 %v7377_v46 }
 0x1a1   : > { %v8844_v13 = vpop.f32.mrf.mxu1  ;;  %v1763_v5 = vadd.f32 %v1488_v52, %v1476_v28 }
 0x1a2   : > { %v1492_v2 = vpop.f32.mrf.mxu0  ;;  %6254 = vmatmul.mubr.msk.bf16.gmra.mxu0 %vm8626_vm2, %v8616_v56  ;;  %v10643_v56 = vld [vmem:[#allocation82_spill] sm:$0xff] }
 0x1a3   : > { %v2055_v15 = vpop.f32.mrf.mxu1  ;;  %3031 = vmatprep.mubr.bf16.mxu0 %v10485_v23  ;;  %v8856_v4 = vadd.f32 %v8607_v40, %v1763_v5  ;;  %7031 = vmatpush3.bf16.msra.mxu0 %v7377_v46 }
 0x1a4   : > { %v2369_v3 = vadd.f32 %v2055_v15, %v8573_v36  ;;  %v1494_v32 = vpop.f32.mrf.mxu0  ;;  %7032 = vmatprep.subr.bf16.mxu0 %v7379_v24 }
 0x1a5   : > { %v2057_v0 = vpop.f32.mrf.mxu1  ;;  %v1764_v28 = vadd.f32 %v1494_v32, %v1482_v48 }
 0x1a6   : > { %v8858_v41 = vadd.f32 %v2367_v53, %v2057_v0  ;;  %v1496_v57 = vpop.f32.mrf.mxu0  ;;  %v10644_v53 = vld [vmem:[#allocation78_spill] sm:$0xff] }
 0x1a7   : > { %v2059_v52 = vpop.f32.mrf.mxu1  ;;  %v8864_v29 = vadd.f32 %v1764_v28, %v10643_v56  ;;  %7033 = vmatpush3.bf16.msra.mxu0 %v7379_v24 }
 0x1a8   : > { %v8861_v35 = vadd.f32 %v2059_v52, %v10642_v60  ;;  %v1498_v36 = vpop.f32.mrf.mxu0  ;;  %v7378_v52 = vld [vmem:[#allocation9 + $0x170] ss:$12 sps:$4 sm:$0xff]  }
 0x1a9   : > { %v8866_v15 = vpop.f32.mrf.mxu1  ;;  %v1765_v40 = vadd.f32 %v1498_v36, %v1486_v20  ;;  %7070 = vmatprep.subr.bf16.mxu1 %v7378_v52 }
 0x1aa   : > { %v1502_v5 = vpop.f32.mrf.mxu0  ;;  %6257 = vmatmul.mubr.msk.bf16.gmra.mxu0 %vm8660_vm9, %v8657_v45  ;;  %v10646_v45 = vld [vmem:[#allocation80_spill] sm:$0xff]  ;;  %7071 = vmatpush3.bf16.msra.mxu1 %v7378_v52 }
 0x1ab   : > { %v2065_v48 = vpop.f32.mrf.mxu1  ;;  %3041 = vmatprep.mubr.bf16.mxu0 %v10485_v23  ;;  %v8874_v60 = vadd.f32 %v1765_v40, %v8671_v31 }
 0x1ac   : > { %v2371_v32 = vadd.f32 %v2065_v48, %v10644_v53  ;;  %v1504_v0 = vpop.f32.mrf.mxu0 }
 0x1ad   : > { %v2067_v28 = vpop.f32.mrf.mxu1  ;;  %v1766_v46 = vadd.f32 %v1504_v0, %v1492_v2 }
 0x1ae   : > { %v8876_v20 = vadd.f32 %v2369_v3, %v2067_v28  ;;  %v1506_v56 = vpop.f32.mrf.mxu0 }
 0x1af   : > { %v2069_v36 = vpop.f32.mrf.mxu1  ;;  %v8882_v48 = vadd.f32 %v10646_v45, %v1766_v46 }
 0x1b0   : > { %v8879_v19 = vadd.f32 %v2069_v36, %v10645_v26  ;;  %v1508_v53 = vpop.f32.mrf.mxu0  ;;  %v10647_v26 = vld [vmem:[#allocation83_spill] sm:$0xff] }
 0x1b1   : > { %v8884_v31 = vpop.f32.mrf.mxu1  ;;  %v1767_v40 = vadd.f32 %v1508_v53, %v1496_v57 }
 0x1b2   : > { %v1512_v63 = vpop.f32.mrf.mxu0  ;;  %6260 = vmatmul.mubr.msk.bf16.gmra.mxu0 %vm8674_vm3, %v8664_v58 }
 0x1b3   : > { %v2075_v24 = vpop.f32.mrf.mxu1  ;;  %3051 = vmatprep.mubr.bf16.mxu0 %v10485_v23  ;;  %v8892_v3 = vadd.f32 %v10647_v26, %v1767_v40 }
 0x1b4   : > { %v2373_v2 = vadd.f32 %v2075_v24, %v8669_v7  ;;  %v1514_v0 = vpop.f32.mrf.mxu0 }
 0x1b5   : > { %v2077_v28 = vpop.f32.mrf.mxu1  ;;  %v1768_v46 = vadd.f32 %v1514_v0, %v1502_v5 }
 0x1b6   : > { %v8894_v36 = vadd.f32 %v2371_v32, %v2077_v28  ;;  %v1516_v52 = vpop.f32.mrf.mxu0 }
 0x1b7   : > { %v2079_v57 = vpop.f32.mrf.mxu1  ;;  %v8900_v53 = vadd.f32 %v1768_v46, %v8697_v16 }
 0x1b8   : > { %v8897_v45 = vadd.f32 %v2079_v57, %v8695_v59  ;;  %v1518_v58 = vpop.f32.mrf.mxu0  ;;  %v7380_v57 = vld [vmem:[#allocation9 + $0x158] ss:$12 sps:$4 sm:$0xff]  }
 0x1b9   : > { %v8902_v7 = vpop.f32.mrf.mxu1  ;;  %v1769_v24 = vadd.f32 %v1518_v58, %v1506_v56  ;;  %7072 = vmatprep.subr.bf16.mxu1 %v7380_v57 }
 0x1ba   : > { %v1522_v34 = vpop.f32.mrf.mxu0  ;;  %6263 = vmatmul.mubr.msk.bf16.gmra.mxu0 %vm8713_vm5, %v8709_v11  ;;  %7073 = vmatpush3.bf16.msra.mxu1 %v7380_v57 }
 0x1bb   : > { %v2085_v40 = vpop.f32.mrf.mxu1  ;;  %3061 = vmatprep.mubr.bf16.mxu0 %v10485_v23  ;;  %v8910_v59 = vadd.f32 %v1769_v24, %v8723_v42 }
 0x1bc   : > { %v2375_v5 = vadd.f32 %v2085_v40, %v8721_v37  ;;  %v1523_v32 = vpop.f32.mrf.mxu0 }
 0x1bd   : > { %v2087_v16 = vpop.f32.mrf.mxu1  ;;  %v8912_v26 = vadd.f32 %v1523_v32, %v1512_v63 }
 0x1be   : > { %v8914_v0 = vadd.f32 %v2373_v2, %v2087_v16  ;;  %v1525_v56 = vpop.f32.mrf.mxu0 }
 0x1bf   : > { %v2089_v34 = vpop.f32.mrf.mxu1 }
 0x1c0   : > { %v8917_v28 = vadd.f32 %v2089_v34, %v8747_v12  ;;  %v1526_v46 = vpop.f32.mrf.mxu0 }
 0x1c1   : > { %v8919_v11 = vpop.f32.mrf.mxu1  ;;  %v8921_v37 = vadd.f32 %v1526_v46, %v1516_v52 }
 0x1c2   : > { %v1530_v58 = vpop.f32.mrf.mxu0  ;;  %6266 = vmatmul.mubr.msk.bf16.gmra.mxu0 %vm8728_vm15, %v8717_v47 }
 0x1c3   : > { %v2095_v42 = vpop.f32.mrf.mxu1  ;;  %3071 = vmatprep.mubr.bf16.mxu0 %v10485_v23 }
 0x1c4   : > { %v2377_v63 = vadd.f32 %v2095_v42, %v8764_v30  ;;  %v1531_v2 = vpop.f32.mrf.mxu0 }
 0x1c5   : > { %v2097_v12 = vpop.f32.mrf.mxu1 }
 0x1c6   : > { %v8928_v40 = vadd.f32 %v2375_v5, %v2097_v12  ;;  %v1532_v32 = vpop.f32.mrf.mxu0 }
 0x1c7   : > { %v2099_v52 = vpop.f32.mrf.mxu1 }
 0x1c8   : > { %v8931_v16 = vadd.f32 %v2099_v52, %v8782_v43  ;;  %v1533_v56 = vpop.f32.mrf.mxu0  ;;  %v7381_v52 = vld [vmem:[#allocation9 + $0x140] ss:$12 sps:$4 sm:$0xff]  }
 0x1c9   : > { %v8933_v34 = vpop.f32.mrf.mxu1  ;;  %7074 = vmatprep.subr.bf16.mxu1 %v7381_v52 }
 0x1ca   : > { %v6932_v47 = vpop.f32.mrf.mxu0  ;;  %6269 = vmatmul.mubr.msk.bf16.gmra.mxu0 %vm8759_vm7, %v8753_v1  ;;  %7075 = vmatpush3.bf16.msra.mxu1 %v7381_v52 }
 0x1cb   : > { %v2105_v46 = vpop.f32.mrf.mxu1  ;;  %3081 = vmatprep.mubr.bf16.mxu0 %v10485_v23 }
 0x1cc   : > { %v2379_v30 = vadd.f32 %v2105_v46, %v8802_v50  ;;  %v2222_v57 = vpop.f32.mrf.mxu0  ;;  %v2396_v46 = vadd.f32 %v8794_v49, %v8826_v33 }
 0x1cd   : > { %v2107_v5 = vpop.f32.mrf.mxu1 }
 0x1ce   : > { %v8940_v58 = vadd.f32 %v2377_v63, %v2107_v5  ;;  %v6933_v43 = vpop.f32.mrf.mxu0 }
 0x1cf   : > { %v2109_v42 = vpop.f32.mrf.mxu1 }
 0x1d0   : > { %v8943_v2 = vadd.f32 %v2109_v42, %v8815_v22  ;;  %v2224_v32 = vpop.f32.mrf.mxu0 }
 0x1d1   : > { %v8945_v12 = vpop.f32.mrf.mxu1 }
 0x1d2   : > { %v6936_v47 = vpop.f32.mrf.mxu0  ;;  %6272 = vmatmul.mubr.msk.bf16.gmra.mxu0 %vm8769_vm0, %v8766_v10 }
 0x1d3   : > { %v2115_v56 = vpop.f32.mrf.mxu1  ;;  %v8952_v50 = vadd.f32 %v6936_v47, %v8818_v6  ;;  %3089 = vmatprep.mubr.bf16.mxu0 %v10485_v23 }
 0x1d4   : > { %v2381_v1 = vadd.f32 %v2115_v56, %v8824_v18  ;;  %v2234_v63 = vpop.f32.mrf.mxu0 }
 0x1d5   : > { %v2117_v22 = vpop.f32.mrf.mxu1  ;;  %v8958_v57 = vadd.f32 %v8787_v38, %v2234_v63 }
 0x1d6   : > { %v2411_v5 = vadd.f32 %v2379_v30, %v2117_v22  ;;  %v6937_v10 = vpop.f32.mrf.mxu0  ;;  %v2400_v30 = vadd.f32 %v8839_v21, %v8866_v15 }
 0x1d7   : > { %v2119_v42 = vpop.f32.mrf.mxu1  ;;  %v8963_v6 = vadd.f32 %v6937_v10, %v2396_v46 }
 0x1d8   : > { %v8961_v18 = vadd.f32 %v2119_v42, %v8834_v39  ;;  %v8965_v32 = vpop.f32.mrf.mxu0 }
 0x1d9   : > { %v2121_v43 = vpop.f32.mrf.mxu1 }
 0x1da   : > { %v6940_v47 = vpop.f32.mrf.mxu0  ;;  %6275 = vmatmul.mubr.msk.bf16.gmra.mxu0 %vm8797_vm1, %v8791_v25 }
 0x1db   : > { %v2125_v56 = vpop.f32.mrf.mxu1  ;;  %v8972_v38 = vadd.f32 %v6940_v47, %v8858_v41  ;;  %7034 = vmatprep.mubr.msk.bf16.mxu0 %vm10641_vm14, %v10639_v27  ;;  %vm10668_vm14 = vcmask 1046528  }
 0x1dc   : > { %v2383_v49 = vadd.f32 %v2125_v56, %v8842_v55  ;;  %v2250_v39 = vpop.f32.mrf.mxu0  ;;  %v2404_v56 = vadd.f32 %v8879_v19, %v8902_v7 }
 0x1dd   : > { %v2127_v33 = vpop.f32.mrf.mxu1  ;;  %v8982_v22 = vadd.f32 %v8836_v51, %v2250_v39 }
 0x1de   : > { %v8979_v52 = vadd.f32 %v2381_v1, %v2127_v33  ;;  %v6941_v46 = vpop.f32.mrf.mxu0  ;;  %v7382_v33 = vld [vmem:[#allocation9 + $0x128] ss:$12 sps:$4 sm:$0xff]  }
 0x1df   : > { %v2129_v63 = vpop.f32.mrf.mxu1  ;;  %v8987_v41 = vadd.f32 %v6941_v46, %v2400_v30  ;;  %7076 = vmatprep.subr.bf16.mxu1 %v7382_v33 }
 0x1e0   : > { %v8985_v55 = vadd.f32 %v2129_v63, %v8856_v4  ;;  %v8991_v27 = vpop.f32.mrf.mxu0  ;;  %7077 = vmatpush3.bf16.msra.mxu1 %v7382_v33 }
 0x1e1   : > { %v8989_v42 = vpop.f32.mrf.mxu1 }
 0x1e2   : > { %v6944_v10 = vpop.f32.mrf.mxu0 }
 0x1e3   : > { %v2135_v61 = vpop.f32.mrf.mxu1  ;;  %v8995_v15 = vadd.f32 %v6944_v10, %v8894_v36 }
 0x1e4   : > { %v2385_v21 = vadd.f32 %v2135_v61, %v8864_v29  ;;  %v2266_v1 = vpop.f32.mrf.mxu0 }
 0x1e5   : > { %v2137_v51 = vpop.f32.mrf.mxu1  ;;  %v9000_v47 = vadd.f32 %v8876_v20, %v2266_v1 }
 0x1e6   : > { %v2415_v4 = vadd.f32 %v2383_v49, %v2137_v51  ;;  %v6945_v30 = vpop.f32.mrf.mxu0 }
 0x1e7   : > { %v2139_v39 = vpop.f32.mrf.mxu1  ;;  %v9005_v46 = vadd.f32 %v6945_v30, %v2404_v56 }
 0x1e8   : > { %v9003_v63 = vadd.f32 %v2139_v39, %v8874_v60  ;;  %v9007_v36 = vpop.f32.mrf.mxu0  ;;  %v2408_v60 = vadd.f32 %v8917_v28, %v8933_v34 }
 0x1e9   : > { %v2141_v29 = vpop.f32.mrf.mxu1 }
 0x1ea   : > { %10649 = vst [vmem:[#allocation15_spill] sm:$0xff] %v9003_v63  ;;  %v6948_v10 = vpop.f32.mrf.mxu0 }
 0x1eb   : > { %v2145_v61 = vpop.f32.mrf.mxu1  ;;  %v9011_v20 = vadd.f32 %v6948_v10, %v8928_v40  ;;  %v7385_v40 = vld [vmem:[#allocation9 + $0x16c] ss:$12 sps:$4 sm:$0xff]  }
 0x1ec   : > { %v2387_v19 = vadd.f32 %v2145_v61, %v8882_v48  ;;  %v2282_v49 = vpop.f32.mrf.mxu0  ;;  %4517 = vmatprep.subr.bf16.mxu0 %v7385_v40  ;;  %v10651_v40 = vld [vmem:[#allocation86_spill] sm:$0xff] }
 0x1ed   : > { %v2147_v7 = vpop.f32.mrf.mxu1  ;;  %v9016_v1 = vadd.f32 %v8914_v0, %v2282_v49  ;;  %v7386_v49 = vld [vmem:[#allocation9 + $0x110] ss:$12 sps:$4 sm:$0xff]  }
 0x1ee   : > { %v2417_v51 = vadd.f32 %v2385_v21, %v2147_v7  ;;  %v6949_v39 = vpop.f32.mrf.mxu0  ;;  %v2412_v21 = vadd.f32 %v8943_v2, %v2121_v43  ;;  %7078 = vmatprep.subr.bf16.mxu1 %v7386_v49  ;;  %v1802_v2 = vadd.f32 %v10651_v40, %v8912_v26 }
 0x1ef   : > { %v2149_v56 = vpop.f32.mrf.mxu1  ;;  %v9019_v30 = vadd.f32 %v6949_v39, %v2408_v60  ;;  %7079 = vmatpush3.bf16.msra.mxu1 %v7386_v49 }
 0x1f0   : > { %v2388_v33 = vadd.f32 %v2149_v56, %v8892_v3  ;;  %v9023_v48 = vpop.f32.mrf.mxu0 }
 0x1f1   : > { %v9021_v8 = vpop.f32.mrf.mxu1 }
 0x1f2   : > { %v6952_v10 = vpop.f32.mrf.mxu0 }
 0x1f3   : > { %v2155_v61 = vpop.f32.mrf.mxu1  ;;  %v9026_v28 = vadd.f32 %v6952_v10, %v2411_v5 }
 0x1f4   : > { %v2389_v25 = vadd.f32 %v2155_v61, %v8900_v53  ;;  %v2298_v34 = vpop.f32.mrf.mxu0 }
 0x1f5   : > { %v2157_v0 = vpop.f32.mrf.mxu1  ;;  %v9030_v3 = vadd.f32 %v8940_v58, %v2298_v34 }
 0x1f6   : > { %v2419_v7 = vadd.f32 %v2387_v19, %v2157_v0  ;;  %v6953_v56 = vpop.f32.mrf.mxu0 }
 0x1f7   : > { %v2159_v60 = vpop.f32.mrf.mxu1  ;;  %v9035_v14 = vadd.f32 %v6953_v56, %v2412_v21 }
 0x1f8   : > { %v9033_v39 = vadd.f32 %v2159_v60, %v8910_v59  ;;  %v9037_v5 = vpop.f32.mrf.mxu0  ;;  %v2416_v59 = vadd.f32 %v8985_v55, %v2141_v29  ;;  %v10652_v60 = vld [vmem:[#allocation87_spill] sm:$0xff] }
 0x1f9   : > { %v2161_v53 = vpop.f32.mrf.mxu1  ;;  %v1803_v56 = vadd.f32 %v10652_v60, %v8921_v37 }
 0x1fa   : > { %10650 = vst [vmem:[#allocation16_spill] sm:$0xff] %v9033_v39  ;;  %v6956_v19 = vpop.f32.mrf.mxu0 }
 0x1fb   : > { %v2165_v43 = vpop.f32.mrf.mxu1  ;;  %v9041_v61 = vadd.f32 %v6956_v19, %v2415_v4 }
 0x1fc   : > { %v2391_v58 = vadd.f32 %v2165_v43, %v1802_v2  ;;  %v2314_v0 = vpop.f32.mrf.mxu0 }
 0x1fd   : > { %v2167_v10 = vpop.f32.mrf.mxu1  ;;  %v9045_v21 = vadd.f32 %v8979_v52, %v2314_v0  ;;  %v2420_v52 = vadd.f32 %v2388_v33, %v2161_v53 }
 0x1fe   : > { %v2421_v34 = vadd.f32 %v2389_v25, %v2167_v10  ;;  %v6957_v44 = vpop.f32.mrf.mxu0 }
 0x1ff   : > { %v2169_v49 = vpop.f32.mrf.mxu1  ;;  %v9049_v26 = vadd.f32 %v6957_v44, %v2416_v59 }
 0x200   : > { %v2392_v24 = vadd.f32 %v2169_v49, %v1803_v56  ;;  %v9053_v4 = vpop.f32.mrf.mxu0  ;;  %v7393_v56 = vld [vmem:[#allocation9 + $0xf8] ss:$12 sps:$4 sm:$0xff]  }
 0x201   : > { %v9051_v40 = vpop.f32.mrf.mxu1  ;;  %7080 = vmatprep.subr.bf16.mxu1 %v7393_v56 }
 0x202   : > { %10653 = vst [vmem:[#allocation76_spill] sm:$0xff] %v9051_v40  ;;  %v6960_v43 = vpop.f32.mrf.mxu0  ;;  %7081 = vmatpush3.bf16.msra.mxu1 %v7393_v56  ;;  %v7400_v40 = vld [vmem:[#allocation9 + $0xe0] ss:$12 sps:$4 sm:$0xff]  }
 0x203   : > { %v2175_v2 = vpop.f32.mrf.mxu1  ;;  %v9055_v19 = vadd.f32 %v6960_v43, %v2419_v7  ;;  %7082 = vmatprep.subr.bf16.mxu1 %v7400_v40 }
 0x204   : > { %v2330_v55 = vpop.f32.mrf.mxu0 }
 0x205   : > { %10654 = vst [vmem:[#allocation82_spill] sm:$0xff] %v9055_v19  ;;  %v2176_v25 = vpop.f32.mrf.mxu1  ;;  %v9057_v10 = vadd.f32 %v2417_v51, %v2330_v55 }
 0x206   : > { %v2423_v29 = vadd.f32 %v2391_v58, %v2176_v25  ;;  %v6961_v0 = vpop.f32.mrf.mxu0  ;;  %7083 = vmatpush3.bf16.msra.mxu1 %v7400_v40 }
 0x207   : > { %10655 = vst [vmem:[#allocation78_spill] sm:$0xff] %v9057_v10  ;;  %v2178_v37 = vpop.f32.mrf.mxu1  ;;  %v9059_v60 = vadd.f32 %v6961_v0, %v2420_v52 }
 0x208   : > { %v9061_v59 = vpop.f32.mrf.mxu0 }
 0x209   : > { %10656 = vst [vmem:[#allocation81_spill] sm:$0xff] %v9059_v60  ;;  %v2179_v44 = vpop.f32.mrf.mxu1  ;;  %10657 = vst [vmem:[#allocation80_spill] sm:$0xff] %v9061_v59  ;;  %v7383_v60 = vld [vmem:[#allocation9 + $0x168] ss:$12 sps:$4 sm:$0xff]  }
 0x20a   : > { %v6964_v54 = vpop.f32.mrf.mxu0  ;;  %v2424_v33 = vadd.f32 %v2392_v24, %v2179_v44 }
 0x20b   : > { %v2183_v49 = vpop.f32.mrf.mxu1  ;;  %v9063_v2 = vadd.f32 %v6964_v54, %v2423_v29 }
 0x20c   : > { %v2346_v43 = vpop.f32.mrf.mxu0 }
 0x20d   : > { %10658 = vst [vmem:[#allocation83_spill] sm:$0xff] %v9063_v2  ;;  %v2184_v7 = vpop.f32.mrf.mxu1  ;;  %v9065_v53 = vadd.f32 %v2421_v34, %v2346_v43  ;;  %v2394_v34 = vadd.f32 %v8756_v9, %v8804_v62 }
 0x20e   : > { %v6965_v58 = vpop.f32.mrf.mxu0 }
 0x20f   : > { %10659 = vst [vmem:[#allocation86_spill] sm:$0xff] %v9065_v53  ;;  %v2185_v51 = vpop.f32.mrf.mxu1  ;;  %v9067_v25 = vadd.f32 %v6965_v58, %v2424_v33 }
 0x210   : > { %v9069_v52 = vpop.f32.mrf.mxu0  ;;  %v2426_v51 = vadd.f32 %v2394_v34, %v8965_v32 }
 0x211   : > { %10660 = vst [vmem:[#allocation87_spill] sm:$0xff] %v9067_v25  ;;  %v2186_v55 = vpop.f32.mrf.mxu1  ;;  %10661 = vst [vmem:[#allocation94_spill] sm:$0xff] %v9069_v52  ;;  %v10664_v52 = vld [vmem:[#allocation14_spill] sm:$0xff] }
 0x212   : > { %v2925_v37 = vpop.f32.mrf.mxu0 }
 0x213   : > { %v6984_v0 = vpop.f32.mrf.mxu1  ;;  %v3269_v44 = vadd.f32 %v2925_v37, %v8958_v57  ;;  %v7407_v37 = vld [vmem:[#allocation9 + $0xc8] ss:$12 sps:$4 sm:$0xff]  }
 0x214   : > { %v2927_v49 = vpop.f32.mrf.mxu0  ;;  %7084 = vmatprep.subr.bf16.mxu1 %v7407_v37 }
 0x215   : > { %v3130_v39 = vpop.f32.mrf.mxu1  ;;  %7085 = vmatpush3.bf16.msra.mxu1 %v7407_v37 }
 0x216   : > { %v2928_v54 = vpop.f32.mrf.mxu0  ;;  %v9078_v39 = vld [vmem:[%s10198_s3] ss:$0 sm:$0xff] }
 0x217   : > { %v6985_v29 = vpop.f32.mrf.mxu1  ;;  %v3270_v0 = vadd.f32 %v2928_v54, %v2426_v51 }
 0x218   : > { %v2930_v2 = vpop.f32.mrf.mxu0 }
 0x219   : > { %v3132_v7 = vpop.f32.mrf.mxu1 }
 0x21a   : > { %v2933_v56 = vpop.f32.mrf.mxu0 }
 0x21b   : > { %v6988_v24 = vpop.f32.mrf.mxu1  ;;  %v3271_v32 = vadd.f32 %v2933_v56, %v8952_v50 }
 0x21c   : > { %v2935_v43 = vpop.f32.mrf.mxu0 }
 0x21d   : > { %v3142_v33 = vpop.f32.mrf.mxu1  ;;  %v3301_v58 = vadd.f32 %v3269_v44, %v2935_v43 }
 0x21e   : > { %v2937_v2 = vpop.f32.mrf.mxu0 }
 0x21f   : > { %v6989_v55 = vpop.f32.mrf.mxu1  ;;  %v3333_v49 = vadd.f32 %v3301_v58, %v3142_v33  ;;  %v3272_v50 = vadd.f32 %v2937_v2, %v8963_v6 }
 0x220   : > { %v2939_v29 = vpop.f32.mrf.mxu0 }
 0x221   : > { %v3145_v9 = vpop.f32.mrf.mxu1  ;;  %v3370_v62 = vadd.f32 %v9078_v39, %v3333_v49  ;;  %v3302_v57 = vadd.f32 %v3270_v0, %v2939_v29 }
 0x222   : > { %v2943_v7 = vpop.f32.mrf.mxu0 }
 0x223   : > { %v9081_v40 = vpop.f32.mrf.mxu1  ;;  %v9084_v34 = vmax.f32 %v3370_v62, 0.0  ;;  %v3334_v44 = vadd.f32 %v3302_v57, %v3145_v9 }
 0x224   : > { %v2945_v43 = vpop.f32.mrf.mxu0 }
 0x225   : > { %10662 = vst [vmem:[#allocation95_spill] sm:$0xff] %v9084_v34  ;;  %v3158_v25 = vpop.f32.mrf.mxu1  ;;  %v3371_v54 = vadd.f32 %v9078_v39, %v3334_v44  ;;  %v3303_v33 = vadd.f32 %v3271_v32, %v2945_v43  ;;  %v3546_v0 = vrot.slane %v9084_v34, 7  ;;  %v2398_v44 = vadd.f32 %v8821_v17, %v8844_v13 }
 0x226   : > { %v2947_v51 = vpop.f32.mrf.mxu0  ;;  %v3273_v43 = vadd.f32 %v2943_v7, %v8982_v22  ;;  %v7389_v22 = vld [vmem:[#allocation9 + $0x154] ss:$12 sps:$4 sm:$0xff]  }
 0x227   : > { %v9087_v58 = vpop.f32.mrf.mxu1  ;;  %v3403_v49 = vmax.f32 %v3371_v54, 0.0  ;;  %v3335_v29 = vadd.f32 %v6988_v24, %v3303_v33  ;;  %v3547_v6 = vsel %vm10665_vm13, %v10664_v52, %v3546_v0  ;;  %v2430_v7 = vadd.f32 %v2398_v44, %v8991_v27  ;;  %v7387_v44 = vld [vmem:[#allocation9 + $0x150] ss:$12 sps:$4 sm:$0xff]  }
 0x228   : > { %v2949_v56 = vpop.f32.mrf.mxu0 }
 0x229   : > { %v3161_v9 = vpop.f32.mrf.mxu1  ;;  %v3548_v62 = vrot.slane %v3403_v49, 7  ;;  %v9093_v57 = vpack.c.bf16 %v3403_v49, %v9084_v34  ;;  %v4997_v37 = vrot.slane %v3403_v49, 1  ;;  %v3372_v32 = vadd.f32 %v9078_v39, %v3335_v29 }
 0x22a   : > { %v3304_v54 = vadd.f32 %v3272_v50, %v2949_v56  ;;  %v2953_v24 = vpop.f32.mrf.mxu0  ;;  %v10667_v49 = vrot.slane %v9084_v34, 1 }
 0x22b   : > { %10663 = vst [vmem:[#allocation96_spill] sm:$0xff] %v9093_v57  ;;  %v9099_v33 = vpop.f32.mrf.mxu1  ;;  %v3404_v2 = vmax.f32 %v3372_v32, 0.0  ;;  %v3549_v53 = vsel %vm10666_vm11, %v3546_v0, %v3548_v62  ;;  %v10669_v0 = vld [vmem:[#allocation25_spill] sm:$0xff] }
 0x22c   : > { %v4998_v29 = vsel %vm10668_vm14, %v10667_v49, %v4997_v37  ;;  %v3336_v57 = vadd.f32 %v6989_v55, %v3304_v54  ;;  %v2955_v19 = vpop.f32.mrf.mxu0  ;;  %v6359_v17 = vpack.c.bf16 %v3549_v53, %v3547_v6  ;;  %vm10670_vm13 = vnez %v10669_v0  ;;  %v7392_v6 = vld [vmem:[#allocation9 + $0x13c] ss:$12 sps:$4 sm:$0xff]  }
 0x22d   : > { %v9107_v13 = vpop.f32.mrf.mxu1  ;;  %v3550_v50 = vrot.slane %v3404_v2, 7  ;;  %v4999_v56 = vrot.slane %v3404_v2, 1  ;;  %v3305_v59 = vadd.f32 %v3273_v43, %v2955_v19  ;;  %v3274_v53 = vadd.f32 %v2947_v51, %v2430_v7 }
 0x22e   : > { %v3373_v32 = vadd.f32 %v9078_v39, %v3336_v57  ;;  %v2957_v52 = vpop.f32.mrf.mxu0  ;;  %6360 = vmatmul.mubr.msk.bf16.gmra.mxu1 %vm10670_vm13, %v6359_v17  ;;  %7035 = vmatmul.mubr.msk.bf16.vlgmr.msra.gmra.mxu0 %vm10670_vm13, %v6359_v17  ;;  %vm10673_vm13 = vmmov %vm10666_vm11 }
 0x22f   : > { %v9115_v55 = vpop.f32.mrf.mxu1  ;;  %v3337_v54 = vadd.f32 %v3305_v59, %v3158_v25  ;;  %3914 = vmatprep.mubr.bf16.mxu1 %v10485_v23  ;;  %v3551_v27 = vsel %vm10666_vm11, %v3548_v62, %v3550_v50  ;;  %4518 = vmatpush1.bf16.msra.mxu0 %v7383_v60  ;;  %v5000_v49 = vsel %vm10668_vm14, %v4997_v37, %v4999_v56  ;;  %vm10674_vm11 = vmmov %vm10668_vm14 }
 0x230   : > { %v3405_v19 = vmax.f32 %v3373_v32, 0.0  ;;  %v2959_v43 = vpop.f32.mrf.mxu0  ;;  %4519 = vmatprep.subr.bf16.mxu0 %v7389_v22  ;;  %v9123_v34 = vpack.c.bf16 %v5000_v49, %v4998_v29  ;;  %v3275_v62 = vadd.f32 %v2953_v24, %v8972_v38  ;;  %v7390_v22 = vld [vmem:[#allocation9 + $0x138] ss:$12 sps:$4 sm:$0xff]   ;;  %vm10675_vm14 = vmmov %vm10673_vm13 }
 0x231   : > { %v9119_v57 = vpop.f32.mrf.mxu1  ;;  %v3374_v17 = vadd.f32 %v9078_v39, %v3337_v54  ;;  %v3306_v0 = vadd.f32 %v3274_v53, %v2959_v43 }
 0x232   : > { %10671 = vst [vmem:[#allocation25_spill] sm:$0xff] %v9123_v34  ;;  %v3552_v59 = vrot.slane %v3405_v19, 7  ;;  %v5001_v25 = vrot.slane %v3405_v19, 1  ;;  %v2963_v51 = vpop.f32.mrf.mxu0  ;;  %v9127_v60 = vpack.c.bf16 %v3405_v19, %v3404_v2  ;;  %v7396_v19 = vld [vmem:[#allocation9 + $0x124] ss:$12 sps:$4 sm:$0xff]  }
 0x233   : > { %v9125_v7 = vpop.f32.mrf.mxu1  ;;  %v3406_v32 = vmax.f32 %v3374_v17, 0.0  ;;  %v3338_v10 = vadd.f32 %v3306_v0, %v3161_v9  ;;  %4520 = vmatpush1.bf16.msra.mxu0 %v7387_v44  ;;  %v3276_v9 = vadd.f32 %v2957_v52, %v8987_v41  ;;  %v7414_v0 = vld [vmem:[#allocation9 + $0x22c] ss:$12 sps:$4 sm:$0xff]  }
 0x234   : > { %10672 = vst [vmem:[#allocation97_spill] sm:$0xff] %v9127_v60  ;;  %v2965_v63 = vpop.f32.mrf.mxu0  ;;  %v3553_v37 = vsel %vm10673_vm13, %v3550_v50, %v3552_v59  ;;  %4521 = vmatprep.subr.bf16.mxu0 %v7392_v6  ;;  %v5002_v29 = vsel %vm10674_vm11, %v4999_v56, %v5001_v25  ;;  %v7394_v6 = vld [vmem:[#allocation9 + $0x120] ss:$12 sps:$4 sm:$0xff]   ;;  %5316 = vmatprep.subr.bf16.mxu1 %v7414_v0 }
 0x235   : > { %v9131_v54 = vpop.f32.mrf.mxu1  ;;  %v3554_v53 = vrot.slane %v3406_v32, 7  ;;  %v5003_v43 = vrot.slane %v3406_v32, 1  ;;  %v3375_v49 = vadd.f32 %v9078_v39, %v3338_v10  ;;  %v3307_v2 = vadd.f32 %v3275_v62, %v2965_v63  ;;  %v10676_v56 = vld [vmem:[#allocation26_spill] sm:$0xff] }
 0x236   : > { %v2967_v34 = vpop.f32.mrf.mxu0  ;;  %v6362_v38 = vpack.c.bf16 %v3553_v37, %v3551_v27  ;;  %vm10677_vm13 = vnez %v10676_v56  ;;  %v7399_v27 = vld [vmem:[#allocation9 + $0x10c] ss:$12 sps:$4 sm:$0xff]  }
 0x237   : > { %v9135_v24 = vpop.f32.mrf.mxu1  ;;  %v3407_v44 = vmax.f32 %v3375_v49, 0.0  ;;  %v3339_v50 = vadd.f32 %v9081_v40, %v3307_v2  ;;  %v3555_v17 = vsel %vm10675_vm14, %v3552_v59, %v3554_v53  ;;  %4522 = vmatpush1.bf16.msra.mxu0 %v7390_v22  ;;  %v5004_v41 = vsel %vm10674_vm11, %v5001_v25, %v5003_v43 }
 0x238   : > { %6363 = vmatmul.mubr.msk.bf16.gmra.mxu1 %vm10677_vm13, %v6362_v38  ;;  %7038 = vmatprep.mubr.msk.bf16.mxu0 %vm10677_vm13, %v6362_v38  ;;  %v2969_v63 = vpop.f32.mrf.mxu0  ;;  %v2402_v22 = vadd.f32 %v8861_v35, %v8884_v31  ;;  %v9155_v38 = vpack.c.bf16 %v5004_v41, %v5002_v29  ;;  %v3277_v25 = vadd.f32 %v2963_v51, %v9000_v47  ;;  %vm10678_vm13 = vmmov %vm10674_vm11  ;;  %v10679_v41 = vld [vmem:[#allocation31_spill] sm:$0xff] }
 0x239   : > { %v9144_v10 = vpop.f32.mrf.mxu1  ;;  %v3556_v52 = vrot.slane %v3407_v44, 7  ;;  %v5005_v62 = vrot.slane %v3407_v44, 1  ;;  %v3376_v40 = vadd.f32 %v9078_v39, %v3339_v50  ;;  %v3308_v59 = vadd.f32 %v3276_v9, %v2969_v63  ;;  %3924 = vmatprep.mubr.bf16.mxu1 %v10485_v23  ;;  %4523 = vmatprep.subr.bf16.mxu0 %v7396_v19  ;;  %v7397_v19 = vld [vmem:[#allocation9 + $0x108] ss:$12 sps:$4 sm:$0xff]  }
 0x23a   : > { %v2973_v37 = vpop.f32.mrf.mxu0  ;;  %v9153_v2 = vpack.c.bf16 %v3407_v44, %v3406_v32  ;;  %v2434_v63 = vadd.f32 %v2402_v22, %v9007_v36  ;;  %v7403_v32 = vld [vmem:[#allocation9 + $0xf4] ss:$12 sps:$4 sm:$0xff]   ;;  %vm10680_vm11 = vnez %v10679_v41  ;;  %v7406_v22 = vld [vmem:[#allocation9 + $0xdc] ss:$12 sps:$4 sm:$0xff]  }
 0x23b   : > { %v9151_v49 = vpop.f32.mrf.mxu1  ;;  %v3408_v56 = vmax.f32 %v3376_v40, 0.0  ;;  %v3340_v50 = vadd.f32 %v9087_v58, %v3308_v59  ;;  %v3557_v9 = vsel %vm10675_vm14, %v3554_v53, %v3556_v52  ;;  %4524 = vmatpush1.bf16.msra.mxu0 %v7394_v6  ;;  %v5006_v29 = vsel %vm10678_vm13, %v5003_v43, %v5005_v62  ;;  %v7401_v40 = vld [vmem:[#allocation9 + $0xf0] ss:$12 sps:$4 sm:$0xff]  }
 0x23c   : > { %v2975_v35 = vpop.f32.mrf.mxu0  ;;  %v6365_v31 = vpack.c.bf16 %v3557_v9, %v3555_v17  ;;  %4525 = vmatprep.subr.bf16.mxu0 %v7399_v27  ;;  %v3278_v36 = vadd.f32 %v2967_v34, %v2434_v63 }
 0x23d   : > { %v9161_v60 = vpop.f32.mrf.mxu1  ;;  %v3558_v44 = vrot.slane %v3408_v56, 7  ;;  %v5007_v0 = vrot.slane %v3408_v56, 1  ;;  %v3377_v47 = vadd.f32 %v9078_v39, %v3340_v50  ;;  %v3309_v51 = vadd.f32 %v3277_v25, %v2975_v35 }
 0x23e   : > { %v2977_v58 = vpop.f32.mrf.mxu0  ;;  %7039 = vmatmul.mubr.msk.bf16.gmra.mxu0 %vm10680_vm11, %v6365_v31 }
 0x23f   : > { %v9167_v53 = vpop.f32.mrf.mxu1  ;;  %v3409_v6 = vmax.f32 %v3377_v47, 0.0  ;;  %v3341_v17 = vadd.f32 %v3309_v51, %v9107_v13  ;;  %v3559_v27 = vsel %vm10675_vm14, %v3556_v52, %v3558_v44  ;;  %4526 = vmatpush1.bf16.msra.mxu0 %v7397_v19  ;;  %v5008_v25 = vsel %vm10678_vm13, %v5005_v62, %v5007_v0  ;;  %v7404_v51 = vld [vmem:[#allocation9 + $0xd8] ss:$12 sps:$4 sm:$0xff]  }
 0x240   : > { %6366 = vmatmul.mubr.msk.bf16.gmra.mxu1 %vm10680_vm11, %v6365_v31  ;;  %v2979_v43 = vpop.f32.mrf.mxu0  ;;  %4527 = vmatprep.subr.bf16.mxu0 %v7403_v32  ;;  %v9182_v35 = vpack.c.bf16 %v5008_v25, %v5006_v29  ;;  %v3279_v31 = vadd.f32 %v2973_v37, %v8995_v15  ;;  %vm10682_vm11 = vmmov %vm10675_vm14 }
 0x241   : > { %v9173_v59 = vpop.f32.mrf.mxu1  ;;  %v3560_v50 = vrot.slane %v3409_v6, 7  ;;  %v5009_v9 = vrot.slane %v3409_v6, 1  ;;  %v3378_v34 = vadd.f32 %v9078_v39, %v3341_v17  ;;  %v3310_v63 = vadd.f32 %v3278_v36, %v2979_v43  ;;  %3934 = vmatprep.mubr.bf16.mxu1 %v10485_v23  ;;  %v7410_v43 = vld [vmem:[#allocation9 + $0xc4] ss:$12 sps:$4 sm:$0xff]   ;;  %vm10683_vm14 = vmmov %vm10678_vm13 }
 0x242   : > { %v2983_v13 = vpop.f32.mrf.mxu0  ;;  %v9180_v19 = vpack.c.bf16 %v3409_v6, %v3408_v56  ;;  %10681 = vst [vmem:[#allocation26_spill] sm:$0xff] %v9182_v35 }
 0x243   : > { %v9178_v52 = vpop.f32.mrf.mxu1  ;;  %v3410_v32 = vmax.f32 %v3378_v34, 0.0  ;;  %v3342_v47 = vadd.f32 %v3310_v63, %v9119_v57  ;;  %v3561_v62 = vsel %vm10682_vm11, %v3558_v44, %v3560_v50  ;;  %4528 = vmatpush1.bf16.msra.mxu0 %v7401_v40  ;;  %v5010_v56 = vsel %vm10683_vm14, %v5007_v0, %v5009_v9  ;;  %v10684_v34 = vld [vmem:[#allocation32_spill] sm:$0xff]  ;;  %v7408_v0 = vld [vmem:[#allocation9 + $0xc0] ss:$12 sps:$4 sm:$0xff]  }
 0x244   : > { %v2985_v41 = vpop.f32.mrf.mxu0  ;;  %v6368_v36 = vpack.c.bf16 %v3561_v62, %v3559_v27  ;;  %4529 = vmatprep.subr.bf16.mxu0 %v7406_v22  ;;  %vm10685_vm13 = vnez %v10684_v34  ;;  %v3280_v44 = vadd.f32 %v2977_v58, %v9005_v46 }
 0x245   : > { %v9187_v17 = vpop.f32.mrf.mxu1  ;;  %v3562_v6 = vrot.slane %v3410_v32, 7  ;;  %v5011_v29 = vrot.slane %v3410_v32, 1  ;;  %v3379_v25 = vadd.f32 %v9078_v39, %v3342_v47  ;;  %v3311_v15 = vadd.f32 %v3279_v31, %v2985_v41  ;;  %v9202_v47 = vld [vmem:[#allocation9 + $0x230] ss:$12 sps:$4 sm:$0xff]  }
 0x246   : > { %v2987_v37 = vpop.f32.mrf.mxu0  ;;  %7042 = vmatprep.mubr.msk.bf16.mxu0 %vm10685_vm13, %v6368_v36 }
 0x247   : > { %v9193_v57 = vpop.f32.mrf.mxu1  ;;  %v3411_v27 = vmax.f32 %v3379_v25, 0.0  ;;  %v3343_v40 = vadd.f32 %v9099_v33, %v3311_v15  ;;  %v3563_v22 = vsel %vm10682_vm11, %v3560_v50, %v3562_v6  ;;  %4530 = vmatpush1.bf16.msra.mxu0 %v7404_v51  ;;  %v5012_v62 = vsel %vm10683_vm14, %v5009_v9, %v5011_v29 }
 0x248   : > { %6369 = vmatmul.mubr.msk.bf16.gmra.mxu1 %vm10685_vm13, %v6368_v36  ;;  %v2989_v63 = vpop.f32.mrf.mxu0  ;;  %4531 = vmatprep.subr.bf16.mxu0 %v7410_v43  ;;  %v2406_v50 = vadd.f32 %v8897_v45, %v8919_v11  ;;  %v9213_v43 = vpack.c.bf16 %v5012_v62, %v5010_v56  ;;  %v3281_v15 = vadd.f32 %v2983_v13, %v9016_v1  ;;  %vm10686_vm13 = vmmov %vm10682_vm11 }
 0x249   : > { %v9200_v31 = vpop.f32.mrf.mxu1  ;;  %v3564_v41 = vrot.slane %v3411_v27, 7  ;;  %v5013_v46 = vrot.slane %v3411_v27, 1  ;;  %v3380_v58 = vadd.f32 %v9078_v39, %v3343_v40  ;;  %v3312_v33 = vadd.f32 %v3280_v44, %v2989_v63  ;;  %3944 = vmatprep.mubr.bf16.mxu1 %v10485_v23  ;;  %vm10687_vm11 = vmmov %vm10683_vm14 }
 0x24a   : > { %v2993_v51 = vpop.f32.mrf.mxu0  ;;  %v9211_v25 = vpack.c.bf16 %v3411_v27, %v3410_v32  ;;  %v2438_v44 = vadd.f32 %v2406_v50, %v9023_v48 }
 0x24b   : > { %v9209_v36 = vpop.f32.mrf.mxu1  ;;  %v3412_v9 = vmax.f32 %v3380_v58, 0.0  ;;  %v3344_v34 = vadd.f32 %v9115_v55, %v3312_v33  ;;  %v3565_v40 = vsel %vm10686_vm13, %v3562_v6, %v3564_v41  ;;  %4532 = vmatpush1.bf16.msra.mxu0 %v7408_v0  ;;  %v5014_v11 = vsel %vm10687_vm11, %v5011_v29, %v5013_v46  ;;  %v10688_v55 = vld [vmem:[#allocation33_spill] sm:$0xff] }
 0x24c   : > { %v2995_v63 = vpop.f32.mrf.mxu0  ;;  %v6371_v35 = vpack.c.bf16 %v3565_v40, %v3563_v22  ;;  %7122 = vmatprep.subr.bf16.mxu0 %v9202_v47  ;;  %vm10689_vm14 = vnez %v10688_v55  ;;  %v3282_v48 = vadd.f32 %v2987_v37, %v2438_v44 }
 0x24d   : > { %v9219_v45 = vpop.f32.mrf.mxu1  ;;  %v3566_v32 = vrot.slane %v3412_v9, 7  ;;  %v5015_v56 = vrot.slane %v3412_v9, 1  ;;  %v3381_v1 = vadd.f32 %v9078_v39, %v3344_v34  ;;  %v3313_v13 = vadd.f32 %v3281_v15, %v2995_v63 }
 0x24e   : > { %v2997_v27 = vpop.f32.mrf.mxu0  ;;  %7043 = vmatmul.mubr.msk.bf16.gmra.mxu0 %vm10689_vm14, %v6371_v35 }
 0x24f   : > { %v9226_v6 = vpop.f32.mrf.mxu1  ;;  %v3413_v0 = vmax.f32 %v3381_v1, 0.0  ;;  %v3345_v22 = vadd.f32 %v3313_v13, %v9131_v54  ;;  %v3567_v62 = vsel %vm10686_vm13, %v3564_v41, %v3566_v32  ;;  %v5016_v58 = vsel %vm10687_vm11, %v5013_v46, %v5015_v56 }
 0x250   : > { %6372 = vmatmul.mubr.msk.bf16.gmra.mxu1 %vm10689_vm14, %v6371_v35  ;;  %v2999_v29 = vpop.f32.mrf.mxu0  ;;  %v9239_v54 = vpack.c.bf16 %v5016_v58, %v5014_v11  ;;  %v3283_v41 = vadd.f32 %v2993_v51, %v9011_v20  ;;  %vm10690_vm14 = vmmov %vm10686_vm13  ;;  %v10692_v58 = vld [vmem:[#allocation36_spill] sm:$0xff]  ;;  %v3284_v20 = vadd.f32 %v2997_v27, %v9019_v30  ;;  %v2410_v30 = vadd.f32 %v8931_v16, %v8945_v12 }
 0x251   : > { %v3568_v33 = vrot.slane %v3413_v0, 7  ;;  %v5017_v50 = vrot.slane %v3413_v0, 1  ;;  %v3382_v15 = vadd.f32 %v9078_v39, %v3345_v22  ;;  %v3314_v34 = vadd.f32 %v3282_v48, %v2999_v29  ;;  %3954 = vmatprep.mubr.bf16.mxu1 %v10485_v23  ;;  %v9235_v40 = vpop.f32.mrf.mxu1  ;;  %vm10691_vm13 = vmmov %vm10687_vm11 }
 0x252   : > { %v3003_v37 = vpop.f32.mrf.mxu0  ;;  %v9237_v44 = vpack.c.bf16 %v3413_v0, %v3412_v9  ;;  %vm10693_vm11 = vnez %v10692_v58  ;;  %v2442_v58 = vadd.f32 %v2410_v30, %v9037_v5 }
 0x253   : > { %v3414_v35 = vmax.f32 %v3382_v15, 0.0  ;;  %v3346_v63 = vadd.f32 %v3314_v34, %v9144_v10  ;;  %v3569_v46 = vsel %vm10690_vm14, %v3566_v32, %v3568_v33  ;;  %v9244_v1 = vpop.f32.mrf.mxu1  ;;  %v5018_v48 = vsel %vm10691_vm13, %v5015_v56, %v5017_v50 }
 0x254   : > { %v3005_v13 = vpop.f32.mrf.mxu0  ;;  %v6374_v55 = vpack.c.bf16 %v3569_v46, %v3567_v62 }
 0x255   : > { %v3570_v22 = vrot.slane %v3414_v35, 7  ;;  %v5019_v29 = vrot.slane %v3414_v35, 1  ;;  %v3383_v9 = vadd.f32 %v9078_v39, %v3346_v63  ;;  %v3315_v0 = vadd.f32 %v3283_v41, %v3005_v13  ;;  %v9253_v15 = vpop.f32.mrf.mxu1 }
 0x256   : > { %v3007_v11 = vpop.f32.mrf.mxu0  ;;  %7046 = vmatprep.mubr.msk.bf16.mxu0 %vm10693_vm11, %v6374_v55  ;;  %v3285_v13 = vadd.f32 %v3003_v37, %v9030_v3 }
 0x257   : > { %v3415_v10 = vmax.f32 %v3383_v9, 0.0  ;;  %v3347_v51 = vadd.f32 %v9125_v7, %v3315_v0  ;;  %v3571_v32 = vsel %vm10690_vm14, %v3568_v33, %v3570_v22  ;;  %v5020_v62 = vsel %vm10691_vm13, %v5017_v50, %v5019_v29  ;;  %v9269_v0 = vpop.f32.mrf.mxu1 }
 0x258   : > { %6375 = vmatmul.mubr.msk.bf16.gmra.mxu1 %vm10693_vm11, %v6374_v55  ;;  %v3009_v56 = vpop.f32.mrf.mxu0  ;;  %v9264_v33 = vpack.c.bf16 %v5020_v62, %v5018_v48  ;;  %vm10694_vm11 = vmmov %vm10690_vm14 }
 0x259   : > { %v3572_v34 = vrot.slane %v3415_v10, 7  ;;  %v5021_v41 = vrot.slane %v3415_v10, 1  ;;  %v3384_v63 = vadd.f32 %v9078_v39, %v3347_v51  ;;  %v3316_v46 = vadd.f32 %v3284_v20, %v3009_v56  ;;  %3964 = vmatprep.mubr.bf16.mxu1 %v10485_v23  ;;  %vm10695_vm14 = vmmov %vm10691_vm13  ;;  %v9278_v5 = vpop.f32.mrf.mxu1 }
 0x25a   : > { %v3013_v7 = vpop.f32.mrf.mxu0  ;;  %v9262_v27 = vpack.c.bf16 %v3415_v10, %v3414_v35  ;;  %vm10697_vm13 = vmmov %vm10694_vm11 }
 0x25b   : > { %v3416_v55 = vmax.f32 %v3384_v63, 0.0  ;;  %v3348_v50 = vadd.f32 %v9135_v24, %v3316_v46  ;;  %v3573_v9 = vsel %vm10694_vm11, %v3570_v22, %v3572_v34  ;;  %v5022_v16 = vsel %vm10695_vm14, %v5019_v29, %v5021_v41  ;;  %vm10698_vm11 = vmmov %vm10695_vm14 }
 0x25c   : > { %v3015_v20 = vpop.f32.mrf.mxu0  ;;  %v6377_v51 = vpack.c.bf16 %v3573_v9, %v3571_v32  ;;  %v3286_v24 = vadd.f32 %v3007_v11, %v2442_v58  ;;  %v3287_v9 = vadd.f32 %v3013_v7, %v9026_v28  ;;  %vm10700_vm14 = vmmov %vm10698_vm11 }
 0x25d   : > { %v3574_v12 = vrot.slane %v3416_v55, 7  ;;  %v5023_v35 = vrot.slane %v3416_v55, 1  ;;  %v3385_v48 = vadd.f32 %v9078_v39, %v3348_v50  ;;  %v3317_v10 = vadd.f32 %v3285_v13, %v3015_v20 }
 0x25e   : > { %v3017_v56 = vpop.f32.mrf.mxu0  ;;  %7047 = vmatmul.mubr.msk.bf16.gmra.mxu0 %vm8022_vm8, %v6377_v51  ;;  %v9285_v11 = vpop.f32.mrf.mxu1 }
 0x25f   : > { %v3417_v37 = vmax.f32 %v3385_v48, 0.0  ;;  %v3349_v22 = vadd.f32 %v3317_v10, %v9161_v60  ;;  %v3575_v62 = vsel %vm10697_vm13, %v3572_v34, %v3574_v12  ;;  %v5024_v32 = vsel %vm10698_vm11, %v5021_v41, %v5023_v35 }
 0x260   : > { %6378 = vmatmul.mubr.msk.bf16.gmra.mxu1 %vm8022_vm8, %v6377_v51  ;;  %v3019_v29 = vpop.f32.mrf.mxu0  ;;  %v9289_v34 = vpack.c.bf16 %v5024_v32, %v5022_v16  ;;  %vm10699_vm8 = vmmov %vm10697_vm13  ;;  %v3900_v51 = vpop.f32.mrf.mxu1  ;;  %v3288_v28 = vadd.f32 %v3017_v56, %v9035_v14  ;;  %v2414_v14 = vadd.f32 %v8961_v18, %v8989_v42 }
 0x261   : > { %v3576_v63 = vrot.slane %v3417_v37, 7  ;;  %v5025_v46 = vrot.slane %v3417_v37, 1  ;;  %v3386_v30 = vadd.f32 %v9078_v39, %v3349_v22  ;;  %v3318_v13 = vadd.f32 %v3286_v24, %v3019_v29  ;;  %3974 = vmatprep.mubr.bf16.mxu1 %v10485_v23  ;;  %vm10702_vm13 = vmmov %vm10699_vm8 }
 0x262   : > { %v3023_v60 = vpop.f32.mrf.mxu0  ;;  %v9287_v50 = vpack.c.bf16 %v3417_v37, %v3416_v55  ;;  %v9296_v37 = vpop.f32.mrf.mxu1 }
 0x263   : > { %v3418_v58 = vmax.f32 %v3386_v30, 0.0  ;;  %v3350_v20 = vadd.f32 %v3318_v13, %v9173_v59  ;;  %v3577_v41 = vsel %vm10699_vm8, %v3574_v12, %v3576_v63  ;;  %v5026_v3 = vsel %vm10700_vm14, %v5023_v35, %v5025_v46 }
 0x264   : > { %v3025_v48 = vpop.f32.mrf.mxu0  ;;  %v6380_v10 = vpack.c.bf16 %v3577_v41, %v3575_v62  ;;  %v3903_v62 = vpop.f32.mrf.mxu1  ;;  %v3289_v51 = vadd.f32 %v3023_v60, %v9045_v21 }
 0x265   : > { %v3578_v24 = vrot.slane %v3418_v58, 7  ;;  %v5027_v22 = vrot.slane %v3418_v58, 1  ;;  %v3387_v29 = vadd.f32 %v9078_v39, %v3350_v20  ;;  %v3319_v55 = vadd.f32 %v3287_v9, %v3025_v48 }
 0x266   : > { %v3027_v16 = vpop.f32.mrf.mxu0  ;;  %7050 = vmatprep.mubr.msk.bf16.mxu0 %vm8060_vm10, %v6380_v10 }
 0x267   : > { %v3419_v59 = vmax.f32 %v3387_v29, 0.0  ;;  %v3351_v7 = vadd.f32 %v9151_v49, %v3319_v55  ;;  %v3579_v12 = vsel %vm10702_vm13, %v3576_v63, %v3578_v24  ;;  %v5028_v30 = vsel %vm10698_vm11, %v5025_v46, %v5027_v22 }
 0x268   : > { %6381 = vmatmul.mubr.msk.bf16.gmra.mxu1 %vm8060_vm10, %v6380_v10  ;;  %v3029_v35 = vpop.f32.mrf.mxu0  ;;  %v9312_v63 = vpack.c.bf16 %v5028_v30, %v5026_v3  ;;  %vm10703_vm10 = vmmov %vm10699_vm8  ;;  %v2446_v29 = vadd.f32 %v2414_v14, %v9053_v4 }
 0x269   : > { %v3580_v13 = vrot.slane %v3419_v59, 7  ;;  %v5029_v9 = vrot.slane %v3419_v59, 1  ;;  %v3388_v20 = vadd.f32 %v9078_v39, %v3351_v7  ;;  %v3320_v41 = vadd.f32 %v3288_v28, %v3029_v35  ;;  %3984 = vmatprep.mubr.bf16.mxu1 %v10485_v23  ;;  %vm10704_vm8 = vmmov %vm10698_vm11 }
 0x26a   : > { %v3033_v49 = vpop.f32.mrf.mxu0  ;;  %v9310_v56 = vpack.c.bf16 %v3419_v59, %v3418_v58  ;;  %v10705_v59 = vld [vmem:[#allocation45_spill] sm:$0xff]  ;;  %v3290_v21 = vadd.f32 %v3027_v16, %v2446_v29  ;;  %vm10707_vm13 = vmmov %vm10703_vm10 }
 0x26b   : > { %v3420_v48 = vmax.f32 %v3388_v20, 0.0  ;;  %v3352_v46 = vadd.f32 %v9167_v53, %v3320_v41  ;;  %v3581_v10 = vsel %vm10703_vm10, %v3578_v24, %v3580_v13  ;;  %v5030_v28 = vsel %vm10704_vm8, %v5027_v22, %v5029_v9  ;;  %vm10708_vm11 = vmmov %vm10704_vm8 }
 0x26c   : > { %v3035_v55 = vpop.f32.mrf.mxu0  ;;  %v6383_v32 = vpack.c.bf16 %v3581_v10, %v3579_v12  ;;  %vm10706_vm14 = vnez %v10705_v59 }
 0x26d   : > { %v3582_v7 = vrot.slane %v3420_v48, 7  ;;  %v5031_v18 = vrot.slane %v3420_v48, 1  ;;  %v3389_v42 = vadd.f32 %v9078_v39, %v3352_v46  ;;  %v3321_v58 = vadd.f32 %v3289_v51, %v3035_v55 }
 0x26e   : > { %v3037_v3 = vpop.f32.mrf.mxu0  ;;  %7051 = vmatmul.mubr.msk.bf16.gmra.mxu0 %vm10706_vm14, %v6383_v32 }
 0x26f   : > { %v3421_v60 = vmax.f32 %v3389_v42, 0.0  ;;  %v3353_v53 = vadd.f32 %v3321_v58, %v9187_v17  ;;  %v3583_v24 = vsel %vm10707_vm13, %v3580_v13, %v3582_v7  ;;  %v5032_v22 = vsel %vm10708_vm11, %v5029_v9, %v5031_v18  ;;  %v10709_v58 = vld [vmem:[#allocation47_spill] sm:$0xff]  ;;  %vm10711_vm13 = vmmov %vm10703_vm10 }
 0x270   : > { %6384 = vmatmul.mubr.msk.bf16.gmra.mxu1 %vm10706_vm14, %v6383_v32  ;;  %v3039_v4 = vpop.f32.mrf.mxu0  ;;  %v9331_v41 = vpack.c.bf16 %v5032_v22, %v5030_v28  ;;  %v3291_v17 = vadd.f32 %v3033_v49, %v9041_v61  ;;  %vm10710_vm14 = vnez %v10709_v58  ;;  %v3292_v61 = vadd.f32 %v3037_v3, %v9049_v26  ;;  %vm10712_vm11 = vmmov %vm10704_vm8  ;;  %v10713_v26 = vld [vmem:[#allocation15_spill] sm:$0xff]  ;;  %v10714_v22 = vld [vmem:[#allocation78_spill] sm:$0xff] }
 0x271   : > { %v3584_v12 = vrot.slane %v3421_v60, 7  ;;  %v5033_v62 = vrot.slane %v3421_v60, 1  ;;  %v3390_v35 = vadd.f32 %v9078_v39, %v3353_v53  ;;  %v3322_v30 = vadd.f32 %v3290_v21, %v3039_v4  ;;  %3994 = vmatprep.mubr.bf16.mxu1 %v10485_v23  ;;  %v10716_v58 = vld [vmem:[#allocation51_spill] sm:$0xff] }
 0x272   : > { %v3043_v20 = vpop.f32.mrf.mxu0  ;;  %v9329_v16 = vpack.c.bf16 %v3421_v60, %v3420_v48  ;;  %v2418_v3 = vadd.f32 %v10713_v26, %v9021_v8 }
 0x273   : > { %v3422_v13 = vmax.f32 %v3390_v35, 0.0  ;;  %v3354_v14 = vadd.f32 %v3322_v30, %v9200_v31  ;;  %v3585_v51 = vsel %vm10703_vm10, %v3582_v7, %v3584_v12  ;;  %v5034_v10 = vsel %vm10704_vm8, %v5031_v18, %v5033_v62 }
 0x274   : > { %v3045_v9 = vpop.f32.mrf.mxu0  ;;  %v6386_v46 = vpack.c.bf16 %v3585_v51, %v3583_v24 }
 0x275   : > { %v3586_v29 = vrot.slane %v3422_v13, 7  ;;  %v5035_v55 = vrot.slane %v3422_v13, 1  ;;  %v3391_v32 = vadd.f32 %v9078_v39, %v3354_v14  ;;  %v3323_v42 = vadd.f32 %v3291_v17, %v3045_v9  ;;  %v10715_v17 = vld [vmem:[#allocation80_spill] sm:$0xff] }
 0x276   : > { %v3047_v48 = vpop.f32.mrf.mxu0  ;;  %7054 = vmatprep.mubr.msk.bf16.mxu0 %vm10710_vm14, %v6386_v46  ;;  %v2450_v14 = vadd.f32 %v2418_v3, %v10715_v17 }
 0x277   : > { %v3423_v49 = vmax.f32 %v3391_v32, 0.0  ;;  %v3355_v31 = vadd.f32 %v9178_v52, %v3323_v42  ;;  %v3587_v28 = vsel %vm10711_vm13, %v3584_v12, %v3586_v29  ;;  %v5036_v18 = vsel %vm10712_vm11, %v5033_v62, %v5035_v55  ;;  %vm10718_vm13 = vmmov %vm10703_vm10 }
 0x278   : > { %6387 = vmatmul.mubr.msk.bf16.gmra.mxu1 %vm10710_vm14, %v6386_v46  ;;  %v3049_v7 = vpop.f32.mrf.mxu0  ;;  %v9352_v4 = vpack.c.bf16 %v5036_v18, %v5034_v10  ;;  %v3293_v12 = vadd.f32 %v3043_v20, %v10714_v22  ;;  %vm10717_vm14 = vnez %v10716_v58  ;;  %v3294_v20 = vadd.f32 %v3047_v48, %v2450_v14  ;;  %vm10719_vm11 = vmmov %vm10704_vm8 }
 0x279   : > { %v3588_v59 = vrot.slane %v3423_v49, 7  ;;  %v5037_v21 = vrot.slane %v3423_v49, 1  ;;  %v3392_v60 = vadd.f32 %v9078_v39, %v3355_v31  ;;  %v3324_v53 = vadd.f32 %v3292_v61, %v3049_v7  ;;  %4004 = vmatprep.mubr.bf16.mxu1 %v10485_v23 }
 0x27a   : > { %v3053_v24 = vpop.f32.mrf.mxu0  ;;  %v9350_v52 = vpack.c.bf16 %v3423_v49, %v3422_v13 }
 0x27b   : > { %v3424_v35 = vmax.f32 %v3392_v60, 0.0  ;;  %v3356_v62 = vadd.f32 %v9193_v57, %v3324_v53  ;;  %v3589_v30 = vsel %vm10703_vm10, %v3586_v29, %v3588_v59  ;;  %v5038_v46 = vsel %vm10704_vm8, %v5035_v55, %v5037_v21 }
 0x27c   : > { %v3055_v51 = vpop.f32.mrf.mxu0  ;;  %v6389_v9 = vpack.c.bf16 %v3589_v30, %v3587_v28 }
 0x27d   : > { %v3590_v32 = vrot.slane %v3424_v35, 7  ;;  %v5039_v8 = vrot.slane %v3424_v35, 1  ;;  %v3393_v13 = vadd.f32 %v9078_v39, %v3356_v62  ;;  %v3325_v42 = vadd.f32 %v3293_v12, %v3055_v51 }
 0x27e   : > { %v3057_v10 = vpop.f32.mrf.mxu0  ;;  %7055 = vmatmul.mubr.msk.bf16.gmra.mxu0 %vm10717_vm14, %v6389_v9 }
 0x27f   : > { %v3425_v61 = vmax.f32 %v3393_v13, 0.0  ;;  %v3357_v57 = vadd.f32 %v3325_v42, %v9219_v45  ;;  %v3591_v29 = vsel %vm10718_vm13, %v3588_v59, %v3590_v32  ;;  %v5040_v55 = vsel %vm10719_vm11, %v5037_v21, %v5039_v8  ;;  %v10720_v45 = vld [vmem:[#allocation82_spill] sm:$0xff]  ;;  %vm10724_vm13 = vmmov %vm10703_vm10 }
 0x280   : > { %6390 = vmatmul.mubr.msk.bf16.gmra.mxu1 %vm10717_vm14, %v6389_v9  ;;  %v3059_v49 = vpop.f32.mrf.mxu0  ;;  %v9371_v53 = vpack.c.bf16 %v5040_v55, %v5038_v46  ;;  %v3295_v59 = vadd.f32 %v3053_v24, %v10720_v45  ;;  %v10721_v9 = vld [vmem:[#allocation54_spill] sm:$0xff]  ;;  %v10723_v46 = vld [vmem:[#allocation81_spill] sm:$0xff]  ;;  %vm10725_vm11 = vmmov %vm10704_vm8 }
 0x281   : > { %v3592_v31 = vrot.slane %v3425_v61, 7  ;;  %v5041_v28 = vrot.slane %v3425_v61, 1  ;;  %v3394_v7 = vadd.f32 %v9078_v39, %v3357_v57  ;;  %v3326_v18 = vadd.f32 %v3294_v20, %v3059_v49  ;;  %4014 = vmatprep.mubr.bf16.mxu1 %v10485_v23 }
 0x282   : > { %v3063_v60 = vpop.f32.mrf.mxu0  ;;  %v9369_v48 = vpack.c.bf16 %v3425_v61, %v3424_v35  ;;  %vm10722_vm14 = vnez %v10721_v9  ;;  %v3296_v24 = vadd.f32 %v3057_v10, %v10723_v46  ;;  %v10727_v10 = vld [vmem:[#allocation16_spill] sm:$0xff] }
 0x283   : > { %v3426_v26 = vmax.f32 %v3394_v7, 0.0  ;;  %v3358_v3 = vadd.f32 %v3326_v18, %v9235_v40  ;;  %v3593_v22 = vsel %vm10703_vm10, %v3590_v32, %v3592_v31  ;;  %v5042_v62 = vsel %vm10704_vm8, %v5039_v8, %v5041_v28  ;;  %v10728_v7 = vld [vmem:[#allocation86_spill] sm:$0xff] }
 0x284   : > { %v3065_v21 = vpop.f32.mrf.mxu0  ;;  %v6392_v12 = vpack.c.bf16 %v3593_v22, %v3591_v29  ;;  %v10726_v29 = vld [vmem:[#allocation76_spill] sm:$0xff]  ;;  %v3297_v18 = vadd.f32 %v3063_v60, %v10728_v7 }
 0x285   : > { %v3594_v30 = vrot.slane %v3426_v26, 7  ;;  %v5043_v17 = vrot.slane %v3426_v26, 1  ;;  %v3395_v14 = vadd.f32 %v9078_v39, %v3358_v3  ;;  %v3327_v51 = vadd.f32 %v3295_v59, %v3065_v21  ;;  %v10729_v3 = vld [vmem:[#allocation94_spill] sm:$0xff] }
 0x286   : > { %v3067_v35 = vpop.f32.mrf.mxu0  ;;  %7058 = vmatprep.mubr.msk.bf16.mxu0 %vm10722_vm14, %v6392_v12  ;;  %v2422_v49 = vadd.f32 %v10727_v10, %v10726_v29 }
 0x287   : > { %v3427_v13 = vmax.f32 %v3395_v14, 0.0  ;;  %v3359_v40 = vadd.f32 %v9209_v36, %v3327_v51  ;;  %v3595_v32 = vsel %vm10724_vm13, %v3592_v31, %v3594_v30  ;;  %v5044_v42 = vsel %vm10725_vm11, %v5041_v28, %v5043_v17  ;;  %vm10732_vm13 = vmmov %vm10703_vm10 }
 0x288   : > { %6393 = vmatmul.mubr.msk.bf16.gmra.mxu1 %vm10722_vm14, %v6392_v12  ;;  %v3069_v8 = vpop.f32.mrf.mxu0  ;;  %v9392_v31 = vpack.c.bf16 %v5044_v42, %v5042_v62  ;;  %v2454_v22 = vadd.f32 %v2422_v49, %v10729_v3  ;;  %vm10733_vm11 = vmmov %vm10704_vm8 }
 0x289   : > { %v3596_v58 = vrot.slane %v3427_v13, 7  ;;  %v5045_v20 = vrot.slane %v3427_v13, 1  ;;  %v3396_v61 = vadd.f32 %v9078_v39, %v3359_v40  ;;  %v3328_v57 = vadd.f32 %v3296_v24, %v3069_v8  ;;  %4024 = vmatprep.mubr.bf16.mxu1 %v10485_v23  ;;  %v10730_v24 = vld [vmem:[#allocation57_spill] sm:$0xff] }
 0x28a   : > { %v3073_v55 = vpop.f32.mrf.mxu0  ;;  %v9390_v36 = vpack.c.bf16 %v3427_v13, %v3426_v26  ;;  %vm10731_vm14 = vnez %v10730_v24  ;;  %v3298_v60 = vadd.f32 %v3067_v35, %v2454_v22 }
 0x28b   : > { %v3428_v45 = vmax.f32 %v3396_v61, 0.0  ;;  %v3360_v28 = vadd.f32 %v9226_v6, %v3328_v57  ;;  %v3597_v59 = vsel %vm10703_vm10, %v3594_v30, %v3596_v58  ;;  %v5046_v14 = vsel %vm10704_vm8, %v5043_v17, %v5045_v20  ;;  %v10734_v57 = vld [vmem:[#allocation83_spill] sm:$0xff] }
 0x28c   : > { %v3075_v21 = vpop.f32.mrf.mxu0  ;;  %v6395_v12 = vpack.c.bf16 %v3597_v59, %v3595_v32  ;;  %v3299_v35 = vadd.f32 %v3073_v55, %v10734_v57  ;;  %v10735_v55 = vld [vmem:[#allocation87_spill] sm:$0xff] }
 0x28d   : > { %v3598_v51 = vrot.slane %v3428_v45, 7  ;;  %v5047_v9 = vrot.slane %v3428_v45, 1  ;;  %v3397_v26 = vadd.f32 %v9078_v39, %v3360_v28  ;;  %v3329_v46 = vadd.f32 %v3297_v18, %v3075_v21 }
 0x28e   : > { %v3077_v62 = vpop.f32.mrf.mxu0  ;;  %7059 = vmatmul.mubr.msk.bf16.gmra.mxu0 %vm10731_vm14, %v6395_v12 }
 0x28f   : > { %v3429_v13 = vmax.f32 %v3397_v26, 0.0  ;;  %v3361_v6 = vadd.f32 %v3329_v46, %v9253_v15  ;;  %v3599_v30 = vsel %vm10732_vm13, %v3596_v58, %v3598_v51  ;;  %v5048_v17 = vsel %vm10733_vm11, %v5045_v20, %v5047_v9  ;;  %v10736_v26 = vld [vmem:[#allocation58_spill] sm:$0xff]  ;;  %vm10738_vm13 = vmmov %vm10703_vm10 }
 0x290   : > { %6396 = vmatmul.mubr.msk.bf16.gmra.mxu1 %vm10731_vm14, %v6395_v12  ;;  %v3079_v40 = vpop.f32.mrf.mxu0  ;;  %v9412_v15 = vpack.c.bf16 %v5048_v17, %v5046_v14  ;;  %v3300_v12 = vadd.f32 %v3077_v62, %v10735_v55  ;;  %vm10737_vm14 = vnez %v10736_v26  ;;  %vm10739_vm11 = vmmov %vm10704_vm8  ;;  %v10744_v55 = vld [vmem:[#allocation14_spill] sm:$0xff] }
 0x291   : > { %v3600_v32 = vrot.slane %v3429_v13, 7  ;;  %v5049_v8 = vrot.slane %v3429_v13, 1  ;;  %v3398_v42 = vadd.f32 %v9078_v39, %v3361_v6  ;;  %v3330_v61 = vadd.f32 %v3298_v60, %v3079_v40  ;;  %4034 = vmatprep.mubr.bf16.mxu1 %v10485_v23  ;;  %v10747_v26 = vld [vmem:[#allocation66_spill] sm:$0xff] }
 0x292   : > { %v3083_v29 = vpop.f32.mrf.mxu0  ;;  %v9410_v10 = vpack.c.bf16 %v3429_v13, %v3428_v45 }
 0x293   : > { %v3430_v58 = vmax.f32 %v3398_v42, 0.0  ;;  %v3362_v49 = vadd.f32 %v3330_v61, %v9278_v5  ;;  %v3601_v7 = vsel %vm10703_vm10, %v3598_v51, %v3600_v32  ;;  %v5050_v20 = vsel %vm10704_vm8, %v5047_v9, %v5049_v8 }
 0x294   : > { %v3084_v18 = vpop.f32.mrf.mxu0  ;;  %v6398_v28 = vpack.c.bf16 %v3601_v7, %v3599_v30 }
 0x295   : > { %v3602_v59 = vrot.slane %v3430_v58, 7  ;;  %v5051_v3 = vrot.slane %v3430_v58, 1  ;;  %v3399_v22 = vadd.f32 %v9078_v39, %v3362_v49  ;;  %v3331_v21 = vadd.f32 %v3299_v35, %v3084_v18  ;;  %v10740_v49 = vld [vmem:[#allocation63_spill] sm:$0xff] }
 0x296   : > { %v3086_v45 = vpop.f32.mrf.mxu0  ;;  %7062 = vmatprep.mubr.msk.bf16.mxu0 %vm10737_vm14, %v6398_v28 }
 0x297   : > { %v3431_v14 = vmax.f32 %v3399_v22, 0.0  ;;  %v3363_v5 = vadd.f32 %v9244_v1, %v3331_v21  ;;  %v3603_v51 = vsel %vm10738_vm13, %v3600_v32, %v3602_v59  ;;  %v5052_v9 = vsel %vm10739_vm11, %v5049_v8, %v5051_v3  ;;  %vm10742_vm13 = vmmov %vm10703_vm10 }
 0x298   : > { %6399 = vmatmul.mubr.msk.bf16.gmra.mxu1 %vm10737_vm14, %v6398_v28  ;;  %v3087_v46 = vpop.f32.mrf.mxu0  ;;  %v9426_v24 = vpack.c.bf16 %v5052_v9, %v5050_v20  ;;  %vm10741_vm14 = vnez %v10740_v49  ;;  %vm10743_vm11 = vmmov %vm10704_vm8  ;;  %v7428_v49 = vld [vmem:[#allocation9 + $0x1cc] ss:$12 sps:$4 sm:$0xff]  }
 0x299   : > { %v3604_v60 = vrot.slane %v3431_v14, 7  ;;  %v5053_v13 = vrot.slane %v3431_v14, 1  ;;  %v3400_v62 = vadd.f32 %v9078_v39, %v3363_v5  ;;  %v3332_v6 = vadd.f32 %v3300_v12, %v3087_v46  ;;  %4044 = vmatprep.mubr.bf16.mxu1 %v10485_v23  ;;  %v7447_v39 = vld [vmem:[%s10198_s3] ss:$0 sm:$0xff]  ;;  %v10748_v46 = vld [vmem:[#allocation64_spill] sm:$0xff] }
 0x29a   : > { %v3091_v30 = vpop.f32.mrf.mxu0  ;;  %v9430_v40 = vpack.c.bf16 %v3431_v14, %v3430_v58 }
 0x29b   : > { %v3432_v1 = vmax.f32 %v3400_v62, 0.0  ;;  %v3364_v17 = vadd.f32 %v9269_v0, %v3332_v6  ;;  %v3605_v32 = vsel %vm10703_vm10, %v3602_v59, %v3604_v60  ;;  %v5054_v8 = vsel %vm10704_vm8, %v5051_v3, %v5053_v13  ;;  %vm10745_vm8 = vmmov %vm10703_vm10  ;;  %v7425_v6 = vld [vmem:[#allocation9 + $0x200] ss:$12 sps:$4 sm:$0xff]   ;;  %v7412_v30 = vld [vmem:[#allocation9 + $0x228] ss:$12 sps:$4 sm:$0xff]  }
 0x29c   : > { %v6401_v42 = vpack.c.bf16 %v3605_v32, %v3603_v51  ;;  %v3092_v61 = vpop.f32.mrf.mxu0  ;;  %v10752_v62 = vmov 0.0|0.0   ;;  %v7432_v32 = vld [vmem:[#allocation9 + $0x1e8] ss:$12 sps:$4 sm:$0xff]  }
 0x29d   : > { %v3606_v57 = vrot.slane %v3432_v1, 7  ;;  %v5055_v35 = vrot.slane %v3432_v1, 1  ;;  %v3401_v29 = vadd.f32 %v7447_v39, %v3364_v17  ;;  %v10753_v17 = vld [vmem:[#allocation96_spill] sm:$0xff]  ;;  %v7440_v39 = vld [vmem:[#allocation9 + $0x1b8] ss:$12 sps:$4 sm:$0xff]  }
 0x29e   : > { %7063 = vmatmul.mubr.msk.bf16.gmra.mxu0 %vm10741_vm14, %v6401_v42  ;;  %v3093_v58 = vpop.f32.mrf.mxu0  ;;  %v7439_v61 = vld [vmem:[#allocation9 + $0x1d0] ss:$12 sps:$4 sm:$0xff]  }
 0x29f   : > { %v3433_v7 = vmax.f32 %v3401_v29, 0.0  ;;  %v3607_v0 = vsel %vm10742_vm13, %v3604_v60, %v3606_v57  ;;  %v5056_v20 = vsel %vm10743_vm11, %v5053_v13, %v5055_v35  ;;  %vm10746_vm13 = vmmov %vm10743_vm11  ;;  %v10750_v60 = vld [vmem:[#allocation65_spill] sm:$0xff]  ;;  %v7422_v29 = vld [vmem:[#allocation9 + $0x1e0] ss:$12 sps:$4 sm:$0xff]  }
 0x2a0   : > { %6402 = vmatmul.mubr.msk.bf16.gmra.mxu1 %vm10741_vm14, %v6401_v42  ;;  %v3094_v18 = vpop.f32.mrf.mxu0  ;;  %v9444_v28 = vpack.c.bf16 %v5056_v20, %v5054_v8  ;;  %vm10749_vm14 = vnez %v10748_v46  ;;  %vm10751_vm1 = vnez %v10750_v60  ;;  %v7418_v13 = vld [vmem:[#allocation9 + $0x218] ss:$12 sps:$4 sm:$0xff]   ;;  %v7421_v42 = vld [vmem:[#allocation9 + $0x1fc] ss:$12 sps:$4 sm:$0xff]   ;;  %v7441_v58 = vld [vmem:[#allocation9 + $0x1a0] ss:$12 sps:$4 sm:$0xff]  }
 0x2a1   : > { %v3608_v59 = vrot.slane %v3433_v7, 7  ;;  %v5057_v3 = vrot.slane %v3433_v7, 1  ;;  %4054 = vmatprep.mubr.bf16.mxu1 %v10485_v23  ;;  %v9447_v22 = vpack.c.bf16 %v3433_v7, %v3432_v1  ;;  %v7417_v1 = vld [vmem:[#allocation9 + $0x214] ss:$12 sps:$4 sm:$0xff]   ;;  %v10754_v8 = vld [vmem:[#allocation97_spill] sm:$0xff] }
 0x2a2   : > { %v7426_v7 = vld [vmem:[#allocation9 + $0x1c8] ss:$12 sps:$4 sm:$0xff]   ;;  %v7429_v18 = vld [vmem:[#allocation9 + $0x1b0] ss:$12 sps:$4 sm:$0xff]  }
 0x2a3   : > { %v3609_v21 = vsel %vm10703_vm10, %v3606_v57, %v3608_v59  ;;  %v3611_v12 = vsel %vm10745_vm8, %v3608_v59, %v10744_v55  ;;  %v5058_v45 = vsel %vm10746_vm13, %v5055_v35, %v5057_v3  ;;  %v5060_v14 = vsel %vm10743_vm11, %v5057_v3, %v10747_v26  ;;  %v7419_v57 = vld [vmem:[#allocation9 + $0x1f8] ss:$12 sps:$4 sm:$0xff]   ;;  %v7442_v20 = vld [vmem:[#allocation9 + $0x188] ss:$12 sps:$4 sm:$0xff]  }
 0x2a4   : > { %v6404_v5 = vpack.c.bf16 %v3609_v21, %v3607_v0  ;;  %v6407_v51 = vpack.c.bf16 %v10744_v55, %v3611_v12  ;;  %v9456_v9 = vpack.c.bf16 %v5060_v14, %v5058_v45  ;;  %v7424_v35 = vld [vmem:[#allocation9 + $0x1e4] ss:$12 sps:$4 sm:$0xff]   ;;  %v7431_v0 = vld [vmem:[#allocation9 + $0x1b4] ss:$12 sps:$4 sm:$0xff]   ;;  %v7435_v59 = vld [vmem:[#allocation9 + $0x19c] ss:$12 sps:$4 sm:$0xff]  }
 0x2a5   : > { %v7433_v3 = vld [vmem:[#allocation9 + $0x198] ss:$12 sps:$4 sm:$0xff]  }
 0x2a6   : > { %7066 = vmatprep.mubr.msk.bf16.mxu0 %vm10749_vm14, %v6404_v5  ;;  %v7438_v21 = vld [vmem:[#allocation9 + $0x184] ss:$12 sps:$4 sm:$0xff]  }
 0x2a7   : > { %7067 = vmatmul.mubr.msk.bf16.gmra.mxu0 %vm10751_vm1, %v6407_v51 }
 0x2a8   : > { %6405 = vmatmul.mubr.msk.bf16.gmra.mxu1 %vm10749_vm14, %v6404_v5  ;;  %4549 = vmatprep.mubr.bf16.mxu0 %v10485_v23 }
 0x2a9   : > { %4062 = vmatprep.mubr.bf16.mxu1 %v10485_v23 }
 0x2af   : > { %4550 = vmatmul.mubr.bf16.vlgmr.msra.gmra.mxu0 %v10752_v62 }
 0x2b0   : > { %6408 = vmatmul.mubr.msk.bf16.gmra.mxu1 %vm10751_vm1, %v6407_v51  ;;  %7123 = vmatpush3.bf16.msra.mxu0 %v9202_v47  ;;  %v7415_v47 = vld [vmem:[#allocation9 + $0x210] ss:$12 sps:$4 sm:$0xff]   ;;  %v10755_v51 = vld [vmem:[#allocation95_spill] sm:$0xff]  ;;  %vm10757_vm1 = vmmov %vm10743_vm11 }
 0x2b1   : > { %7086 = vmatprep.mubr.bf16.mxu1 %v10752_v62  ;;  %4557 = vmatprep.mubr.bf16.mxu0 %v10485_v23  ;;  %v10756_v46 = vrot.slane %v10755_v51, 1 }
 0x2b2   : > { %7124 = vmatprep.subr.bf16.mxu0 %v7418_v13 }
 0x2b3   : > { %v4996_v60 = vsel %vm10757_vm1, %v10747_v26, %v10756_v46 }
 0x2b4   : > { %7125 = vmatpush3.bf16.msra.mxu0 %v7418_v13 }
 0x2b5   : > { %7126 = vmatprep.subr.bf16.mxu0 %v7425_v6 }
 0x2b7   : > { %4558 = vmatmul.mubr.bf16.gmra.mxu0 %v10753_v17 }
 0x2b8   : > { %7087 = vmatmul.mubr.bf16.vlgmr.msra.gmra.mxu1 %v10753_v17  ;;  %4567 = vmatprep.mubr.bf16.mxu0 %v10485_v23 }
 0x2b9   : > { %7090 = vmatprep.mubr.bf16.mxu1 %v10754_v8  ;;  %5317 = vmatpush1.bf16.msra.mxu1 %v7412_v30  ;;  %v9515_v30 = vpack.c.bf16 %v4996_v60, %v10747_v26 }
 0x2ba   : > { %5318 = vmatprep.subr.bf16.mxu1 %v7417_v1  ;;  %7127 = vmatpush3.bf16.msra.mxu0 %v7425_v6 }
 0x2bb   : > { %7128 = vmatprep.subr.bf16.mxu0 %v7432_v32 }
 0x2bd   : > { %5319 = vmatpush1.bf16.msra.mxu1 %v7415_v47 }
 0x2be   : > { %5320 = vmatprep.subr.bf16.mxu1 %v7421_v42  ;;  %7129 = vmatpush3.bf16.msra.mxu0 %v7432_v32  ;;  %v10758_v42 = vld [vmem:[#allocation67_spill] sm:$0xff] }
 0x2bf   : > { %4568 = vmatmul.mubr.bf16.gmra.mxu0 %v10754_v8  ;;  %7130 = vmatprep.subr.bf16.mxu0 %v7439_v61  ;;  %vm10759_vm10 = vnez %v10758_v42 }
 0x2c0   : > { %7091 = vmatmul.mubr.bf16.gmra.mxu1 %v9153_v2  ;;  %4577 = vmatprep.mubr.bf16.mxu0 %v10485_v23 }
 0x2c1   : > { %7094 = vmatprep.mubr.bf16.mxu1 %v9180_v19  ;;  %5321 = vmatpush1.bf16.msra.mxu1 %v7419_v57 }
 0x2c2   : > { %5322 = vmatprep.subr.bf16.mxu1 %v7424_v35  ;;  %7131 = vmatpush3.bf16.msra.mxu0 %v7439_v61 }
 0x2c3   : > { %7132 = vmatprep.subr.bf16.mxu0 %v7440_v39 }
 0x2c5   : > { %5323 = vmatpush1.bf16.msra.mxu1 %v7422_v29 }
 0x2c6   : > { %5324 = vmatprep.subr.bf16.mxu1 %v7428_v49  ;;  %7133 = vmatpush3.bf16.msra.mxu0 %v7440_v39 }
 0x2c7   : > { %4578 = vmatmul.mubr.bf16.gmra.mxu0 %v9153_v2  ;;  %7134 = vmatprep.subr.bf16.mxu0 %v7441_v58  ;;  %v7436_v2 = vld [vmem:[#allocation9 + $0x180] ss:$12 sps:$4 sm:$0xff]  }
 0x2c8   : > { %7095 = vmatmul.mubr.bf16.gmra.mxu1 %v9211_v25  ;;  %4587 = vmatprep.mubr.bf16.mxu0 %v10485_v23 }
 0x2c9   : > { %7098 = vmatprep.mubr.bf16.mxu1 %v9237_v44  ;;  %5325 = vmatpush1.bf16.msra.mxu1 %v7426_v7  ;;  %v10760_v7 = vld [vmem:[#allocation25_spill] sm:$0xff] }
 0x2ca   : > { %5326 = vmatprep.subr.bf16.mxu1 %v7431_v0  ;;  %7135 = vmatpush3.bf16.msra.mxu0 %v7441_v58  ;;  %v10761_v0 = vld [vmem:[#allocation68_spill] sm:$0xff] }
 0x2cb   : > { %7136 = vmatprep.subr.bf16.mxu0 %v7442_v20  ;;  %vm10762_vm8 = vnez %v10761_v0 }
 0x2cd   : > { %5327 = vmatpush1.bf16.msra.mxu1 %v7429_v18 }
 0x2ce   : > { %5328 = vmatprep.subr.bf16.mxu1 %v7435_v59  ;;  %7137 = vmatpush3.bf16.msra.mxu0 %v7442_v20 }
 0x2cf   : > { %4588 = vmatmul.mubr.bf16.gmra.mxu0 %v9180_v19 }
 0x2d0   : > { %7099 = vmatmul.mubr.bf16.gmra.mxu1 %v9262_v27  ;;  %4597 = vmatprep.mubr.bf16.mxu0 %v10485_v23 }
 0x2d1   : > { %7102 = vmatprep.mubr.bf16.mxu1 %v9287_v50  ;;  %5329 = vmatpush1.bf16.msra.mxu1 %v7433_v3 }
 0x2d2   : > { %5330 = vmatprep.subr.bf16.mxu1 %v7438_v21 }
 0x2d5   : > { %5331 = vmatpush1.bf16.msra.mxu1 %v7436_v2 }
 0x2d7   : > { %4598 = vmatmul.mubr.bf16.gmra.mxu0 %v9211_v25 }
 0x2d8   : > { %7103 = vmatmul.mubr.bf16.gmra.mxu1 %v9310_v56  ;;  %4607 = vmatprep.mubr.bf16.mxu0 %v10485_v23 }
 0x2d9   : > { %7106 = vmatprep.mubr.bf16.mxu1 %v9329_v16 }
 0x2df   : > { %4608 = vmatmul.mubr.bf16.gmra.mxu0 %v9237_v44 }
 0x2e0   : > { %7107 = vmatmul.mubr.bf16.gmra.mxu1 %v9350_v52  ;;  %4617 = vmatprep.mubr.bf16.mxu0 %v10485_v23 }
 0x2e1   : > { %7110 = vmatprep.mubr.bf16.mxu1 %v9369_v48 }
 0x2e7   : > { %4618 = vmatmul.mubr.bf16.gmra.mxu0 %v9262_v27 }
 0x2e8   : > { %7111 = vmatmul.mubr.bf16.gmra.mxu1 %v9390_v36  ;;  %4627 = vmatprep.mubr.bf16.mxu0 %v10485_v23 }
 0x2e9   : > { %7114 = vmatprep.mubr.bf16.mxu1 %v9410_v10 }
 0x2ee   : > { %v3906_v19 = vpop.f32.mrf.mxu1  ;;  %v7036_v25 = vpop.f32.mrf.mxu0 }
 0x2ef   : > { %4628 = vmatmul.mubr.bf16.gmra.mxu0 %v9287_v50 }
 0x2f0   : > { %7115 = vmatmul.mubr.bf16.gmra.mxu1 %v9430_v40  ;;  %v3908_v44 = vpop.f32.mrf.mxu1  ;;  %v4103_v55 = vpop.f32.mrf.mxu0  ;;  %4637 = vmatprep.mubr.bf16.mxu0 %v10485_v23 }
 0x2f1   : > { %7118 = vmatprep.mubr.bf16.mxu1 %v9447_v22  ;;  %v4274_v17 = vadd.f32 %v3908_v44, %v9285_v11  ;;  %v10763_v44 = vld [vmem:[#allocation69_spill] sm:$0xff] }
 0x2f2   : > { %v3910_v12 = vpop.f32.mrf.mxu1  ;;  %v7037_v27 = vpop.f32.mrf.mxu0  ;;  %vm10764_vm13 = vnez %v10763_v44 }
 0x2f4   : > { %v9504_v45 = vpop.f32.mrf.mxu1  ;;  %v4105_v14 = vpop.f32.mrf.mxu0 }
 0x2f7   : > { %4638 = vmatmul.mubr.bf16.gmra.mxu0 %v9310_v56 }
 0x2f8   : > { %v3916_v5 = vpop.f32.mrf.mxu1  ;;  %7119 = vmatmul.mubr.bf16.gmra.mxu1 %v10752_v62  ;;  %4647 = vmatprep.mubr.bf16.mxu0 %v10485_v23 }
 0x2f9   : > { %5348 = vmatprep.mubr.bf16.mxu1 %v10485_v23 }
 0x2fa   : > { %v3918_v50 = vpop.f32.mrf.mxu1 }
 0x2fb   : > { %v4276_v13 = vadd.f32 %v3918_v50, %v3906_v19 }
 0x2fc   : > { %v3920_v6 = vpop.f32.mrf.mxu1 }
 0x2fe   : > { %v3922_v1 = vpop.f32.mrf.mxu1  ;;  %v7040_v56 = vpop.f32.mrf.mxu0 }
 0x2ff   : > { %v4277_v32 = vadd.f32 %v3922_v1, %v3910_v12  ;;  %v9518_v8 = vadd.f32 %v7040_v56, %v4276_v13  ;;  %4648 = vmatmul.mubr.bf16.gmra.mxu0 %v9329_v16  ;;  %v10765_v13 = vld [vmem:[#allocation26_spill] sm:$0xff] }
 0x300   : > { %v3926_v47 = vpop.f32.mrf.mxu1  ;;  %6513 = vmatmul.mubr.msk.bf16.vlgmr.msra.gmra.mxu1 %vm10759_vm10, %v9515_v30  ;;  %v4115_v61 = vpop.f32.mrf.mxu0  ;;  %4657 = vmatprep.mubr.bf16.mxu0 %v10485_v23 }
 0x301   : > { %v9525_v57 = vadd.f32 %v4274_v17, %v4115_v61  ;;  %5356 = vmatprep.mubr.bf16.mxu1 %v10485_v23 }
 0x302   : > { %v3928_v26 = vpop.f32.mrf.mxu1  ;;  %v7041_v35 = vpop.f32.mrf.mxu0 }
 0x303   : > { %v4278_v11 = vadd.f32 %v3928_v26, %v3916_v5  ;;  %v9528_v39 = vadd.f32 %v7041_v35, %v4277_v32 }
 0x304   : > { %v3930_v29 = vpop.f32.mrf.mxu1  ;;  %v9538_v59 = vpop.f32.mrf.mxu0 }
 0x306   : > { %v3932_v49 = vpop.f32.mrf.mxu1 }
 0x307   : > { %v9530_v16 = vadd.f32 %v3932_v49, %v3920_v6  ;;  %4658 = vmatmul.mubr.bf16.gmra.mxu0 %v9350_v52  ;;  %v10766_v6 = vld [vmem:[#allocation70_spill] sm:$0xff] }
 0x308   : > { %v3936_v58 = vpop.f32.mrf.mxu1  ;;  %6516 = vmatmul.mubr.msk.bf16.gmra.mxu1 %vm10762_vm8, %v10760_v7  ;;  %4667 = vmatprep.mubr.bf16.mxu0 %v10485_v23  ;;  %vm10767_vm11 = vnez %v10766_v6 }
 0x309   : > { %5366 = vmatprep.mubr.bf16.mxu1 %v10485_v23 }
 0x30a   : > { %v3938_v20 = vpop.f32.mrf.mxu1 }
 0x30b   : > { %v4280_v18 = vadd.f32 %v3938_v20, %v3926_v47 }
 0x30c   : > { %v3940_v3 = vpop.f32.mrf.mxu1 }
 0x30e   : > { %v3942_v21 = vpop.f32.mrf.mxu1  ;;  %v7044_v2 = vpop.f32.mrf.mxu0 }
 0x30f   : > { %v4281_v19 = vadd.f32 %v3942_v21, %v3930_v29  ;;  %v9540_v25 = vadd.f32 %v7044_v2, %v4280_v18  ;;  %4668 = vmatmul.mubr.bf16.gmra.mxu0 %v9369_v48 }
 0x310   : > { %v3946_v52 = vpop.f32.mrf.mxu1  ;;  %6519 = vmatmul.mubr.msk.bf16.gmra.mxu1 %vm10764_vm13, %v9155_v38  ;;  %v4131_v55 = vpop.f32.mrf.mxu0  ;;  %4677 = vmatprep.mubr.bf16.mxu0 %v10485_v23 }
 0x311   : > { %v9547_v12 = vadd.f32 %v4278_v11, %v4131_v55  ;;  %5376 = vmatprep.mubr.bf16.mxu1 %v10485_v23  ;;  %v10768_v11 = vld [vmem:[#allocation71_spill] sm:$0xff] }
 0x312   : > { %v3948_v27 = vpop.f32.mrf.mxu1  ;;  %v7045_v14 = vpop.f32.mrf.mxu0  ;;  %vm10769_vm14 = vnez %v10768_v11 }
 0x313   : > { %v4282_v5 = vadd.f32 %v3948_v27, %v3936_v58  ;;  %v9550_v50 = vadd.f32 %v7045_v14, %v4281_v19  ;;  %v10770_v27 = vld [vmem:[#allocation72_spill] sm:$0xff] }
 0x314   : > { %v3950_v51 = vpop.f32.mrf.mxu1  ;;  %v9558_v17 = vpop.f32.mrf.mxu0  ;;  %vm10771_vm1 = vnez %v10770_v27 }
 0x316   : > { %v3952_v46 = vpop.f32.mrf.mxu1 }
 0x317   : > { %v4283_v48 = vadd.f32 %v3952_v46, %v3940_v3  ;;  %4678 = vmatmul.mubr.bf16.gmra.mxu0 %v9390_v36 }
 0x318   : > { %v3956_v60 = vpop.f32.mrf.mxu1  ;;  %6522 = vmatmul.mubr.msk.bf16.gmra.mxu1 %vm10767_vm11, %v10765_v13  ;;  %4687 = vmatprep.mubr.bf16.mxu0 %v10485_v23 }
 0x319   : > { %5386 = vmatprep.mubr.bf16.mxu1 %v10485_v23 }
 0x31a   : > { %v3958_v1 = vpop.f32.mrf.mxu1 }
 0x31b   : > { %v4284_v56 = vadd.f32 %v3958_v1, %v3946_v52 }
 0x31c   : > { %v3960_v32 = vpop.f32.mrf.mxu1 }
 0x31e   : > { %v3962_v47 = vpop.f32.mrf.mxu1  ;;  %v7048_v61 = vpop.f32.mrf.mxu0 }
 0x31f   : > { %v4285_v26 = vadd.f32 %v3962_v47, %v3950_v51  ;;  %v9560_v35 = vadd.f32 %v7048_v61, %v4284_v56  ;;  %4688 = vmatmul.mubr.bf16.gmra.mxu0 %v9410_v10  ;;  %v10772_v56 = vld [vmem:[#allocation73_spill] sm:$0xff] }
 0x320   : > { %v3966_v36 = vpop.f32.mrf.mxu1  ;;  %6525 = vmatmul.mubr.msk.bf16.gmra.mxu1 %vm10769_vm14, %v9213_v43  ;;  %v4147_v29 = vpop.f32.mrf.mxu0  ;;  %4697 = vmatprep.mubr.bf16.mxu0 %v10485_v23  ;;  %vm10773_vm0 = vnez %v10772_v56 }
 0x321   : > { %v9567_v49 = vadd.f32 %v4282_v5, %v4147_v29  ;;  %5396 = vmatprep.mubr.bf16.mxu1 %v10485_v23 }
 0x322   : > { %v3968_v58 = vpop.f32.mrf.mxu1  ;;  %v7049_v20 = vpop.f32.mrf.mxu0 }
 0x323   : > { %v4286_v18 = vadd.f32 %v3968_v58, %v3956_v60  ;;  %v9570_v3 = vadd.f32 %v7049_v20, %v4285_v26 }
 0x324   : > { %v3970_v21 = vpop.f32.mrf.mxu1  ;;  %v4150_v2 = vpop.f32.mrf.mxu0 }
 0x325   : > { %v9572_v10 = vadd.f32 %v4283_v48, %v4150_v2 }
 0x326   : > { %v3972_v19 = vpop.f32.mrf.mxu1 }
 0x327   : > { %v4287_v52 = vadd.f32 %v3972_v19, %v3960_v32  ;;  %4698 = vmatmul.mubr.bf16.gmra.mxu0 %v9430_v40 }
 0x328   : > { %v3976_v55 = vpop.f32.mrf.mxu1  ;;  %6528 = vmatmul.mubr.msk.bf16.gmra.mxu1 %vm10771_vm1, %v9239_v54  ;;  %4707 = vmatprep.mubr.bf16.mxu0 %v10485_v23 }
 0x329   : > { %5406 = vmatprep.mubr.bf16.mxu1 %v10485_v23 }
 0x32a   : > { %v3978_v14 = vpop.f32.mrf.mxu1 }
 0x32b   : > { %v4288_v5 = vadd.f32 %v3978_v14, %v3966_v36 }
 0x32c   : > { %v3980_v51 = vpop.f32.mrf.mxu1 }
 0x32e   : > { %v3982_v46 = vpop.f32.mrf.mxu1  ;;  %v7052_v60 = vpop.f32.mrf.mxu0 }
 0x32f   : > { %v4289_v48 = vadd.f32 %v3982_v46, %v3970_v21  ;;  %v9580_v1 = vadd.f32 %v7052_v60, %v4288_v5  ;;  %4708 = vmatmul.mubr.bf16.gmra.mxu0 %v9447_v22 }
 0x330   : > { %v3986_v40 = vpop.f32.mrf.mxu1  ;;  %6531 = vmatmul.mubr.msk.bf16.gmra.mxu1 %vm10773_vm0, %v9264_v33  ;;  %v4163_v32 = vpop.f32.mrf.mxu0  ;;  %4715 = vmatprep.mubr.bf16.mxu0 %v10485_v23 }
 0x331   : > { %v9587_v47 = vadd.f32 %v4286_v18, %v4163_v32  ;;  %5416 = vmatprep.mubr.bf16.mxu1 %v10485_v23 }
 0x332   : > { %v3988_v61 = vpop.f32.mrf.mxu1  ;;  %v7053_v26 = vpop.f32.mrf.mxu0 }
 0x333   : > { %v4290_v36 = vadd.f32 %v3988_v61, %v3976_v55  ;;  %v9590_v29 = vadd.f32 %v7053_v26, %v4289_v48 }
 0x334   : > { %v3990_v58 = vpop.f32.mrf.mxu1  ;;  %v4166_v20 = vpop.f32.mrf.mxu0 }
 0x335   : > { %v9592_v22 = vadd.f32 %v4287_v52, %v4166_v20 }
 0x336   : > { %v3992_v21 = vpop.f32.mrf.mxu1 }
 0x337   : > { %v4291_v2 = vadd.f32 %v3992_v21, %v3980_v51  ;;  %4716 = vmatmul.mubr.bf16.gmra.mxu0 %v10752_v62 }
 0x338   : > { %v3996_v19 = vpop.f32.mrf.mxu1  ;;  %6534 = vmatmul.mubr.msk.bf16.gmra.mxu1 %vm8564_vm12, %v9289_v34  ;;  %7138 = vmatprep.mubr.msk.bf16.mxu0 %vm10759_vm10, %v9515_v30 }
 0x339   : > { %5426 = vmatprep.mubr.bf16.mxu1 %v10485_v23 }
 0x33a   : > { %v3998_v18 = vpop.f32.mrf.mxu1 }
 0x33b   : > { %v4292_v55 = vadd.f32 %v3998_v18, %v3986_v40 }
 0x33c   : > { %v4000_v5 = vpop.f32.mrf.mxu1 }
 0x33e   : > { %v4002_v52 = vpop.f32.mrf.mxu1  ;;  %v7056_v46 = vpop.f32.mrf.mxu0 }
 0x33f   : > { %v4293_v60 = vadd.f32 %v4002_v52, %v3990_v58  ;;  %v9602_v51 = vadd.f32 %v7056_v46, %v4292_v55  ;;  %7139 = vmatmul.mubr.msk.bf16.vlgmr.msra.gmra.mxu0 %vm10762_vm8, %v10760_v7 }
 0x340   : > { %v4006_v62 = vpop.f32.mrf.mxu1  ;;  %6537 = vmatmul.mubr.msk.bf16.gmra.mxu1 %vm8578_vm6, %v9312_v63  ;;  %v4179_v30 = vpop.f32.mrf.mxu0  ;;  %7142 = vmatprep.mubr.msk.bf16.mxu0 %vm10764_vm13, %v9155_v38 }
 0x341   : > { %v9613_v42 = vadd.f32 %v4290_v36, %v4179_v30  ;;  %5436 = vmatprep.mubr.bf16.mxu1 %v10485_v23 }
 0x342   : > { %v4008_v40 = vpop.f32.mrf.mxu1  ;;  %v7057_v32 = vpop.f32.mrf.mxu0 }
 0x343   : > { %v4294_v61 = vadd.f32 %v4008_v40, %v3996_v19  ;;  %v9616_v26 = vadd.f32 %v7057_v32, %v4293_v60 }
 0x344   : > { %v4010_v7 = vpop.f32.mrf.mxu1  ;;  %v4182_v0 = vpop.f32.mrf.mxu0 }
 0x345   : > { %v9618_v58 = vadd.f32 %v4291_v2, %v4182_v0 }
 0x346   : > { %v4012_v20 = vpop.f32.mrf.mxu1 }
 0x347   : > { %v4295_v21 = vadd.f32 %v4012_v20, %v4000_v5  ;;  %7143 = vmatmul.mubr.msk.bf16.gmra.mxu0 %vm10767_vm11, %v10765_v13 }
 0x348   : > { %v4016_v38 = vpop.f32.mrf.mxu1  ;;  %6540 = vmatmul.mubr.msk.bf16.gmra.mxu1 %vm8612_vm4, %v9331_v41  ;;  %7146 = vmatprep.mubr.msk.bf16.mxu0 %vm10769_vm14, %v9213_v43 }
 0x349   : > { %5446 = vmatprep.mubr.bf16.mxu1 %v10485_v23 }
 0x34a   : > { %v4018_v36 = vpop.f32.mrf.mxu1 }
 0x34b   : > { %v4296_v2 = vadd.f32 %v4018_v36, %v4006_v62 }
 0x34c   : > { %v4020_v19 = vpop.f32.mrf.mxu1 }
 0x34e   : > { %v4022_v18 = vpop.f32.mrf.mxu1  ;;  %v7060_v55 = vpop.f32.mrf.mxu0 }
 0x34f   : > { %v4297_v5 = vadd.f32 %v4022_v18, %v4010_v7  ;;  %v9630_v52 = vadd.f32 %v7060_v55, %v4296_v2  ;;  %7147 = vmatmul.mubr.msk.bf16.gmra.mxu0 %vm10771_vm1, %v9239_v54 }
 0x350   : > { %v4026_v13 = vpop.f32.mrf.mxu1  ;;  %6543 = vmatmul.mubr.msk.bf16.gmra.mxu1 %vm8626_vm2, %v9352_v4  ;;  %v4195_v43 = vpop.f32.mrf.mxu0  ;;  %7150 = vmatprep.mubr.msk.bf16.mxu0 %vm10773_vm0, %v9264_v33 }
 0x351   : > { %v9641_v11 = vadd.f32 %v4294_v61, %v4195_v43  ;;  %5456 = vmatprep.mubr.bf16.mxu1 %v10485_v23 }
 0x352   : > { %v4028_v46 = vpop.f32.mrf.mxu1  ;;  %v7061_v60 = vpop.f32.mrf.mxu0 }
 0x353   : > { %v4298_v62 = vadd.f32 %v4028_v46, %v4016_v38  ;;  %v9644_v30 = vadd.f32 %v7061_v60, %v4297_v5 }
 0x354   : > { %v4030_v54 = vpop.f32.mrf.mxu1  ;;  %v4198_v27 = vpop.f32.mrf.mxu0 }
 0x355   : > { %v9646_v40 = vadd.f32 %v4295_v21, %v4198_v27 }
 0x356   : > { %v4032_v32 = vpop.f32.mrf.mxu1 }
 0x357   : > { %v4299_v7 = vadd.f32 %v4032_v32, %v4020_v19  ;;  %7151 = vmatmul.mubr.msk.bf16.gmra.mxu0 %vm8564_vm12, %v9289_v34 }
 0x358   : > { %v4036_v33 = vpop.f32.mrf.mxu1  ;;  %6546 = vmatmul.mubr.msk.bf16.gmra.mxu1 %vm8660_vm9, %v9371_v53  ;;  %7154 = vmatprep.mubr.msk.bf16.mxu0 %vm8578_vm6, %v9312_v63 }
 0x359   : > { %5466 = vmatprep.mubr.bf16.mxu1 %v10485_v23 }
 0x35a   : > { %v4038_v61 = vpop.f32.mrf.mxu1 }
 0x35b   : > { %v4300_v0 = vadd.f32 %v4038_v61, %v4026_v13 }
 0x35c   : > { %v4040_v20 = vpop.f32.mrf.mxu1 }
 0x35e   : > { %v4042_v21 = vpop.f32.mrf.mxu1  ;;  %v7064_v38 = vpop.f32.mrf.mxu0 }
 0x35f   : > { %v4301_v36 = vadd.f32 %v4042_v21, %v4030_v54  ;;  %v9658_v2 = vadd.f32 %v7064_v38, %v4300_v0  ;;  %7155 = vmatmul.mubr.msk.bf16.gmra.mxu0 %vm8612_vm4, %v9331_v41 }
 0x360   : > { %v4046_v34 = vpop.f32.mrf.mxu1  ;;  %6549 = vmatmul.mubr.msk.bf16.gmra.mxu1 %vm8674_vm3, %v9392_v31  ;;  %v4211_v63 = vpop.f32.mrf.mxu0  ;;  %7158 = vmatprep.mubr.msk.bf16.mxu0 %vm8626_vm2, %v9352_v4 }
 0x361   : > { %v9669_v48 = vadd.f32 %v4298_v62, %v4211_v63  ;;  %5476 = vmatprep.mubr.bf16.mxu1 %v10485_v23 }
 0x362   : > { %v4048_v19 = vpop.f32.mrf.mxu1  ;;  %v7065_v18 = vpop.f32.mrf.mxu0 }
 0x363   : > { %v4302_v55 = vadd.f32 %v4048_v19, %v4036_v33  ;;  %v9672_v5 = vadd.f32 %v7065_v18, %v4301_v36 }
 0x364   : > { %v4050_v41 = vpop.f32.mrf.mxu1  ;;  %v4214_v44 = vpop.f32.mrf.mxu0 }
 0x365   : > { %v9674_v13 = vadd.f32 %v4299_v7, %v4214_v44 }
 0x366   : > { %v4052_v43 = vpop.f32.mrf.mxu1 }
 0x367   : > { %v4303_v46 = vadd.f32 %v4052_v43, %v4040_v20  ;;  %v7068_v60 = vpop.f32.mrf.mxu0  ;;  %7159 = vmatmul.mubr.msk.bf16.gmra.mxu0 %vm8660_vm9, %v9371_v53 }
 0x368   : > { %v4056_v4 = vpop.f32.mrf.mxu1  ;;  %6552 = vmatmul.mubr.msk.bf16.gmra.mxu1 %vm8713_vm5, %v9412_v15  ;;  %7162 = vmatprep.mubr.msk.bf16.mxu0 %vm8674_vm3, %v9392_v31  ;;  %v4275_v31 = vadd.f32 %v9504_v45, %v9296_v37 }
 0x369   : > { %v4227_v62 = vpop.f32.mrf.mxu0  ;;  %5486 = vmatprep.mubr.bf16.mxu1 %v10485_v23 }
 0x36a   : > { %v4057_v54 = vpop.f32.mrf.mxu1  ;;  %v9686_v27 = vadd.f32 %v4302_v55, %v4227_v62 }
 0x36b   : > { %v4304_v32 = vadd.f32 %v4057_v54, %v4046_v34  ;;  %v7069_v7 = vpop.f32.mrf.mxu0 }
 0x36c   : > { %v4059_v33 = vpop.f32.mrf.mxu1 }
 0x36d   : > { %v4230_v56 = vpop.f32.mrf.mxu0  ;;  %v9688_v53 = vadd.f32 %v7068_v60, %v4304_v32 }
 0x36e   : > { %v4060_v61 = vpop.f32.mrf.mxu1  ;;  %v9690_v0 = vadd.f32 %v4303_v46, %v4230_v56 }
 0x36f   : > { %v4305_v20 = vadd.f32 %v4060_v61, %v4050_v41  ;;  %v4551_v21 = vpop.f32.mrf.mxu0  ;;  %7163 = vmatmul.mubr.msk.bf16.gmra.mxu0 %vm8713_vm5, %v9412_v15  ;;  %v4307_v15 = vadd.f32 %v4275_v31, %v9538_v59  ;;  %v10783_v59 = vld [vmem:[#allocation91_spill] sm:$0xff]  ;;  %v10786_v61 = vld [vmem:[#allocation93_spill] sm:$0xff] }
 0x370   : > { %v4064_v38 = vpop.f32.mrf.mxu1  ;;  %6555 = vmatmul.mubr.msk.bf16.gmra.mxu1 %vm8728_vm15, %v9426_v24  ;;  %v4895_v34 = vadd.f32 %v4551_v21, %v9525_v57  ;;  %7166 = vmatprep.mubr.msk.bf16.mxu0 %vm8728_vm15, %v9426_v24  ;;  %vm10784_vm12 = vnez %v10783_v59  ;;  %vm10787_vm6 = vnez %v10786_v61 }
 0x371   : > { %v4553_v14 = vpop.f32.mrf.mxu0  ;;  %5496 = vmatprep.mubr.bf16.mxu1 %v10485_v23  ;;  %v9705_v63 = vadd.f32 %v7069_v7, %v4305_v20 }
 0x372   : > { %v4065_v19 = vpop.f32.mrf.mxu1 }
 0x373   : > { %v4554_v37 = vpop.f32.mrf.mxu0 }
 0x374   : > { %v4066_v45 = vpop.f32.mrf.mxu1  ;;  %v4896_v18 = vadd.f32 %v4554_v37, %v4307_v15 }
 0x375   : > { %v4556_v55 = vpop.f32.mrf.mxu0 }
 0x376   : > { %v4067_v41 = vpop.f32.mrf.mxu1 }
 0x377   : > { %v4559_v44 = vpop.f32.mrf.mxu0  ;;  %7167 = vmatmul.mubr.msk.bf16.gmra.mxu0 %vm8759_vm7, %v9444_v28 }
 0x378   : > { %v7088_v43 = vpop.f32.mrf.mxu1  ;;  %6558 = vmatmul.mubr.msk.bf16.gmra.mxu1 %vm8759_vm7, %v9444_v28  ;;  %v4897_v24 = vadd.f32 %v4559_v44, %v9518_v8  ;;  %7170 = vmatprep.mubr.msk.bf16.mxu0 %vm10784_vm12, %v9456_v9  ;;  %v10785_v28 = vld [vmem:[#allocation92_spill] sm:$0xff] }
 0x379   : > { %v4561_v46 = vpop.f32.mrf.mxu0  ;;  %5506 = vmatprep.mubr.bf16.mxu1 %v10485_v23 }
 0x37a   : > { %v4756_v60 = vpop.f32.mrf.mxu1  ;;  %v4927_v4 = vadd.f32 %v4895_v34, %v4561_v46 }
 0x37b   : > { %v4563_v6 = vpop.f32.mrf.mxu0 }
 0x37c   : > { %v7089_v62 = vpop.f32.mrf.mxu1  ;;  %v4898_v54 = vadd.f32 %v4563_v6, %v9528_v39  ;;  %v4311_v39 = vadd.f32 %v9530_v16, %v9558_v17 }
 0x37d   : > { %v4565_v32 = vpop.f32.mrf.mxu0 }
 0x37e   : > { %v4758_v7 = vpop.f32.mrf.mxu1  ;;  %v4928_v33 = vadd.f32 %v4896_v18, %v4565_v32 }
 0x37f   : > { %v4569_v56 = vpop.f32.mrf.mxu0  ;;  %7171 = vmatmul.mubr.msk.bf16.gmra.mxu0 %vm10787_vm6, %v10785_v28 }
 0x380   : > { %v7092_v8 = vpop.f32.mrf.mxu1  ;;  %6561 = vmatmul.mubr.msk.bf16.gmra.mxu1 %vm10784_vm12, %v9456_v9  ;;  %v4899_v20 = vadd.f32 %v4569_v56, %v9547_v12 }
 0x381   : > { %v4571_v21 = vpop.f32.mrf.mxu0  ;;  %5514 = vmatprep.mubr.bf16.mxu1 %v10485_v23 }
 0x382   : > { %v4768_v31 = vpop.f32.mrf.mxu1  ;;  %v4929_v38 = vadd.f32 %v4897_v24, %v4571_v21 }
 0x383   : > { %v9730_v36 = vadd.f32 %v4927_v4, %v4768_v31  ;;  %v4573_v34 = vpop.f32.mrf.mxu0 }
 0x384   : > { %v7093_v14 = vpop.f32.mrf.mxu1  ;;  %v4900_v15 = vadd.f32 %v4573_v34, %v4311_v39  ;;  %v9732_v19 = vadd.f32 %v7092_v8, %v4929_v38 }
 0x385   : > { %v4575_v37 = vpop.f32.mrf.mxu0 }
 0x386   : > { %v4771_v45 = vpop.f32.mrf.mxu1  ;;  %v4930_v9 = vadd.f32 %v4898_v54, %v4575_v37 }
 0x387   : > { %v9734_v18 = vadd.f32 %v4928_v33, %v4771_v45  ;;  %v4579_v12 = vpop.f32.mrf.mxu0 }
 0x388   : > { %v7096_v55 = vpop.f32.mrf.mxu1  ;;  %6564 = vmatmul.mubr.msk.bf16.gmra.mxu1 %vm10787_vm6, %v10785_v28  ;;  %v4901_v23 = vadd.f32 %v4579_v12, %v9540_v25  ;;  %v9740_v16 = vadd.f32 %v7093_v14, %v4930_v9 }
 0x389   : > { %v4581_v17 = vpop.f32.mrf.mxu0 }
 0x38a   : > { %v4784_v41 = vpop.f32.mrf.mxu1  ;;  %v4931_v44 = vadd.f32 %v4899_v20, %v4581_v17 }
 0x38b   : > { %v4583_v57 = vpop.f32.mrf.mxu0 }
 0x38c   : > { %v7097_v43 = vpop.f32.mrf.mxu1  ;;  %v4902_v24 = vadd.f32 %v4583_v57, %v9550_v50  ;;  %v9743_v59 = vadd.f32 %v4931_v44, %v4784_v41 }
 0x38d   : > { %v4585_v46 = vpop.f32.mrf.mxu0 }
 0x38e   : > { %v4787_v60 = vpop.f32.mrf.mxu1  ;;  %v4932_v4 = vadd.f32 %v4900_v15, %v4585_v46 }
 0x38f   : > { %v4589_v6 = vpop.f32.mrf.mxu0 }
 0x390   : > { %v7100_v62 = vpop.f32.mrf.mxu1  ;;  %v4903_v54 = vadd.f32 %v4589_v6, %v9567_v49  ;;  %v9746_v32 = vadd.f32 %v4932_v4, %v4787_v60 }
 0x391   : > { %v4591_v25 = vpop.f32.mrf.mxu0 }
 0x392   : > { %v4800_v7 = vpop.f32.mrf.mxu1  ;;  %v4933_v33 = vadd.f32 %v4901_v23, %v4591_v25 }
 0x393   : > { %v4593_v56 = vpop.f32.mrf.mxu0 }
 0x394   : > { %v7101_v28 = vpop.f32.mrf.mxu1  ;;  %v4904_v61 = vadd.f32 %v4593_v56, %v9572_v10  ;;  %v9749_v8 = vadd.f32 %v7096_v55, %v4933_v33 }
 0x395   : > { %v4595_v50 = vpop.f32.mrf.mxu0 }
 0x396   : > { %v4803_v20 = vpop.f32.mrf.mxu1  ;;  %v4934_v21 = vadd.f32 %v4902_v24, %v4595_v50 }
 0x397   : > { %v4599_v39 = vpop.f32.mrf.mxu0 }
 0x398   : > { %v7104_v31 = vpop.f32.mrf.mxu1  ;;  %v4905_v38 = vadd.f32 %v4599_v39, %v9560_v35  ;;  %v9752_v34 = vadd.f32 %v7097_v43, %v4934_v21 }
 0x399   : > { %v4601_v49 = vpop.f32.mrf.mxu0 }
 0x39a   : > { %v4816_v14 = vpop.f32.mrf.mxu1  ;;  %v4935_v15 = vadd.f32 %v4903_v54, %v4601_v49 }
 0x39b   : > { %v4603_v37 = vpop.f32.mrf.mxu0 }
 0x39c   : > { %v7105_v45 = vpop.f32.mrf.mxu1  ;;  %v4906_v9 = vadd.f32 %v4603_v37, %v9570_v3  ;;  %v9755_v12 = vadd.f32 %v4935_v15, %v4800_v7 }
 0x39d   : > { %v4605_v10 = vpop.f32.mrf.mxu0 }
 0x39e   : > { %v4819_v55 = vpop.f32.mrf.mxu1  ;;  %v4936_v23 = vadd.f32 %v4904_v61, %v4605_v10 }
 0x39f   : > { %v4609_v17 = vpop.f32.mrf.mxu0 }
 0x3a0   : > { %v9757_v41 = vpop.f32.mrf.mxu1  ;;  %v4907_v44 = vadd.f32 %v4609_v17, %v9587_v47  ;;  %v9760_v35 = vadd.f32 %v4936_v23, %v4803_v20 }
 0x3a1   : > { %v4611_v57 = vpop.f32.mrf.mxu0 }
 0x3a2   : > { %v4832_v43 = vpop.f32.mrf.mxu1  ;;  %v4937_v24 = vadd.f32 %v4905_v38, %v4611_v57 }
 0x3a3   : > { %v4613_v46 = vpop.f32.mrf.mxu0 }
 0x3a4   : > { %v9762_v60 = vpop.f32.mrf.mxu1  ;;  %v4908_v3 = vadd.f32 %v4613_v46, %v9592_v22  ;;  %v9765_v4 = vadd.f32 %v7100_v62, %v4937_v24 }
 0x3a5   : > { %v4615_v6 = vpop.f32.mrf.mxu0 }
 0x3a6   : > { %v4835_v54 = vpop.f32.mrf.mxu1  ;;  %v4938_v25 = vadd.f32 %v4906_v9, %v4615_v6 }
 0x3a7   : > { %v4619_v7 = vpop.f32.mrf.mxu0 }
 0x3a8   : > { %v9767_v33 = vpop.f32.mrf.mxu1  ;;  %v4909_v47 = vadd.f32 %v4619_v7, %v9580_v1  ;;  %v9770_v56 = vadd.f32 %v7101_v28, %v4938_v25 }
 0x3a9   : > { %v4621_v61 = vpop.f32.mrf.mxu0 }
 0x3aa   : > { %v9772_v50 = vpop.f32.mrf.mxu1  ;;  %v4939_v20 = vadd.f32 %v4907_v44, %v4621_v61 }
 0x3ab   : > { %v4623_v21 = vpop.f32.mrf.mxu0 }
 0x3ac   : > { %v9774_v39 = vpop.f32.mrf.mxu1  ;;  %v4910_v22 = vadd.f32 %v4623_v21, %v9590_v29  ;;  %v9777_v62 = vadd.f32 %v4939_v20, %v4816_v14 }
 0x3ad   : > { %v4625_v38 = vpop.f32.mrf.mxu0 }
 0x3ae   : > { %v9779_v49 = vpop.f32.mrf.mxu1  ;;  %v4940_v15 = vadd.f32 %v4908_v3, %v4625_v38 }
 0x3af   : > { %v4629_v37 = vpop.f32.mrf.mxu0 }
 0x3b0   : > { %v9781_v9 = vpop.f32.mrf.mxu1  ;;  %v4911_v1 = vadd.f32 %v4629_v37, %v9613_v42  ;;  %v9784_v28 = vadd.f32 %v4940_v15, %v4819_v55 }
 0x3b1   : > { %v4631_v10 = vpop.f32.mrf.mxu0 }
 0x3b2   : > { %v9786_v23 = vpop.f32.mrf.mxu1  ;;  %v4941_v17 = vadd.f32 %v4909_v47, %v4631_v10 }
 0x3b3   : > { %v4633_v44 = vpop.f32.mrf.mxu0 }
 0x3b4   : > { %v9788_v57 = vpop.f32.mrf.mxu1  ;;  %v4912_v29 = vadd.f32 %v4633_v44, %v9618_v58  ;;  %v9791_v14 = vadd.f32 %v7104_v31, %v4941_v17 }
 0x3b5   : > { %v4635_v24 = vpop.f32.mrf.mxu0 }
 0x3b6   : > { %v9793_v46 = vpop.f32.mrf.mxu1  ;;  %v4942_v3 = vadd.f32 %v4910_v22, %v4635_v24 }
 0x3b7   : > { %v4639_v6 = vpop.f32.mrf.mxu0 }
 0x3b8   : > { %v9795_v25 = vpop.f32.mrf.mxu1  ;;  %v4913_v42 = vadd.f32 %v4639_v6, %v9602_v51  ;;  %v9798_v55 = vadd.f32 %v7105_v45, %v4942_v3 }
 0x3b9   : > { %v4641_v7 = vpop.f32.mrf.mxu0 }
 0x3ba   : > { %v9800_v47 = vpop.f32.mrf.mxu1  ;;  %v4943_v61 = vadd.f32 %v4911_v1, %v4641_v7 }
 0x3bb   : > { %v4643_v20 = vpop.f32.mrf.mxu0 }
 0x3bc   : > { %v9802_v21 = vpop.f32.mrf.mxu1  ;;  %v4914_v58 = vadd.f32 %v4643_v20, %v9616_v26  ;;  %v9805_v31 = vadd.f32 %v4943_v61, %v4832_v43 }
 0x3bd   : > { %v4645_v38 = vpop.f32.mrf.mxu0 }
 0x3be   : > { %v9807_v22 = vpop.f32.mrf.mxu1  ;;  %v4944_v15 = vadd.f32 %v4912_v29, %v4645_v38 }
 0x3bf   : > { %v4649_v37 = vpop.f32.mrf.mxu0 }
 0x3c0   : > { %v5350_v10 = vpop.f32.mrf.mxu1  ;;  %v4915_v51 = vadd.f32 %v4649_v37, %v9641_v11  ;;  %v9810_v45 = vadd.f32 %v4944_v15, %v4835_v54 }
 0x3c1   : > { %v9813_v17 = vadd.f32 %v5350_v10, %v9730_v36  ;;  %v4651_v1 = vpop.f32.mrf.mxu0 }
 0x3c2   : > { %v5352_v44 = vpop.f32.mrf.mxu1  ;;  %v4945_v24 = vadd.f32 %v4913_v42, %v4651_v1 }
 0x3c3   : > { %v4653_v3 = vpop.f32.mrf.mxu0 }
 0x3c4   : > { %v5353_v26 = vpop.f32.mrf.mxu1  ;;  %v4916_v43 = vadd.f32 %v4653_v3, %v9646_v40  ;;  %v9817_v6 = vadd.f32 %v9757_v41, %v4945_v24 }
 0x3c5   : > { %v9820_v29 = vadd.f32 %v5353_v26, %v9734_v18  ;;  %v4655_v7 = vpop.f32.mrf.mxu0 }
 0x3c6   : > { %v5355_v11 = vpop.f32.mrf.mxu1  ;;  %v4946_v54 = vadd.f32 %v4914_v58, %v4655_v7 }
 0x3c7   : > { %v4659_v61 = vpop.f32.mrf.mxu0 }
 0x3c8   : > { %v9822_v20 = vpop.f32.mrf.mxu1  ;;  %v4917_v36 = vadd.f32 %v4659_v61, %v9630_v52  ;;  %v9826_v42 = vadd.f32 %v9762_v60, %v4946_v54 }
 0x3c9   : > { %v4661_v38 = vpop.f32.mrf.mxu0 }
 0x3ca   : > { %v9828_v15 = vpop.f32.mrf.mxu1  ;;  %v4947_v40 = vadd.f32 %v4915_v51, %v4661_v38 }
 0x3cb   : > { %v4663_v41 = vpop.f32.mrf.mxu0 }
 0x3cc   : > { %v9830_v37 = vpop.f32.mrf.mxu1  ;;  %v4918_v18 = vadd.f32 %v4663_v41, %v9644_v30  ;;  %v9834_v10 = vadd.f32 %v4947_v40, %v9772_v50 }
 0x3cd   : > { %v4665_v58 = vpop.f32.mrf.mxu0 }
 0x3ce   : > { %10788 = vst [vmem:[#allocation31_spill] sm:$0xff] %v9834_v10  ;;  %v9836_v1 = vpop.f32.mrf.mxu1  ;;  %v4948_v44 = vadd.f32 %v4916_v43, %v4665_v58 }
 0x3cf   : > { %v4669_v52 = vpop.f32.mrf.mxu0 }
 0x3d0   : > { %v9838_v24 = vpop.f32.mrf.mxu1  ;;  %v4919_v60 = vadd.f32 %v4669_v52, %v9669_v48  ;;  %v9842_v3 = vadd.f32 %v4948_v44, %v9779_v49 }
 0x3d1   : > { %v4671_v51 = vpop.f32.mrf.mxu0 }
 0x3d2   : > { %10789 = vst [vmem:[#allocation32_spill] sm:$0xff] %v9842_v3  ;;  %v9844_v26 = vpop.f32.mrf.mxu1  ;;  %v4949_v7 = vadd.f32 %v4917_v36, %v4671_v51 }
 0x3d3   : > { %v4673_v30 = vpop.f32.mrf.mxu0 }
 0x3d4   : > { %v9846_v11 = vpop.f32.mrf.mxu1  ;;  %v4920_v50 = vadd.f32 %v4673_v30, %v9674_v13  ;;  %v9850_v54 = vadd.f32 %v9767_v33, %v4949_v7 }
 0x3d5   : > { %v4675_v43 = vpop.f32.mrf.mxu0 }
 0x3d6   : > { %10790 = vst [vmem:[#allocation33_spill] sm:$0xff] %v9850_v54  ;;  %v9852_v61 = vpop.f32.mrf.mxu1  ;;  %v4950_v38 = vadd.f32 %v4918_v18, %v4675_v43 }
 0x3d7   : > { %v4679_v48 = vpop.f32.mrf.mxu0 }
 0x3d8   : > { %v9854_v40 = vpop.f32.mrf.mxu1  ;;  %v4921_v49 = vadd.f32 %v4679_v48, %v9658_v2  ;;  %v9858_v41 = vadd.f32 %v9774_v39, %v4950_v38 }
 0x3d9   : > { %v4681_v36 = vpop.f32.mrf.mxu0 }
 0x3da   : > { %10791 = vst [vmem:[#allocation36_spill] sm:$0xff] %v9858_v41  ;;  %v9860_v58 = vpop.f32.mrf.mxu1  ;;  %v4951_v44 = vadd.f32 %v4919_v60, %v4681_v36  ;;  %v5700_v41 = vadd.f32 %v9854_v40, %v9749_v8 }
 0x3db   : > { %v4683_v13 = vpop.f32.mrf.mxu0 }
 0x3dc   : > { %v9862_v52 = vpop.f32.mrf.mxu1  ;;  %v4922_v33 = vadd.f32 %v4683_v13, %v9672_v5  ;;  %v9866_v51 = vadd.f32 %v4951_v44, %v9786_v23 }
 0x3dd   : > { %v4685_v18 = vpop.f32.mrf.mxu0 }
 0x3de   : > { %10792 = vst [vmem:[#allocation39_spill] sm:$0xff] %v9866_v51  ;;  %v9868_v7 = vpop.f32.mrf.mxu1  ;;  %v4952_v30 = vadd.f32 %v4920_v50, %v4685_v18 }
 0x3df   : > { %v4689_v2 = vpop.f32.mrf.mxu0 }
 0x3e0   : > { %v9870_v43 = vpop.f32.mrf.mxu1  ;;  %v4923_v39 = vadd.f32 %v4689_v2, %v9686_v27  ;;  %v9874_v38 = vadd.f32 %v4952_v30, %v9793_v46 }
 0x3e1   : > { %v4691_v60 = vpop.f32.mrf.mxu0 }
 0x3e2   : > { %10793 = vst [vmem:[#allocation42_spill] sm:$0xff] %v9874_v38  ;;  %v9876_v48 = vpop.f32.mrf.mxu1  ;;  %v4953_v36 = vadd.f32 %v4921_v49, %v4691_v60 }
 0x3e3   : > { %v4693_v5 = vpop.f32.mrf.mxu0 }
 0x3e4   : > { %v9878_v13 = vpop.f32.mrf.mxu1  ;;  %v4924_v23 = vadd.f32 %v4693_v5, %v9690_v0  ;;  %v9882_v44 = vadd.f32 %v9781_v9, %v4953_v36 }
 0x3e5   : > { %v4695_v50 = vpop.f32.mrf.mxu0 }
 0x3e6   : > { %10794 = vst [vmem:[#allocation45_spill] sm:$0xff] %v9882_v44  ;;  %v9884_v18 = vpop.f32.mrf.mxu1  ;;  %v4954_v51 = vadd.f32 %v4922_v33, %v4695_v50 }
 0x3e7   : > { %v4699_v27 = vpop.f32.mrf.mxu0 }
 0x3e8   : > { %v9886_v2 = vpop.f32.mrf.mxu1  ;;  %v4925_v46 = vadd.f32 %v4699_v27, %v9688_v53  ;;  %v9890_v30 = vadd.f32 %v9788_v57, %v4954_v51 }
 0x3e9   : > { %v4701_v49 = vpop.f32.mrf.mxu0 }
 0x3ea   : > { %10795 = vst [vmem:[#allocation47_spill] sm:$0xff] %v9890_v30  ;;  %v9892_v60 = vpop.f32.mrf.mxu1  ;;  %v4955_v38 = vadd.f32 %v4923_v39, %v4701_v49 }
 0x3eb   : > { %v4703_v0 = vpop.f32.mrf.mxu0 }
 0x3ec   : > { %v9894_v5 = vpop.f32.mrf.mxu1  ;;  %v4926_v9 = vadd.f32 %v4703_v0, %v9705_v63  ;;  %v9898_v36 = vadd.f32 %v4955_v38, %v9800_v47 }
 0x3ed   : > { %v4705_v33 = vpop.f32.mrf.mxu0 }
 0x3ee   : > { %10796 = vst [vmem:[#allocation15_spill] sm:$0xff] %v9898_v36  ;;  %v9900_v50 = vpop.f32.mrf.mxu1  ;;  %v4956_v44 = vadd.f32 %v4924_v23, %v4705_v33 }
 0x3ef   : > { %v4709_v53 = vpop.f32.mrf.mxu0 }
 0x3f0   : > { %v9902_v27 = vpop.f32.mrf.mxu1  ;;  %v9905_v57 = vadd.f32 %v4956_v44, %v9807_v22 }
 0x3f1   : > { %v4710_v51 = vpop.f32.mrf.mxu0 }
 0x3f2   : > { %10797 = vst [vmem:[#allocation78_spill] sm:$0xff] %v9905_v57  ;;  %v9907_v39 = vpop.f32.mrf.mxu1  ;;  %v4957_v49 = vadd.f32 %v4925_v46, %v4710_v51 }
 0x3f3   : > { %v4712_v30 = vpop.f32.mrf.mxu0 }
 0x3f4   : > { %v9909_v3 = vpop.f32.mrf.mxu1  ;;  %v9912_v63 = vadd.f32 %v9795_v25, %v4957_v49 }
 0x3f5   : > { %v4713_v47 = vpop.f32.mrf.mxu0 }
 0x3f6   : > { %10798 = vst [vmem:[#allocation80_spill] sm:$0xff] %v9912_v63  ;;  %v9914_v38 = vpop.f32.mrf.mxu1  ;;  %v4958_v23 = vadd.f32 %v4926_v9, %v4713_v47 }
 0x3f7   : > { %v4717_v0 = vpop.f32.mrf.mxu0 }
 0x3f8   : > { %v9916_v33 = vpop.f32.mrf.mxu1  ;;  %v9919_v22 = vadd.f32 %v9802_v21, %v4958_v23  ;;  %v5696_v21 = vadd.f32 %v9822_v20, %v9732_v19 }
 0x3f9   : > { %v4718_v44 = vpop.f32.mrf.mxu0 }
 0x3fa   : > { %10799 = vst [vmem:[#allocation51_spill] sm:$0xff] %v9919_v22  ;;  %v9921_v53 = vpop.f32.mrf.mxu1  ;;  %v5728_v44 = vadd.f32 %v5696_v21, %v9844_v26 }
 0x3fb   : > { %v4719_v46 = vpop.f32.mrf.mxu0 }
 0x3fc   : > { %v9923_v30 = vpop.f32.mrf.mxu1 }
 0x3fd   : > { %v4720_v51 = vpop.f32.mrf.mxu0 }
 0x3fe   : > { %v9925_v57 = vpop.f32.mrf.mxu1 }
 0x3ff   : > { %v7140_v25 = vpop.f32.mrf.mxu0 }
 0x400   : > { %v9927_v49 = vpop.f32.mrf.mxu1  ;;  %v9941_v25 = vld [vmem:[%s10198_s3 + $0x1] ss:$0 sm:$0xff] }
 0x401   : > { %v5555_v63 = vpop.f32.mrf.mxu0 }
 0x402   : > { %v9929_v9 = vpop.f32.mrf.mxu1  ;;  %v5726_v63 = vadd.f32 %v9813_v17, %v9828_v15  ;;  %v5727_v17 = vadd.f32 %v9820_v29, %v9836_v1 }
 0x403   : > { %v7141_v47 = vpop.f32.mrf.mxu0 }
 0x404   : > { %v9933_v23 = vpop.f32.mrf.mxu1  ;;  %v5697_v47 = vadd.f32 %v9830_v37, %v9740_v16  ;;  %v10800_v16 = vld [vmem:[#allocation19_spill] sm:$0xff] }
 0x405   : > { %v5557_v0 = vpop.f32.mrf.mxu0 }
 0x406   : > { %v9936_v46 = vpop.f32.mrf.mxu1  ;;  %v5729_v26 = vadd.f32 %v5697_v47, %v9852_v61  ;;  %v5732_v47 = vadd.f32 %v5700_v41, %v9876_v48 }
 0x407   : > { %v7144_v51 = vpop.f32.mrf.mxu0 }
 0x408   : > { %v9947_v19 = vpop.f32.mrf.mxu1  ;;  %v5760_v20 = vadd.f32 %v7144_v51, %v5728_v44  ;;  %v5698_v51 = vadd.f32 %v9838_v24, %v9743_v59  ;;  %v10802_v24 = vld [vmem:[#allocation20_spill] sm:$0xff] }
 0x409   : > { %v5567_v0 = vpop.f32.mrf.mxu0 }
 0x40a   : > { %v5797_v21 = vadd.f32 %v9941_v25, %v5760_v20  ;;  %v9952_v22 = vpop.f32.mrf.mxu1  ;;  %v5758_v36 = vadd.f32 %v5726_v63, %v5567_v0  ;;  %v10801_v0 = vld [vmem:[#allocation17_spill] sm:$0xff]  ;;  %v5730_v1 = vadd.f32 %v5698_v51, %v9860_v58  ;;  %v5699_v58 = vadd.f32 %v9846_v11, %v9746_v32  ;;  %v10804_v11 = vld [vmem:[#allocation23_spill] sm:$0xff] }
 0x40b   : > { %v7145_v10 = vpop.f32.mrf.mxu0 }
 0x40c   : > { %v5829_v15 = vadd.f32 %v10800_v16, %v5797_v21  ;;  %v5795_v37 = vadd.f32 %v9941_v25, %v5758_v36  ;;  %v9960_v44 = vpop.f32.mrf.mxu1  ;;  %v5761_v61 = vadd.f32 %v7145_v10, %v5729_v26  ;;  %v5701_v36 = vadd.f32 %v9862_v52, %v9752_v34  ;;  %v10803_v16 = vld [vmem:[#allocation18_spill] sm:$0xff] }
 0x40d   : > { %v5570_v63 = vpop.f32.mrf.mxu0 }
 0x40e   : > { %v5861_v20 = vmax.f32 %v5829_v15, 0.0  ;;  %v5827_v8 = vadd.f32 %v10801_v0, %v5795_v37  ;;  %v5798_v40 = vadd.f32 %v9941_v25, %v5761_v61  ;;  %v9967_v54 = vpop.f32.mrf.mxu1  ;;  %v5759_v29 = vadd.f32 %v5727_v17, %v5570_v63 }
 0x40f   : > { %v7148_v10 = vpop.f32.mrf.mxu0  ;;  %v5733_v34 = vadd.f32 %v5701_v36, %v9884_v18  ;;  %v5731_v63 = vadd.f32 %v5699_v58, %v9868_v7 }
 0x410   : > { %5893 = vst [vmem:[%s9972_s24 + $0x10] sm:$0xff] %v5861_v20  ;;  %v5859_v59 = vmax.f32 %v5827_v8, 0.0  ;;  %v5830_v41 = vadd.f32 %v10802_v24, %v5798_v40  ;;  %v5796_v48 = vadd.f32 %v9941_v25, %v5759_v29  ;;  %v9977_v26 = vpop.f32.mrf.mxu1  ;;  %v5764_v21 = vadd.f32 %v7148_v10, %v5732_v47 }
 0x411   : > { %v5583_v52 = vpop.f32.mrf.mxu0  ;;  %v5704_v47 = vadd.f32 %v9886_v2, %v9765_v4  ;;  %v5702_v29 = vadd.f32 %v9870_v43, %v9755_v12  ;;  %v10805_v4 = vld [vmem:[#allocation21_spill] sm:$0xff]  ;;  %v10806_v43 = vld [vmem:[#allocation24_spill] sm:$0xff] }
 0x412   : > { %5891 = vst [vmem:[%s9972_s24] sm:$0xff] %v5859_v59  ;;  %v5862_v17 = vmax.f32 %v5830_v41, 0.0  ;;  %v5828_v15 = vadd.f32 %v10803_v16, %v5796_v48  ;;  %v5801_v37 = vadd.f32 %v9941_v25, %v5764_v21  ;;  %v9985_v61 = vpop.f32.mrf.mxu1  ;;  %v5762_v51 = vadd.f32 %v5730_v1, %v5583_v52 }
 0x413   : > { %v7149_v20 = vpop.f32.mrf.mxu0  ;;  %v5736_v1 = vadd.f32 %v5704_v47, %v9907_v39  ;;  %v5734_v41 = vadd.f32 %v5702_v29, %v9892_v60  ;;  %v5705_v48 = vadd.f32 %v9894_v5, %v9770_v56  ;;  %v10807_v56 = vld [vmem:[#allocation22_spill] sm:$0xff] }
 0x414   : > { %5894 = vst [vmem:[%s9972_s24 + $0x18] sm:$0xff] %v5862_v17  ;;  %v5860_v32 = vmax.f32 %v5828_v15, 0.0  ;;  %v5833_v18 = vadd.f32 %v10804_v11, %v5801_v37  ;;  %v5799_v0 = vadd.f32 %v9941_v25, %v5762_v51  ;;  %v9993_v8 = vpop.f32.mrf.mxu1  ;;  %v5765_v40 = vadd.f32 %v7149_v20, %v5733_v34 }
 0x415   : > { %v5586_v7 = vpop.f32.mrf.mxu0  ;;  %v5703_v17 = vadd.f32 %v9878_v13, %v9760_v35  ;;  %v5737_v16 = vadd.f32 %v5705_v48, %v9914_v38  ;;  %v5708_v20 = vadd.f32 %v9916_v33, %v9791_v14  ;;  %v10808_v13 = vld [vmem:[#allocation29_spill] sm:$0xff]  ;;  %v10809_v14 = vld [vmem:[#allocation27_spill] sm:$0xff] }
 0x416   : > { %5892 = vst [vmem:[%s9972_s24 + $0x8] sm:$0xff] %v5860_v32  ;;  %v5865_v36 = vmax.f32 %v5833_v18, 0.0  ;;  %v5831_v2 = vadd.f32 %v10805_v4, %v5799_v0  ;;  %v5802_v10 = vadd.f32 %v9941_v25, %v5765_v40  ;;  %v10001_v59 = vpop.f32.mrf.mxu1  ;;  %v5763_v24 = vadd.f32 %v5731_v63, %v5586_v7 }
 0x417   : > { %v7152_v21 = vpop.f32.mrf.mxu0  ;;  %v5735_v47 = vadd.f32 %v5703_v17, %v9900_v50  ;;  %v5706_v40 = vadd.f32 %v9902_v27, %v9777_v62  ;;  %v5740_v29 = vadd.f32 %v5708_v20, %v9929_v9  ;;  %v10810_v27 = vld [vmem:[#allocation30_spill] sm:$0xff] }
 0x418   : > { %5897 = vst [vmem:[%s9972_s24 + $0x30] sm:$0xff] %v5865_v36  ;;  %v5863_v12 = vmax.f32 %v5831_v2, 0.0  ;;  %v5834_v39 = vadd.f32 %v10806_v43, %v5802_v10  ;;  %v5800_v58 = vadd.f32 %v9941_v25, %v5763_v24  ;;  %v10009_v34 = vpop.f32.mrf.mxu1  ;;  %v5768_v52 = vadd.f32 %v7152_v21, %v5736_v1 }
 0x419   : > { %v5599_v60 = vpop.f32.mrf.mxu0  ;;  %v5738_v2 = vadd.f32 %v5706_v40, %v9921_v53  ;;  %v5709_v10 = vadd.f32 %v9923_v30, %v9798_v55  ;;  %v10811_v55 = vld [vmem:[#allocation28_spill] sm:$0xff] }
 0x41a   : > { %5895 = vst [vmem:[%s9972_s24 + $0x20] sm:$0xff] %v5863_v12  ;;  %v5866_v15 = vmax.f32 %v5834_v39, 0.0  ;;  %v5832_v5 = vadd.f32 %v10807_v56, %v5800_v58  ;;  %v5805_v37 = vadd.f32 %v9941_v25, %v5768_v52  ;;  %v10017_v51 = vpop.f32.mrf.mxu1  ;;  %v5766_v63 = vadd.f32 %v5734_v41, %v5599_v60 }
 0x41b   : > { %v7153_v32 = vpop.f32.mrf.mxu0  ;;  %v5707_v12 = vadd.f32 %v9909_v3, %v9784_v28  ;;  %v5741_v43 = vadd.f32 %v5709_v10, %v9936_v46  ;;  %v5712_v60 = vadd.f32 %v9947_v19, %v9817_v6  ;;  %v10812_v3 = vld [vmem:[#allocation37_spill] sm:$0xff]  ;;  %v10813_v6 = vld [vmem:[#allocation34_spill] sm:$0xff] }
 0x41c   : > { %5898 = vst [vmem:[%s9972_s24 + $0x38] sm:$0xff] %v5866_v15  ;;  %v5864_v35 = vmax.f32 %v5832_v5, 0.0  ;;  %v5837_v38 = vadd.f32 %v10808_v13, %v5805_v37  ;;  %v5803_v11 = vadd.f32 %v9941_v25, %v5766_v63  ;;  %v10025_v18 = vpop.f32.mrf.mxu1  ;;  %v5769_v0 = vadd.f32 %v7153_v32, %v5737_v16 }
 0x41d   : > { %v5602_v50 = vpop.f32.mrf.mxu0  ;;  %v5739_v16 = vadd.f32 %v5707_v12, %v9925_v57  ;;  %v5710_v63 = vadd.f32 %v9927_v49, %v9805_v31  ;;  %v10814_v49 = vld [vmem:[#allocation38_spill] sm:$0xff]  ;;  %v10818_v12 = vld [vmem:[#allocation31_spill] sm:$0xff] }
 0x41e   : > { %5896 = vst [vmem:[%s9972_s24 + $0x28] sm:$0xff] %v5864_v35  ;;  %v5869_v1 = vmax.f32 %v5837_v38, 0.0  ;;  %v5835_v33 = vadd.f32 %v10809_v14, %v5803_v11  ;;  %v5806_v7 = vadd.f32 %v9941_v25, %v5769_v0  ;;  %v10033_v36 = vpop.f32.mrf.mxu1  ;;  %v5767_v4 = vadd.f32 %v5735_v47, %v5602_v50 }
 0x41f   : > { %v7156_v24 = vpop.f32.mrf.mxu0  ;;  %v5744_v47 = vadd.f32 %v5712_v60, %v9985_v61  ;;  %v5742_v38 = vadd.f32 %v5710_v63, %v9952_v22  ;;  %v5713_v11 = vadd.f32 %v9960_v44, %v9826_v42  ;;  %v10820_v60 = vld [vmem:[#allocation36_spill] sm:$0xff] }
 0x420   : > { %5901 = vst [vmem:[%s9972_s24 + $0x50] sm:$0xff] %v5869_v1  ;;  %v5867_v62 = vmax.f32 %v5835_v33, 0.0  ;;  %v5838_v9 = vadd.f32 %v10810_v27, %v5806_v7  ;;  %v5804_v41 = vadd.f32 %v9941_v25, %v5767_v4  ;;  %v10041_v48 = vpop.f32.mrf.mxu1  ;;  %v5772_v21 = vadd.f32 %v7156_v24, %v5740_v29  ;;  %v10815_v7 = vld [vmem:[#allocation35_spill] sm:$0xff]  ;;  %v10816_v24 = vld [vmem:[#allocation33_spill] sm:$0xff]  ;;  %v10822_v63 = vld [vmem:[#allocation32_spill] sm:$0xff] }
 0x421   : > { %v5615_v53 = vpop.f32.mrf.mxu0  ;;  %v5711_v1 = vadd.f32 %v9933_v23, %v9810_v45  ;;  %v5745_v14 = vadd.f32 %v5713_v11, %v10001_v59  ;;  %v10817_v23 = vld [vmem:[#allocation43_spill] sm:$0xff]  ;;  %v10824_v11 = vld [vmem:[#allocation45_spill] sm:$0xff] }
 0x422   : > { %5899 = vst [vmem:[%s9972_s24 + $0x40] sm:$0xff] %v5867_v62  ;;  %v5870_v39 = vmax.f32 %v5838_v9, 0.0  ;;  %v5836_v30 = vadd.f32 %v10811_v55, %v5804_v41  ;;  %v5809_v58 = vadd.f32 %v9941_v25, %v5772_v21  ;;  %v5470_v52 = vpop.f32.mrf.mxu1  ;;  %v5770_v17 = vadd.f32 %v5738_v2, %v5615_v53  ;;  %v10819_v55 = vld [vmem:[#allocation40_spill] sm:$0xff] }
 0x423   : > { %v7157_v15 = vpop.f32.mrf.mxu0  ;;  %v5743_v10 = vadd.f32 %v5711_v1, %v9967_v54  ;;  %v5716_v62 = vadd.f32 %v10009_v34, %v10816_v24  ;;  %v10826_v1 = vld [vmem:[#allocation39_spill] sm:$0xff] }
 0x424   : > { %5902 = vst [vmem:[%s9972_s24 + $0x58] sm:$0xff] %v5870_v39  ;;  %v5868_v28 = vmax.f32 %v5836_v30, 0.0  ;;  %v5841_v46 = vadd.f32 %v10812_v3, %v5809_v58  ;;  %v5807_v56 = vadd.f32 %v9941_v25, %v5770_v17  ;;  %v10055_v5 = vpop.f32.mrf.mxu1  ;;  %v5773_v37 = vadd.f32 %v7157_v15, %v5741_v43  ;;  %v10828_v24 = vld [vmem:[#allocation47_spill] sm:$0xff] }
 0x425   : > { %v5618_v57 = vpop.f32.mrf.mxu0  ;;  %v5714_v43 = vadd.f32 %v9977_v26, %v10818_v12  ;;  %v5748_v53 = vadd.f32 %v5716_v62, %v5470_v52  ;;  %v5717_v15 = vadd.f32 %v10025_v18, %v10820_v60  ;;  %v10821_v26 = vld [vmem:[#allocation44_spill] sm:$0xff]  ;;  %v10830_v12 = vld [vmem:[#allocation42_spill] sm:$0xff] }
 0x426   : > { %5900 = vst [vmem:[%s9972_s24 + $0x48] sm:$0xff] %v5868_v28  ;;  %v5873_v20 = vmax.f32 %v5841_v46, 0.0  ;;  %v5839_v19 = vadd.f32 %v10813_v6, %v5807_v56  ;;  %v5810_v32 = vadd.f32 %v9941_v25, %v5773_v37  ;;  %v5474_v35 = vpop.f32.mrf.mxu1  ;;  %v5771_v13 = vadd.f32 %v5739_v16, %v5618_v57  ;;  %v10823_v6 = vld [vmem:[#allocation41_spill] sm:$0xff] }
 0x427   : > { %v7160_v0 = vpop.f32.mrf.mxu0  ;;  %v5746_v16 = vadd.f32 %v5714_v43, %v10017_v51  ;;  %v5749_v57 = vadd.f32 %v5717_v15, %v5474_v35  ;;  %v5719_v43 = vadd.f32 %v10055_v5, %v10830_v12  ;;  %v10832_v15 = vld [vmem:[#allocation55_spill] sm:$0xff]  ;;  %v10841_v12 = vld [vmem:[#allocation61_spill] sm:$0xff] }
 0x428   : > { %5905 = vst [vmem:[%s9972_s24 + $0x70] sm:$0xff] %v5873_v20  ;;  %v5871_v31 = vmax.f32 %v5839_v19, 0.0  ;;  %v5842_v61 = vadd.f32 %v10814_v49, %v5810_v32  ;;  %v5808_v40 = vadd.f32 %v9941_v25, %v5771_v13  ;;  %v5478_v29 = vpop.f32.mrf.mxu1  ;;  %v5776_v50 = vadd.f32 %v7160_v0, %v5744_v47 }
 0x429   : > { %v5631_v33 = vpop.f32.mrf.mxu0  ;;  %v5715_v47 = vadd.f32 %v9993_v8, %v10822_v63  ;;  %v5720_v0 = vadd.f32 %v5478_v29, %v10824_v11  ;;  %v10836_v11 = vld [vmem:[#allocation80_spill] sm:$0xff] }
 0x42a   : > { %5903 = vst [vmem:[%s9972_s24 + $0x60] sm:$0xff] %v5871_v31  ;;  %v5874_v22 = vmax.f32 %v5842_v61, 0.0  ;;  %v5840_v42 = vadd.f32 %v10815_v7, %v5808_v40  ;;  %v5813_v44 = vadd.f32 %v9941_v25, %v5776_v50  ;;  %v5480_v4 = vpop.f32.mrf.mxu1  ;;  %v5774_v2 = vadd.f32 %v5742_v38, %v5631_v33  ;;  %v10825_v61 = vld [vmem:[#allocation49_spill] sm:$0xff] }
 0x42b   : > { %v7161_v27 = vpop.f32.mrf.mxu0  ;;  %v5747_v38 = vadd.f32 %v5715_v47, %v10033_v36  ;;  %v10827_v36 = vld [vmem:[#allocation46_spill] sm:$0xff]  ;;  %v10834_v47 = vld [vmem:[#allocation52_spill] sm:$0xff] }
 0x42c   : > { %5906 = vst [vmem:[%s9972_s24 + $0x78] sm:$0xff] %v5874_v22  ;;  %v5872_v45 = vmax.f32 %v5840_v42, 0.0  ;;  %v5845_v59 = vadd.f32 %v10817_v23, %v5813_v44  ;;  %v5811_v9 = vadd.f32 %v9941_v25, %v5774_v2  ;;  %v5482_v41 = vpop.f32.mrf.mxu1  ;;  %v5777_v21 = vadd.f32 %v7161_v27, %v5745_v14  ;;  %v10829_v23 = vld [vmem:[#allocation50_spill] sm:$0xff] }
 0x42d   : > { %v5634_v39 = vpop.f32.mrf.mxu0  ;;  %v5718_v14 = vadd.f32 %v10041_v48, %v10826_v1  ;;  %v5721_v62 = vadd.f32 %v5482_v41, %v10828_v24  ;;  %v10840_v24 = vld [vmem:[#allocation59_spill] sm:$0xff] }
 0x42e   : > { %5904 = vst [vmem:[%s9972_s24 + $0x68] sm:$0xff] %v5872_v45  ;;  %v5877_v54 = vmax.f32 %v5845_v59, 0.0  ;;  %v5843_v30 = vadd.f32 %v10819_v55, %v5811_v9  ;;  %v5814_v34 = vadd.f32 %v9941_v25, %v5777_v21  ;;  %v5484_v58 = vpop.f32.mrf.mxu1  ;;  %v5775_v17 = vadd.f32 %v5743_v10, %v5634_v39 }
 0x42f   : > { %v7164_v28 = vpop.f32.mrf.mxu0  ;;  %v5750_v10 = vadd.f32 %v5718_v14, %v5480_v4 }
 0x430   : > { %5909 = vst [vmem:[%s9972_s24 + $0x90] sm:$0xff] %v5877_v54  ;;  %v5875_v3 = vmax.f32 %v5843_v30, 0.0  ;;  %v5846_v52 = vadd.f32 %v10821_v26, %v5814_v34  ;;  %v5812_v46 = vadd.f32 %v9941_v25, %v5775_v17  ;;  %v5488_v56 = vpop.f32.mrf.mxu1  ;;  %v5780_v37 = vadd.f32 %v7164_v28, %v5748_v53  ;;  %v10831_v54 = vld [vmem:[#allocation48_spill] sm:$0xff] }
 0x431   : > { %v5647_v20 = vpop.f32.mrf.mxu0  ;;  %v5751_v17 = vadd.f32 %v5719_v43, %v5484_v58 }
 0x432   : > { %5907 = vst [vmem:[%s9972_s24 + $0x80] sm:$0xff] %v5875_v3  ;;  %v5878_v51 = vmax.f32 %v5846_v52, 0.0  ;;  %v5844_v19 = vadd.f32 %v10823_v6, %v5812_v46  ;;  %v5817_v18 = vadd.f32 %v9941_v25, %v5780_v37  ;;  %v5490_v32 = vpop.f32.mrf.mxu1  ;;  %v5778_v13 = vadd.f32 %v5746_v16, %v5647_v20  ;;  %v10833_v52 = vld [vmem:[#allocation15_spill] sm:$0xff] }
 0x433   : > { %v7165_v31 = vpop.f32.mrf.mxu0  ;;  %v5752_v33 = vadd.f32 %v5720_v0, %v5490_v32  ;;  %v5722_v46 = vadd.f32 %v5488_v56, %v10833_v52  ;;  %v10835_v32 = vld [vmem:[#allocation56_spill] sm:$0xff] }
 0x434   : > { %5910 = vst [vmem:[%s9972_s24 + $0x98] sm:$0xff] %v5878_v51  ;;  %v5876_v49 = vmax.f32 %v5844_v19, 0.0  ;;  %v5849_v8 = vadd.f32 %v10825_v61, %v5817_v18  ;;  %v5815_v35 = vadd.f32 %v9941_v25, %v5778_v13  ;;  %v5492_v40 = vpop.f32.mrf.mxu1  ;;  %v5781_v50 = vadd.f32 %v7165_v31, %v5749_v57 }
 0x435   : > { %v5650_v22 = vpop.f32.mrf.mxu0 }
 0x436   : > { %5908 = vst [vmem:[%s9972_s24 + $0x88] sm:$0xff] %v5876_v49  ;;  %v5881_v7 = vmax.f32 %v5849_v8, 0.0  ;;  %v5847_v42 = vadd.f32 %v10827_v36, %v5815_v35  ;;  %v5818_v29 = vadd.f32 %v9941_v25, %v5781_v50  ;;  %v5494_v44 = vpop.f32.mrf.mxu1  ;;  %v5779_v2 = vadd.f32 %v5747_v38, %v5650_v22  ;;  %v10837_v49 = vld [vmem:[#allocation78_spill] sm:$0xff]  ;;  %v10838_v35 = vld [vmem:[#allocation53_spill] sm:$0xff] }
 0x437   : > { %v7168_v27 = vpop.f32.mrf.mxu0  ;;  %v5753_v53 = vadd.f32 %v5721_v62, %v5494_v44  ;;  %v5723_v61 = vadd.f32 %v5492_v40, %v10837_v49  ;;  %v10839_v44 = vld [vmem:[#allocation51_spill] sm:$0xff] }
 0x438   : > { %5913 = vst [vmem:[%s9972_s24 + $0xb0] sm:$0xff] %v5881_v7  ;;  %v5879_v45 = vmax.f32 %v5847_v42, 0.0  ;;  %v5850_v48 = vadd.f32 %v10829_v23, %v5818_v29  ;;  %v5816_v59 = vadd.f32 %v9941_v25, %v5779_v2  ;;  %v5498_v9 = vpop.f32.mrf.mxu1  ;;  %v5784_v21 = vadd.f32 %v7168_v27, %v5752_v33 }
 0x439   : > { %v5663_v39 = vpop.f32.mrf.mxu0  ;;  %v5724_v0 = vadd.f32 %v5498_v9, %v10836_v11 }
 0x43a   : > { %5911 = vst [vmem:[%s9972_s24 + $0xa0] sm:$0xff] %v5879_v45  ;;  %v5882_v4 = vmax.f32 %v5850_v48, 0.0  ;;  %v5848_v41 = vadd.f32 %v10831_v54, %v5816_v59  ;;  %v5821_v55 = vadd.f32 %v9941_v25, %v5784_v21  ;;  %v5500_v30 = vpop.f32.mrf.mxu1  ;;  %v5782_v34 = vadd.f32 %v5750_v10, %v5663_v39  ;;  %v10842_v39 = vld [vmem:[#allocation60_spill] sm:$0xff] }
 0x43b   : > { %v7169_v16 = vpop.f32.mrf.mxu0  ;;  %v5754_v19 = vadd.f32 %v5722_v46, %v5500_v30 }
 0x43c   : > { %5914 = vst [vmem:[%s9972_s24 + $0xb8] sm:$0xff] %v5882_v4  ;;  %v5880_v60 = vmax.f32 %v5848_v41, 0.0  ;;  %v5853_v28 = vadd.f32 %v10832_v15, %v5821_v55  ;;  %v5819_v5 = vadd.f32 %v9941_v25, %v5782_v34  ;;  %v5502_v3 = vpop.f32.mrf.mxu1  ;;  %v5785_v26 = vadd.f32 %v7169_v16, %v5753_v53 }
 0x43d   : > { %v5666_v37 = vpop.f32.mrf.mxu0  ;;  %v5725_v2 = vadd.f32 %v5502_v3, %v10839_v44 }
 0x43e   : > { %5912 = vst [vmem:[%s9972_s24 + $0xa8] sm:$0xff] %v5880_v60  ;;  %v5885_v63 = vmax.f32 %v5853_v28, 0.0  ;;  %v5851_v57 = vadd.f32 %v10834_v47, %v5819_v5  ;;  %v5822_v58 = vadd.f32 %v9941_v25, %v5785_v26  ;;  %v5504_v20 = vpop.f32.mrf.mxu1  ;;  %v5783_v51 = vadd.f32 %v5751_v17, %v5666_v37  ;;  %v10843_v17 = vld [vmem:[#allocation62_spill] sm:$0xff] }
 0x43f   : > { %v7172_v6 = vpop.f32.mrf.mxu0  ;;  %v5755_v7 = vadd.f32 %v5723_v61, %v5504_v20 }
 0x440   : > { %5917 = vst [vmem:[%s9972_s24 + $0xd0] sm:$0xff] %v5885_v63  ;;  %v5883_v18 = vmax.f32 %v5851_v57, 0.0  ;;  %v5854_v13 = vadd.f32 %v10835_v32, %v5822_v58  ;;  %v5820_v38 = vadd.f32 %v9941_v25, %v5783_v51  ;;  %v5508_v56 = vpop.f32.mrf.mxu1 }
 0x441   : > { %v5679_v31 = vpop.f32.mrf.mxu0 }
 0x442   : > { %5915 = vst [vmem:[%s9972_s24 + $0xc0] sm:$0xff] %v5883_v18  ;;  %v5886_v8 = vmax.f32 %v5854_v13, 0.0  ;;  %v5852_v50 = vadd.f32 %v10838_v35, %v5820_v38  ;;  %v5509_v1 = vpop.f32.mrf.mxu1  ;;  %v5786_v14 = vadd.f32 %v5754_v19, %v5679_v31 }
 0x443   : > { %v5756_v33 = vadd.f32 %v5724_v0, %v5509_v1  ;;  %v7173_v22 = vpop.f32.mrf.mxu0 }
 0x444   : > { %5918 = vst [vmem:[%s9972_s24 + $0xd8] sm:$0xff] %v5886_v8  ;;  %v5884_v36 = vmax.f32 %v5852_v50, 0.0  ;;  %v5823_v42 = vadd.f32 %v9941_v25, %v5786_v14  ;;  %v5511_v29 = vpop.f32.mrf.mxu1 }
 0x445   : > { %v5788_v10 = vadd.f32 %v7172_v6, %v5756_v33  ;;  %v5682_v40 = vpop.f32.mrf.mxu0 }
 0x446   : > { %5916 = vst [vmem:[%s9972_s24 + $0xc8] sm:$0xff] %v5884_v36  ;;  %v5855_v62 = vadd.f32 %v10840_v24, %v5823_v42  ;;  %v5512_v27 = vpop.f32.mrf.mxu1  ;;  %v5787_v45 = vadd.f32 %v5755_v7, %v5682_v40 }
 0x447   : > { %v5825_v23 = vadd.f32 %v9941_v25, %v5788_v10  ;;  %v5757_v48 = vadd.f32 %v5725_v2, %v5512_v27 }
 0x448   : > { %v5887_v59 = vmax.f32 %v5855_v62, 0.0  ;;  %v5824_v9 = vadd.f32 %v9941_v25, %v5787_v45  ;;  %v5516_v21 = vpop.f32.mrf.mxu1 }
 0x449   : > { %v5857_v43 = vadd.f32 %v10841_v12, %v5825_v23  ;;  %v5789_v53 = vadd.f32 %v7173_v22, %v5757_v48 }
 0x44a   : > { %5919 = vst [vmem:[%s9972_s24 + $0xe0] sm:$0xff] %v5887_v59  ;;  %v5856_v4 = vadd.f32 %v10842_v39, %v5824_v9  ;;  %v5517_v54 = vpop.f32.mrf.mxu1 }
 0x44b   : > { %v5889_v41 = vmax.f32 %v5857_v43, 0.0  ;;  %v5826_v55 = vadd.f32 %v9941_v25, %v5789_v53 }
 0x44c   : > { %v5888_v30 = vmax.f32 %v5856_v4, 0.0  ;;  %v5518_v34 = vpop.f32.mrf.mxu1 }
 0x44d   : > { %5921 = vst [vmem:[%s9972_s24 + $0xf0] sm:$0xff] %v5889_v41  ;;  %v5858_v16 = vadd.f32 %v10843_v17, %v5826_v55 }
 0x44e   : > { %5920 = vst [vmem:[%s9972_s24 + $0xe8] sm:$0xff] %v5888_v30  ;;  %v5519_v60 = vpop.f32.mrf.mxu1 }
 0x44f   : > { %v5890_v25 = vmax.f32 %v5858_v16, 0.0 }
 0x451   : > { %5922 = vst [vmem:[%s9972_s24 + $0xf8] sm:$0xff] %v5890_v25 }
 0x452   : > { %7541 = shalt.err (!%p7538_p9)
}
 0x453   : > { %s7542_s23 = scalar_lea.hbm %s10149_s8, 4096  ;;  %s7546_s6 = scalar_lea.hbm %s10199_s4, 8192 }
 0x454   : > { %p7543_p13 = scmp.ne.s32.totalorder %s10149_s8, %s7542_s23  ;;  %p7547_p4 = scmp.lt.s32.totalorder %s10149_s8, %s10199_s4 }
 0x455   : > { %p7548_p8 = scmp.lt.s32.totalorder %s7546_s6, %s7542_s23 }
 0x456   : > { %p7544_p5 = pnand %p7543_p13, %p10844_p10 }
 0x457   : > { %p7549_p3 = por %p7548_p8, %p7547_p4 }
 0x458   : > { %p7545_p0 = pneg %p7544_p5 }
 0x45a   : > { %p7550_p11 = pnand %p7549_p3, %p7545_p0 }
 0x45c   : > { %7553 = shalt.err (!%p7550_p11)
}
 0x45d   : > { %s7610_s24 = smov 128   ;;  %s7611_s26 = smov 8  }
 0x45e   : > { %7184 = dma.vmem_to_hbm [thread:$0]  (%p10844_p10), %s10151_s27, 4096, %s10149_s8, %s5924_s19, %s7610_s24, %s7610_s24, %s7611_s26  }
 0x45f PF: > { %s5952_s28 = sand.u32 1, %s7584_s15   ;;  %p10845_p1 = scmp.ne.s32.totalorder %s10400_s22, 0 }
 0x460   : > { %p10846_p2 = scmp.ge.s32.totalorder %s7596_s18, 2  ;;  %s5953_s30 = scalar_lea.sflag [#allocation6], %s5952_s28 }
 0x462   : > { %p7198_p6 = pnand %p10846_p2, %p10845_p1 }
 0x464   : > { %p7199_p12 = pneg %p7198_p6 }
 0x466   : > { %7579 = dma.done.wait (%p7199_p12), %s5953_s30, 4096  }
 0x467   : > { %7581 = vsyncadd (%p7199_p12), %s5953_s30, 4294963200  ;;  %p18_p7 = scmp.ge.s32.totalorder %s7709_s11, 4   ;;  %s10847_s15 = smov %s7588_s16 }
 0x468   : > { %s10848_s16 = smov %s7592_s17  ;;  %s10849_s17 = smov %s7725_s20 }
 0x469   : > { %s10850_s18 = smov %s7709_s11  ;;  %20 = sbr.rel (!%p18_p7) target bundleno = 6 (0x6), region = 93 }
 0x46e   :  { %5958 = vsyncpa [#allocation5], 1 }
 0x46f   :  { %5960 = vsyncpa [#allocation5 + $0x1], 1 }
 0x470   :  { %5961 = vsyncpa [#allocation8], 1 }
 0x471   :  { %5962 = vsyncpa [#allocation6], 1 }
 0x472   :  { %5964 = vsyncpa [#allocation6 + $0x1], 1 }

</bundles_post_ra>
